<compile_context>
chip_gen: v7x
topology: tpu7x:2x2x1
jax: 0.10.0
libtpu: 0.0.40
codegen_flags: <defaults>
</compile_context>

<pallas_src>
import math

import numpy as np
import jax
import jax.numpy as jnp
from jax import lax
from jax.experimental import pallas as pl
from jax.experimental.pallas import tpu as pltpu


def _edge_masks(H, W):
    """(2, H*W) f32 column masks over the flattened per-image pixel axis.
    Row 0: 0.0 where x == 0     (kills the row-wrap of dx = -1 taps)
    Row 1: 0.0 where x == W-1   (kills the row-wrap of dx = +1 taps)
    dy out-of-range taps need no mask: they land in the zero halo of the
    padded line buffer (which emulates the conv's zero padding)."""
    xcol = np.arange(H * W) % W
    return np.stack([(xcol != 0), (xcol != W - 1)]).astype(np.float32)


def make_hsarb_kernel(C, WD, S, H, W, HW, K9, KP, PAD):
    def kernel(x_ref, w1_ref, b1_ref, wc_ref, bc_ref, w3_ref, b3_ref, em_ref,
               o_ref, win_ref, stk_ref, out1_ref):
        # Cheap per-step init (unconditional so "parallel" sharding on v7x keeps
        # every core's scratch initialized): zero only the halo lanes of the line
        # buffer and only the K-padding rows of the stacked buffer (those meet
        # zero weight columns, but stale-VMEM NaN * 0 would poison the MXU).
        win_ref[:, pl.ds(0, PAD)] = jnp.zeros((WD, PAD), jnp.float32)
        win_ref[:, pl.ds(PAD + HW, PAD)] = jnp.zeros((WD, PAD), jnp.float32)
        if KP > K9:
            stk_ref[pl.ds(K9, KP - K9), :] = jnp.zeros((KP - K9, HW), jnp.float32)

        # Edge masks broadcast once (hoisted; never re-materialized per tap/branch).
        eml = jnp.broadcast_to(em_ref[pl.ds(0, 1), :], (WD, HW))   # dx = -1 taps
        emr = jnp.broadcast_to(em_ref[pl.ds(1, 1), :], (WD, HW))   # dx = +1 taps

        # conv1 (1x1) == (Cout, Cin) @ (Cin, H*W), staged in VMEM so the
        # per-branch channel chunks are plain sublane-offset reads.
        out1_ref[...] = (
            jnp.dot(w1_ref[...], x_ref[...], preferred_element_type=jnp.float32)
            + b1_ref[...])

        def stacked_windows(sp):
            """sp: (WD, HW).  Writes stk_ref rows [t*WD:(t+1)*WD] = sp spatially
            shifted by tap t (zero outside the image).  Edge masks are folded
            into the write; dx == 0 taps (incl. the centre tap) need no mask."""
            win_ref[:, pl.ds(PAD, HW)] = sp            # interior; halo stays zero
            for t in range(9):
                dy, dx = t // 3 - 1, t % 3 - 1
                src = win_ref[:, pl.ds(PAD + dy * W + dx, HW)]  # static lane shift
                if dx == -1:
                    src = src * eml
                elif dx == 1:
                    src = src * emr
                stk_ref[pl.ds(t * WD, WD), :] = src
            return stk_ref[...]

        # conv3 accumulator; bias broadcast hoisted (once, not per branch).
        # (C, HW) is a couple of vregs at this tile size; switch to a VMEM
        # accumulator if/when the lane tile grows.
        acc3 = jnp.broadcast_to(b3_ref[...], (C, HW)).astype(jnp.float32)

        sp = out1_ref[pl.ds(0, WD), :]                 # spx[0]
        for k in range(S):
            if k > 0:
                sp = sp + out1_ref[pl.ds(k * WD, WD), :]      # sp + spx[k]
            # branch 3x3 conv: single K = 9*WD MXU matmul + bias + relu
            sp = jnp.maximum(
                jnp.dot(wc_ref[k], stacked_windows(sp),
                        preferred_element_type=jnp.float32) + bc_ref[k], 0.0)
            # fused concat + conv3: accumulate this chunk's contribution
            acc3 = acc3 + jnp.dot(w3_ref[k], stacked_windows(sp),
                                  preferred_element_type=jnp.float32)

        # conv3(out) * 0.1 + x   (lane-dense, unmasked full-tile store)
        o_ref[...] = (acc3 * 0.1 + x_ref[...]).astype(o_ref.dtype)

    return kernel


def hsarb_forward(x, params, *, width, scale):
    """x: (N, C, H, W) NCHW.  Params in PyTorch layouts:
       w1 (S*WD, C, 1, 1), b1 (S*WD,), wc (S, WD, WD, 3, 3), bc (S, WD),
       w3 (C, S*WD, 3, 3), b3 (C,)."""
    w1, b1, wc, bc, w3, b3 = params
    N, C, H, W = x.shape
    WD, S = width, scale
    HW = H * W
    K9 = 9 * WD
    KP = ((K9 + 7) // 8) * 8                 # contraction dim padded to sublane mult
    PAD = ((W + 1 + 127) // 128) * 128       # line-buffer lane padding
    assert PAD >= W + 1, "line-buffer halo must cover the largest tap shift"

    # ---- wrapper-side layout plumbing (lane-dense per-image blocks, fused weights)
    x3d = x.reshape(N, C, HW)                # no transpose needed: batch on the grid
    w1m = w1.reshape(S * WD, C)
    b1m = b1.reshape(S * WD, 1)
    wcf = jnp.pad(jnp.transpose(wc, (0, 1, 3, 4, 2)).reshape(S, WD, K9),
                  ((0, 0), (0, 0), (0, KP - K9)))                    # (S, WD, KP)
    bcm = bc.reshape(S, WD, 1)
    w3f = jnp.pad(jnp.transpose(w3.reshape(C, S, WD, 3, 3),
                                (1, 0, 3, 4, 2)).reshape(S, C, K9),
                  ((0, 0), (0, 0), (0, KP - K9)))                    # (S, C, KP)
    b3m = b3.reshape(C, 1)
    em = jnp.asarray(_edge_masks(H, W))                              # (2, HW), tiny

    kernel = make_hsarb_kernel(C, WD, S, H, W, HW, K9, KP, PAD)

    flops = 2 * N * HW * (S * WD * C + S * (WD + C) * KP)
    bytes_accessed = 4 * (2 * N * C * HW + 2 * HW
                          + S * WD * C + S * (WD + C) * KP + S * WD + C)

    out3d = pl.pallas_call(
        kernel,
        out_shape=jax.ShapeDtypeStruct((N, C, HW), x.dtype),
        grid_spec=pltpu.PrefetchScalarGridSpec(
            num_scalar_prefetch=0,
            grid=(N,),                       # one step per image, parallel on v7x
            in_specs=[
                pl.BlockSpec((None, C, HW), lambda i: (i, 0, 0)),
                pl.BlockSpec((S * WD, C), lambda i: (0, 0)),
                pl.BlockSpec((S * WD, 1), lambda i: (0, 0)),
                pl.BlockSpec((S, WD, KP), lambda i: (0, 0, 0)),
                pl.BlockSpec((S, WD, 1), lambda i: (0, 0, 0)),
                pl.BlockSpec((S, C, KP), lambda i: (0, 0, 0)),
                pl.BlockSpec((C, 1), lambda i: (0, 0)),
                pl.BlockSpec((2, HW), lambda i: (0, 0)),
            ],
            out_specs=pl.BlockSpec((None, C, HW), lambda i: (i, 0, 0)),
            scratch_shapes=[
                pltpu.VMEM((WD, HW + 2 * PAD), jnp.float32),   # padded line buffer
                pltpu.VMEM((KP, HW), jnp.float32),             # stacked windows
                pltpu.VMEM((S * WD, HW), jnp.float32),         # conv1 output
            ],
        ),
        compiler_params=pltpu.CompilerParams(
            dimension_semantics=("parallel",)),
        cost_estimate=pl.CostEstimate(flops=flops, transcendentals=0,
                                      bytes_accessed=bytes_accessed),
    )(x3d, w1m, b1m, wcf, bcm, w3f, b3m, em)

    return out3d.reshape(N, C, H, W)


def hsarb_reference(x, params, *, width, scale):
    """Pure-JAX NCHW reference matching the PyTorch forward semantics."""
    w1, b1, wc, bc, w3, b3 = params
    WD, S = width, scale
    dn = ("NCHW", "OIHW", "NCHW")

    def conv(xx, ww, bb, pad):
        y = lax.conv_general_dilated(xx, ww, (1, 1), pad, dimension_numbers=dn)
        return y + bb.reshape(1, -1, 1, 1)

    out = conv(x, w1, b1, "VALID")
    spx = [out[:, k * WD:(k + 1) * WD] for k in range(S)]
    sp = jax.nn.relu(conv(spx[0], wc[0], bc[0], "SAME"))
    outs = [sp]
    for k in range(S - 1):
        sp = sp + spx[k + 1]
        sp = jax.nn.relu(conv(sp, wc[k + 1], bc[k + 1], "SAME"))
        outs.append(sp)
    cat = jnp.concatenate(outs, axis=1)
    return conv(cat, w3, b3, "SAME") * 0.1 + x


if __name__ == "__main__":
    n_feats = 8
    baseWidth, scale = 32, 4
    width = int(math.floor(n_feats * (baseWidth / 64.0)))   # = 4
    N, H, W = 2, 16, 16

    key = jax.random.PRNGKey(0)
    ks = jax.random.split(key, 7)
    x = jax.random.normal(ks[0], (N, n_feats, H, W), jnp.float32)
    w1 = jax.random.normal(ks[1], (width * scale, n_feats, 1, 1), jnp.float32) * 0.1
    b1 = jax.random.normal(ks[2], (width * scale,), jnp.float32) * 0.1
    wc = jax.random.normal(ks[3], (scale, width, width, 3, 3), jnp.float32) * 0.1
    bc = jax.random.normal(ks[4], (scale, width), jnp.float32) * 0.1
    w3 = jax.random.normal(ks[5], (n_feats, width * scale, 3, 3), jnp.float32) * 0.1
    b3 = jax.random.normal(ks[6], (n_feats,), jnp.float32) * 0.1
    params = (w1, b1, wc, bc, w3, b3)

    y = hsarb_forward(x, params, width=width, scale=scale)
    y = jax.block_until_ready(y)

    y_ref = hsarb_reference(x, params, width=width, scale=scale)
    err = float(jnp.max(jnp.abs(y - y_ref)))
    assert jnp.allclose(y, y_ref, atol=1e-3, rtol=1e-3), f"max abs err = {err}"
    print("KERNEL_OK")
</pallas_src>

<mosaic_0001>
module attributes {stable_mosaic.version = 11 : i64} {
  func.func @kernel(%arg0: i32, %arg1: memref<1x8x256xf32, #tpu.memory_space<vmem>>, %arg2: memref<16x8xf32, #tpu.memory_space<vmem>>, %arg3: memref<16x1xf32, #tpu.memory_space<vmem>>, %arg4: memref<4x4x40xf32, #tpu.memory_space<vmem>>, %arg5: memref<4x4x1xf32, #tpu.memory_space<vmem>>, %arg6: memref<4x8x40xf32, #tpu.memory_space<vmem>>, %arg7: memref<8x1xf32, #tpu.memory_space<vmem>>, %arg8: memref<2x256xf32, #tpu.memory_space<vmem>>, %arg9: memref<1x8x256xf32, #tpu.memory_space<vmem>>, %arg10: memref<4x512xf32, #tpu.memory_space<vmem>>, %arg11: memref<40x256xf32, #tpu.memory_space<vmem>>, %arg12: memref<16x256xf32, #tpu.memory_space<vmem>>) attributes {dimension_semantics = [#tpu.dimension_semantics<parallel>], iteration_bounds = array<i64: 2>, scalar_prefetch = 0 : i64, scratch_operands = 3 : i64, tpu.core_type = #tpu.core_type<tc>, window_params = [{transform_indices = @transform_0, window_bounds = array<i64: 1, 8, 256>}, {pipeline_mode = #tpu.pipeline_mode<synchronous>, transform_indices = @transform_1, window_bounds = array<i64: 16, 8>}, {pipeline_mode = #tpu.pipeline_mode<synchronous>, transform_indices = @transform_2, window_bounds = array<i64: 16, 1>}, {pipeline_mode = #tpu.pipeline_mode<synchronous>, transform_indices = @transform_3, window_bounds = array<i64: 4, 4, 40>}, {pipeline_mode = #tpu.pipeline_mode<synchronous>, transform_indices = @transform_4, window_bounds = array<i64: 4, 4, 1>}, {pipeline_mode = #tpu.pipeline_mode<synchronous>, transform_indices = @transform_5, window_bounds = array<i64: 4, 8, 40>}, {pipeline_mode = #tpu.pipeline_mode<synchronous>, transform_indices = @transform_6, window_bounds = array<i64: 8, 1>}, {pipeline_mode = #tpu.pipeline_mode<synchronous>, transform_indices = @transform_7, window_bounds = array<i64: 2, 256>}, {transform_indices = @transform_8, window_bounds = array<i64: 1, 8, 256>}]} {
    %cst = arith.constant 0.000000e+00 : f32
    %0 = vector.broadcast %cst : f32 to vector<4x128xf32>
    %c0 = arith.constant 0 : index
    %c0_0 = arith.constant 0 : index
    %1 = vector.load %arg10[%c0, %c0_0] : memref<4x512xf32, #tpu.memory_space<vmem>>, vector<4x128xf32>
    tpu.vector_store %arg10[%c0, %c0_0], %0 {strides = array<i32>} : memref<4x512xf32, #tpu.memory_space<vmem>>, vector<4x128xf32>,
    %cst_1 = arith.constant 0.000000e+00 : f32
    %2 = vector.broadcast %cst_1 : f32 to vector<4x128xf32>
    %c0_2 = arith.constant 0 : index
    %c384 = arith.constant 384 : index
    %3 = vector.load %arg10[%c0_2, %c384] : memref<4x512xf32, #tpu.memory_space<vmem>>, vector<4x128xf32>
    tpu.vector_store %arg10[%c0_2, %c384], %2 {strides = array<i32>} : memref<4x512xf32, #tpu.memory_space<vmem>>, vector<4x128xf32>,
    %cst_3 = arith.constant 0.000000e+00 : f32
    %4 = vector.broadcast %cst_3 : f32 to vector<4x256xf32>
    %c36 = arith.constant 36 : index
    %c0_4 = arith.constant 0 : index
    %5 = vector.load %arg11[%c36, %c0_4] : memref<40x256xf32, #tpu.memory_space<vmem>>, vector<4x256xf32>
    tpu.vector_store %arg11[%c36, %c0_4], %4 {strides = array<i32>} : memref<40x256xf32, #tpu.memory_space<vmem>>, vector<4x256xf32>,
    %c0_5 = arith.constant 0 : index
    %c0_6 = arith.constant 0 : index
    %6 = vector.load %arg8[%c0_5, %c0_6] : memref<2x256xf32, #tpu.memory_space<vmem>>, vector<1x256xf32>
    %7 = vector.shape_cast %6 : vector<1x256xf32> to vector<1x256xf32>
    %8 = vector.broadcast %7 : vector<1x256xf32> to vector<4x256xf32>
    %c1 = arith.constant 1 : index
    %c0_7 = arith.constant 0 : index
    %9 = vector.load %arg8[%c1, %c0_7] : memref<2x256xf32, #tpu.memory_space<vmem>>, vector<1x256xf32>
    %10 = vector.shape_cast %9 : vector<1x256xf32> to vector<1x256xf32>
    %11 = vector.broadcast %10 : vector<1x256xf32> to vector<4x256xf32>
    %c0_8 = arith.constant 0 : index
    %c0_9 = arith.constant 0 : index
    %12 = vector.load %arg2[%c0_8, %c0_9] : memref<16x8xf32, #tpu.memory_space<vmem>>, vector<16x8xf32>
    %c0_10 = arith.constant 0 : index
    %c0_11 = arith.constant 0 : index
    %c0_12 = arith.constant 0 : index
    %13 = vector.load %arg1[%c0_10, %c0_11, %c0_12] : memref<1x8x256xf32, #tpu.memory_space<vmem>>, vector<1x8x256xf32>
    %14 = vector.shape_cast %13 : vector<1x8x256xf32> to vector<8x256xf32>
    %cst_13 = arith.constant dense<0.000000e+00> : vector<16x256xf32>
    %15 = tpu.matmul %12, %14, %cst_13 {dimension_numbers = #tpu.dot_dimension_numbers<[1], [0], [0], [1], [0, 0, 1, 1], [], []>} : vector<16x8xf32>, vector<8x256xf32>, vector<16x256xf32> -> vector<16x256xf32>
    %c0_14 = arith.constant 0 : index
    %c0_15 = arith.constant 0 : index
    %16 = vector.load %arg3[%c0_14, %c0_15] : memref<16x1xf32, #tpu.memory_space<vmem>>, vector<16x1xf32>
    %17 = vector.broadcast %16 : vector<16x1xf32> to vector<16x256xf32>
    %18 = arith.addf %15, %17 : vector<16x256xf32>
    %c0_16 = arith.constant 0 : index
    %c0_17 = arith.constant 0 : index
    %19 = vector.load %arg12[%c0_16, %c0_17] : memref<16x256xf32, #tpu.memory_space<vmem>>, vector<16x256xf32>
    tpu.vector_store %arg12[%c0_16, %c0_17], %18 {strides = array<i32>} : memref<16x256xf32, #tpu.memory_space<vmem>>, vector<16x256xf32>,
    %c0_18 = arith.constant 0 : index
    %c0_19 = arith.constant 0 : index
    %20 = vector.load %arg7[%c0_18, %c0_19] : memref<8x1xf32, #tpu.memory_space<vmem>>, vector<8x1xf32>
    %21 = vector.shape_cast %20 : vector<8x1xf32> to vector<8x1xf32>
    %22 = vector.broadcast %21 : vector<8x1xf32> to vector<8x256xf32>
    %c0_20 = arith.constant 0 : index
    %c0_21 = arith.constant 0 : index
    %23 = vector.load %arg12[%c0_20, %c0_21] : memref<16x256xf32, #tpu.memory_space<vmem>>, vector<4x256xf32>
    %c0_22 = arith.constant 0 : index
    %c0_23 = arith.constant 0 : index
    %c0_24 = arith.constant 0 : index
    %24 = vector.load %arg4[%c0_22, %c0_23, %c0_24] : memref<4x4x40xf32, #tpu.memory_space<vmem>>, vector<1x4x40xf32>
    %25 = vector.shape_cast %24 : vector<1x4x40xf32> to vector<4x40xf32>
    %c0_25 = arith.constant 0 : index
    %c128 = arith.constant 128 : index
    %26 = vector.load %arg10[%c0_25, %c128] : memref<4x512xf32, #tpu.memory_space<vmem>>, vector<4x256xf32>
    tpu.vector_store %arg10[%c0_25, %c128], %23 {strides = array<i32>} : memref<4x512xf32, #tpu.memory_space<vmem>>, vector<4x256xf32>,
    %c0_26 = arith.constant 0 : index
    %c111 = arith.constant 111 : index
    %27 = vector.load %arg10[%c0_26, %c111] : memref<4x512xf32, #tpu.memory_space<vmem>>, vector<4x256xf32>
    %28 = arith.mulf %27, %8 : vector<4x256xf32>
    %c0_27 = arith.constant 0 : index
    %c0_28 = arith.constant 0 : index
    %29 = vector.load %arg11[%c0_27, %c0_28] : memref<40x256xf32, #tpu.memory_space<vmem>>, vector<4x256xf32>
    tpu.vector_store %arg11[%c0_27, %c0_28], %28 {strides = array<i32>} : memref<40x256xf32, #tpu.memory_space<vmem>>, vector<4x256xf32>,
    %c0_29 = arith.constant 0 : index
    %c112 = arith.constant 112 : index
    %30 = vector.load %arg10[%c0_29, %c112] : memref<4x512xf32, #tpu.memory_space<vmem>>, vector<4x256xf32>
    %c4 = arith.constant 4 : index
    %c0_30 = arith.constant 0 : index
    %31 = vector.load %arg11[%c4, %c0_30] : memref<40x256xf32, #tpu.memory_space<vmem>>, vector<4x256xf32>
    tpu.vector_store %arg11[%c4, %c0_30], %30 {strides = array<i32>} : memref<40x256xf32, #tpu.memory_space<vmem>>, vector<4x256xf32>,
    %c0_31 = arith.constant 0 : index
    %c113 = arith.constant 113 : index
    %32 = vector.load %arg10[%c0_31, %c113] : memref<4x512xf32, #tpu.memory_space<vmem>>, vector<4x256xf32>
    %33 = arith.mulf %32, %11 : vector<4x256xf32>
    %c8 = arith.constant 8 : index
    %c0_32 = arith.constant 0 : index
    %34 = vector.load %arg11[%c8, %c0_32] : memref<40x256xf32, #tpu.memory_space<vmem>>, vector<4x256xf32>
    tpu.vector_store %arg11[%c8, %c0_32], %33 {strides = array<i32>} : memref<40x256xf32, #tpu.memory_space<vmem>>, vector<4x256xf32>,
    %c0_33 = arith.constant 0 : index
    %c127 = arith.constant 127 : index
    %35 = vector.load %arg10[%c0_33, %c127] : memref<4x512xf32, #tpu.memory_space<vmem>>, vector<4x256xf32>
    %36 = arith.mulf %35, %8 : vector<4x256xf32>
    %c12 = arith.constant 12 : index
    %c0_34 = arith.constant 0 : index
    %37 = vector.load %arg11[%c12, %c0_34] : memref<40x256xf32, #tpu.memory_space<vmem>>, vector<4x256xf32>
    tpu.vector_store %arg11[%c12, %c0_34], %36 {strides = array<i32>} : memref<40x256xf32, #tpu.memory_space<vmem>>, vector<4x256xf32>,
    %c0_35 = arith.constant 0 : index
    %c128_36 = arith.constant 128 : index
    %38 = vector.load %arg10[%c0_35, %c128_36] : memref<4x512xf32, #tpu.memory_space<vmem>>, vector<4x256xf32>
    %c16 = arith.constant 16 : index
    %c0_37 = arith.constant 0 : index
    %39 = vector.load %arg11[%c16, %c0_37] : memref<40x256xf32, #tpu.memory_space<vmem>>, vector<4x256xf32>
    tpu.vector_store %arg11[%c16, %c0_37], %38 {strides = array<i32>} : memref<40x256xf32, #tpu.memory_space<vmem>>, vector<4x256xf32>,
    %c0_38 = arith.constant 0 : index
    %c129 = arith.constant 129 : index
    %40 = vector.load %arg10[%c0_38, %c129] : memref<4x512xf32, #tpu.memory_space<vmem>>, vector<4x256xf32>
    %41 = arith.mulf %40, %11 : vector<4x256xf32>
    %c20 = arith.constant 20 : index
    %c0_39 = arith.constant 0 : index
    %42 = vector.load %arg11[%c20, %c0_39] : memref<40x256xf32, #tpu.memory_space<vmem>>, vector<4x256xf32>
    tpu.vector_store %arg11[%c20, %c0_39], %41 {strides = array<i32>} : memref<40x256xf32, #tpu.memory_space<vmem>>, vector<4x256xf32>,
    %c0_40 = arith.constant 0 : index
    %c143 = arith.constant 143 : index
    %43 = vector.load %arg10[%c0_40, %c143] : memref<4x512xf32, #tpu.memory_space<vmem>>, vector<4x256xf32>
    %44 = arith.mulf %43, %8 : vector<4x256xf32>
    %c24 = arith.constant 24 : index
    %c0_41 = arith.constant 0 : index
    %45 = vector.load %arg11[%c24, %c0_41] : memref<40x256xf32, #tpu.memory_space<vmem>>, vector<4x256xf32>
    tpu.vector_store %arg11[%c24, %c0_41], %44 {strides = array<i32>} : memref<40x256xf32, #tpu.memory_space<vmem>>, vector<4x256xf32>,
    %c0_42 = arith.constant 0 : index
    %c144 = arith.constant 144 : index
    %46 = vector.load %arg10[%c0_42, %c144] : memref<4x512xf32, #tpu.memory_space<vmem>>, vector<4x256xf32>
    %c28 = arith.constant 28 : index
    %c0_43 = arith.constant 0 : index
    %47 = vector.load %arg11[%c28, %c0_43] : memref<40x256xf32, #tpu.memory_space<vmem>>, vector<4x256xf32>
    tpu.vector_store %arg11[%c28, %c0_43], %46 {strides = array<i32>} : memref<40x256xf32, #tpu.memory_space<vmem>>, vector<4x256xf32>,
    %c0_44 = arith.constant 0 : index
    %c145 = arith.constant 145 : index
    %48 = vector.load %arg10[%c0_44, %c145] : memref<4x512xf32, #tpu.memory_space<vmem>>, vector<4x256xf32>
    %49 = arith.mulf %48, %11 : vector<4x256xf32>
    %c32 = arith.constant 32 : index
    %c0_45 = arith.constant 0 : index
    %50 = vector.load %arg11[%c32, %c0_45] : memref<40x256xf32, #tpu.memory_space<vmem>>, vector<4x256xf32>
    tpu.vector_store %arg11[%c32, %c0_45], %49 {strides = array<i32>} : memref<40x256xf32, #tpu.memory_space<vmem>>, vector<4x256xf32>,
    %c0_46 = arith.constant 0 : index
    %c0_47 = arith.constant 0 : index
    %51 = vector.load %arg11[%c0_46, %c0_47] : memref<40x256xf32, #tpu.memory_space<vmem>>, vector<40x256xf32>
    %cst_48 = arith.constant dense<0.000000e+00> : vector<4x256xf32>
    %52 = tpu.matmul %25, %51, %cst_48 {dimension_numbers = #tpu.dot_dimension_numbers<[1], [0], [0], [1], [0, 0, 1, 1], [], []>} : vector<4x40xf32>, vector<40x256xf32>, vector<4x256xf32> -> vector<4x256xf32>
    %c0_49 = arith.constant 0 : index
    %c0_50 = arith.constant 0 : index
    %c0_51 = arith.constant 0 : index
    %53 = vector.load %arg5[%c0_49, %c0_50, %c0_51] : memref<4x4x1xf32, #tpu.memory_space<vmem>>, vector<1x4x1xf32>
    %54 = vector.shape_cast %53 : vector<1x4x1xf32> to vector<4x1xf32>
    %55 = vector.broadcast %54 : vector<4x1xf32> to vector<4x256xf32>
    %56 = arith.addf %52, %55 : vector<4x256xf32>
    %cst_52 = arith.constant 0.000000e+00 : f32
    %57 = vector.broadcast %cst_52 : f32 to vector<4x256xf32>
    %58 = arith.maximumf %56, %57 : vector<4x256xf32>
    %c0_53 = arith.constant 0 : index
    %c0_54 = arith.constant 0 : index
    %c0_55 = arith.constant 0 : index
    %59 = vector.load %arg6[%c0_53, %c0_54, %c0_55] : memref<4x8x40xf32, #tpu.memory_space<vmem>>, vector<1x8x40xf32>
    %60 = vector.shape_cast %59 : vector<1x8x40xf32> to vector<8x40xf32>
    %c0_56 = arith.constant 0 : index
    %c128_57 = arith.constant 128 : index
    %61 = vector.load %arg10[%c0_56, %c128_57] : memref<4x512xf32, #tpu.memory_space<vmem>>, vector<4x256xf32>
    tpu.vector_store %arg10[%c0_56, %c128_57], %58 {strides = array<i32>} : memref<4x512xf32, #tpu.memory_space<vmem>>, vector<4x256xf32>,
    %c0_58 = arith.constant 0 : index
    %c111_59 = arith.constant 111 : index
    %62 = vector.load %arg10[%c0_58, %c111_59] : memref<4x512xf32, #tpu.memory_space<vmem>>, vector<4x256xf32>
    %63 = arith.mulf %62, %8 : vector<4x256xf32>
    %c0_60 = arith.constant 0 : index
    %c0_61 = arith.constant 0 : index
    %64 = vector.load %arg11[%c0_60, %c0_61] : memref<40x256xf32, #tpu.memory_space<vmem>>, vector<4x256xf32>
    tpu.vector_store %arg11[%c0_60, %c0_61], %63 {strides = array<i32>} : memref<40x256xf32, #tpu.memory_space<vmem>>, vector<4x256xf32>,
    %c0_62 = arith.constant 0 : index
    %c112_63 = arith.constant 112 : index
    %65 = vector.load %arg10[%c0_62, %c112_63] : memref<4x512xf32, #tpu.memory_space<vmem>>, vector<4x256xf32>
    %c4_64 = arith.constant 4 : index
    %c0_65 = arith.constant 0 : index
    %66 = vector.load %arg11[%c4_64, %c0_65] : memref<40x256xf32, #tpu.memory_space<vmem>>, vector<4x256xf32>
    tpu.vector_store %arg11[%c4_64, %c0_65], %65 {strides = array<i32>} : memref<40x256xf32, #tpu.memory_space<vmem>>, vector<4x256xf32>,
    %c0_66 = arith.constant 0 : index
    %c113_67 = arith.constant 113 : index
    %67 = vector.load %arg10[%c0_66, %c113_67] : memref<4x512xf32, #tpu.memory_space<vmem>>, vector<4x256xf32>
    %68 = arith.mulf %67, %11 : vector<4x256xf32>
    %c8_68 = arith.constant 8 : index
    %c0_69 = arith.constant 0 : index
    %69 = vector.load %arg11[%c8_68, %c0_69] : memref<40x256xf32, #tpu.memory_space<vmem>>, vector<4x256xf32>
    tpu.vector_store %arg11[%c8_68, %c0_69], %68 {strides = array<i32>} : memref<40x256xf32, #tpu.memory_space<vmem>>, vector<4x256xf32>,
    %c0_70 = arith.constant 0 : index
    %c127_71 = arith.constant 127 : index
    %70 = vector.load %arg10[%c0_70, %c127_71] : memref<4x512xf32, #tpu.memory_space<vmem>>, vector<4x256xf32>
    %71 = arith.mulf %70, %8 : vector<4x256xf32>
    %c12_72 = arith.constant 12 : index
    %c0_73 = arith.constant 0 : index
    %72 = vector.load %arg11[%c12_72, %c0_73] : memref<40x256xf32, #tpu.memory_space<vmem>>, vector<4x256xf32>
    tpu.vector_store %arg11[%c12_72, %c0_73], %71 {strides = array<i32>} : memref<40x256xf32, #tpu.memory_space<vmem>>, vector<4x256xf32>,
    %c0_74 = arith.constant 0 : index
    %c128_75 = arith.constant 128 : index
    %73 = vector.load %arg10[%c0_74, %c128_75] : memref<4x512xf32, #tpu.memory_space<vmem>>, vector<4x256xf32>
    %c16_76 = arith.constant 16 : index
    %c0_77 = arith.constant 0 : index
    %74 = vector.load %arg11[%c16_76, %c0_77] : memref<40x256xf32, #tpu.memory_space<vmem>>, vector<4x256xf32>
    tpu.vector_store %arg11[%c16_76, %c0_77], %73 {strides = array<i32>} : memref<40x256xf32, #tpu.memory_space<vmem>>, vector<4x256xf32>,
    %c0_78 = arith.constant 0 : index
    %c129_79 = arith.constant 129 : index
    %75 = vector.load %arg10[%c0_78, %c129_79] : memref<4x512xf32, #tpu.memory_space<vmem>>, vector<4x256xf32>
    %76 = arith.mulf %75, %11 : vector<4x256xf32>
    %c20_80 = arith.constant 20 : index
    %c0_81 = arith.constant 0 : index
    %77 = vector.load %arg11[%c20_80, %c0_81] : memref<40x256xf32, #tpu.memory_space<vmem>>, vector<4x256xf32>
    tpu.vector_store %arg11[%c20_80, %c0_81], %76 {strides = array<i32>} : memref<40x256xf32, #tpu.memory_space<vmem>>, vector<4x256xf32>,
    %c0_82 = arith.constant 0 : index
    %c143_83 = arith.constant 143 : index
    %78 = vector.load %arg10[%c0_82, %c143_83] : memref<4x512xf32, #tpu.memory_space<vmem>>, vector<4x256xf32>
    %79 = arith.mulf %78, %8 : vector<4x256xf32>
    %c24_84 = arith.constant 24 : index
    %c0_85 = arith.constant 0 : index
    %80 = vector.load %arg11[%c24_84, %c0_85] : memref<40x256xf32, #tpu.memory_space<vmem>>, vector<4x256xf32>
    tpu.vector_store %arg11[%c24_84, %c0_85], %79 {strides = array<i32>} : memref<40x256xf32, #tpu.memory_space<vmem>>, vector<4x256xf32>,
    %c0_86 = arith.constant 0 : index
    %c144_87 = arith.constant 144 : index
    %81 = vector.load %arg10[%c0_86, %c144_87] : memref<4x512xf32, #tpu.memory_space<vmem>>, vector<4x256xf32>
    %c28_88 = arith.constant 28 : index
    %c0_89 = arith.constant 0 : index
    %82 = vector.load %arg11[%c28_88, %c0_89] : memref<40x256xf32, #tpu.memory_space<vmem>>, vector<4x256xf32>
    tpu.vector_store %arg11[%c28_88, %c0_89], %81 {strides = array<i32>} : memref<40x256xf32, #tpu.memory_space<vmem>>, vector<4x256xf32>,
    %c0_90 = arith.constant 0 : index
    %c145_91 = arith.constant 145 : index
    %83 = vector.load %arg10[%c0_90, %c145_91] : memref<4x512xf32, #tpu.memory_space<vmem>>, vector<4x256xf32>
    %84 = arith.mulf %83, %11 : vector<4x256xf32>
    %c32_92 = arith.constant 32 : index
    %c0_93 = arith.constant 0 : index
    %85 = vector.load %arg11[%c32_92, %c0_93] : memref<40x256xf32, #tpu.memory_space<vmem>>, vector<4x256xf32>
    tpu.vector_store %arg11[%c32_92, %c0_93], %84 {strides = array<i32>} : memref<40x256xf32, #tpu.memory_space<vmem>>, vector<4x256xf32>,
    %c0_94 = arith.constant 0 : index
    %c0_95 = arith.constant 0 : index
    %86 = vector.load %arg11[%c0_94, %c0_95] : memref<40x256xf32, #tpu.memory_space<vmem>>, vector<40x256xf32>
    %cst_96 = arith.constant dense<0.000000e+00> : vector<8x256xf32>
    %87 = tpu.matmul %60, %86, %cst_96 {dimension_numbers = #tpu.dot_dimension_numbers<[1], [0], [0], [1], [0, 0, 1, 1], [], []>} : vector<8x40xf32>, vector<40x256xf32>, vector<8x256xf32> -> vector<8x256xf32>
    %88 = arith.addf %22, %87 : vector<8x256xf32>
    %c4_97 = arith.constant 4 : index
    %c0_98 = arith.constant 0 : index
    %89 = vector.load %arg12[%c4_97, %c0_98] : memref<16x256xf32, #tpu.memory_space<vmem>>, vector<4x256xf32>
    %90 = arith.addf %58, %89 : vector<4x256xf32>
    %c1_99 = arith.constant 1 : index
    %c0_100 = arith.constant 0 : index
    %c0_101 = arith.constant 0 : index
    %91 = vector.load %arg4[%c1_99, %c0_100, %c0_101] : memref<4x4x40xf32, #tpu.memory_space<vmem>>, vector<1x4x40xf32>
    %92 = vector.shape_cast %91 : vector<1x4x40xf32> to vector<4x40xf32>
    %c0_102 = arith.constant 0 : index
    %c128_103 = arith.constant 128 : index
    %93 = vector.load %arg10[%c0_102, %c128_103] : memref<4x512xf32, #tpu.memory_space<vmem>>, vector<4x256xf32>
    tpu.vector_store %arg10[%c0_102, %c128_103], %90 {strides = array<i32>} : memref<4x512xf32, #tpu.memory_space<vmem>>, vector<4x256xf32>,
    %c0_104 = arith.constant 0 : index
    %c111_105 = arith.constant 111 : index
    %94 = vector.load %arg10[%c0_104, %c111_105] : memref<4x512xf32, #tpu.memory_space<vmem>>, vector<4x256xf32>
    %95 = arith.mulf %94, %8 : vector<4x256xf32>
    %c0_106 = arith.constant 0 : index
    %c0_107 = arith.constant 0 : index
    %96 = vector.load %arg11[%c0_106, %c0_107] : memref<40x256xf32, #tpu.memory_space<vmem>>, vector<4x256xf32>
    tpu.vector_store %arg11[%c0_106, %c0_107], %95 {strides = array<i32>} : memref<40x256xf32, #tpu.memory_space<vmem>>, vector<4x256xf32>,
    %c0_108 = arith.constant 0 : index
    %c112_109 = arith.constant 112 : index
    %97 = vector.load %arg10[%c0_108, %c112_109] : memref<4x512xf32, #tpu.memory_space<vmem>>, vector<4x256xf32>
    %c4_110 = arith.constant 4 : index
    %c0_111 = arith.constant 0 : index
    %98 = vector.load %arg11[%c4_110, %c0_111] : memref<40x256xf32, #tpu.memory_space<vmem>>, vector<4x256xf32>
    tpu.vector_store %arg11[%c4_110, %c0_111], %97 {strides = array<i32>} : memref<40x256xf32, #tpu.memory_space<vmem>>, vector<4x256xf32>,
    %c0_112 = arith.constant 0 : index
    %c113_113 = arith.constant 113 : index
    %99 = vector.load %arg10[%c0_112, %c113_113] : memref<4x512xf32, #tpu.memory_space<vmem>>, vector<4x256xf32>
    %100 = arith.mulf %99, %11 : vector<4x256xf32>
    %c8_114 = arith.constant 8 : index
    %c0_115 = arith.constant 0 : index
    %101 = vector.load %arg11[%c8_114, %c0_115] : memref<40x256xf32, #tpu.memory_space<vmem>>, vector<4x256xf32>
    tpu.vector_store %arg11[%c8_114, %c0_115], %100 {strides = array<i32>} : memref<40x256xf32, #tpu.memory_space<vmem>>, vector<4x256xf32>,
    %c0_116 = arith.constant 0 : index
    %c127_117 = arith.constant 127 : index
    %102 = vector.load %arg10[%c0_116, %c127_117] : memref<4x512xf32, #tpu.memory_space<vmem>>, vector<4x256xf32>
    %103 = arith.mulf %102, %8 : vector<4x256xf32>
    %c12_118 = arith.constant 12 : index
    %c0_119 = arith.constant 0 : index
    %104 = vector.load %arg11[%c12_118, %c0_119] : memref<40x256xf32, #tpu.memory_space<vmem>>, vector<4x256xf32>
    tpu.vector_store %arg11[%c12_118, %c0_119], %103 {strides = array<i32>} : memref<40x256xf32, #tpu.memory_space<vmem>>, vector<4x256xf32>,
    %c0_120 = arith.constant 0 : index
    %c128_121 = arith.constant 128 : index
    %105 = vector.load %arg10[%c0_120, %c128_121] : memref<4x512xf32, #tpu.memory_space<vmem>>, vector<4x256xf32>
    %c16_122 = arith.constant 16 : index
    %c0_123 = arith.constant 0 : index
    %106 = vector.load %arg11[%c16_122, %c0_123] : memref<40x256xf32, #tpu.memory_space<vmem>>, vector<4x256xf32>
    tpu.vector_store %arg11[%c16_122, %c0_123], %105 {strides = array<i32>} : memref<40x256xf32, #tpu.memory_space<vmem>>, vector<4x256xf32>,
    %c0_124 = arith.constant 0 : index
    %c129_125 = arith.constant 129 : index
    %107 = vector.load %arg10[%c0_124, %c129_125] : memref<4x512xf32, #tpu.memory_space<vmem>>, vector<4x256xf32>
    %108 = arith.mulf %107, %11 : vector<4x256xf32>
    %c20_126 = arith.constant 20 : index
    %c0_127 = arith.constant 0 : index
    %109 = vector.load %arg11[%c20_126, %c0_127] : memref<40x256xf32, #tpu.memory_space<vmem>>, vector<4x256xf32>
    tpu.vector_store %arg11[%c20_126, %c0_127], %108 {strides = array<i32>} : memref<40x256xf32, #tpu.memory_space<vmem>>, vector<4x256xf32>,
    %c0_128 = arith.constant 0 : index
    %c143_129 = arith.constant 143 : index
    %110 = vector.load %arg10[%c0_128, %c143_129] : memref<4x512xf32, #tpu.memory_space<vmem>>, vector<4x256xf32>
    %111 = arith.mulf %110, %8 : vector<4x256xf32>
    %c24_130 = arith.constant 24 : index
    %c0_131 = arith.constant 0 : index
    %112 = vector.load %arg11[%c24_130, %c0_131] : memref<40x256xf32, #tpu.memory_space<vmem>>, vector<4x256xf32>
    tpu.vector_store %arg11[%c24_130, %c0_131], %111 {strides = array<i32>} : memref<40x256xf32, #tpu.memory_space<vmem>>, vector<4x256xf32>,
    %c0_132 = arith.constant 0 : index
    %c144_133 = arith.constant 144 : index
    %113 = vector.load %arg10[%c0_132, %c144_133] : memref<4x512xf32, #tpu.memory_space<vmem>>, vector<4x256xf32>
    %c28_134 = arith.constant 28 : index
    %c0_135 = arith.constant 0 : index
    %114 = vector.load %arg11[%c28_134, %c0_135] : memref<40x256xf32, #tpu.memory_space<vmem>>, vector<4x256xf32>
    tpu.vector_store %arg11[%c28_134, %c0_135], %113 {strides = array<i32>} : memref<40x256xf32, #tpu.memory_space<vmem>>, vector<4x256xf32>,
    %c0_136 = arith.constant 0 : index
    %c145_137 = arith.constant 145 : index
    %115 = vector.load %arg10[%c0_136, %c145_137] : memref<4x512xf32, #tpu.memory_space<vmem>>, vector<4x256xf32>
    %116 = arith.mulf %115, %11 : vector<4x256xf32>
    %c32_138 = arith.constant 32 : index
    %c0_139 = arith.constant 0 : index
    %117 = vector.load %arg11[%c32_138, %c0_139] : memref<40x256xf32, #tpu.memory_space<vmem>>, vector<4x256xf32>
    tpu.vector_store %arg11[%c32_138, %c0_139], %116 {strides = array<i32>} : memref<40x256xf32, #tpu.memory_space<vmem>>, vector<4x256xf32>,
    %c0_140 = arith.constant 0 : index
    %c0_141 = arith.constant 0 : index
    %118 = vector.load %arg11[%c0_140, %c0_141] : memref<40x256xf32, #tpu.memory_space<vmem>>, vector<40x256xf32>
    %cst_142 = arith.constant dense<0.000000e+00> : vector<4x256xf32>
    %119 = tpu.matmul %92, %118, %cst_142 {dimension_numbers = #tpu.dot_dimension_numbers<[1], [0], [0], [1], [0, 0, 1, 1], [], []>} : vector<4x40xf32>, vector<40x256xf32>, vector<4x256xf32> -> vector<4x256xf32>
    %c1_143 = arith.constant 1 : index
    %c0_144 = arith.constant 0 : index
    %c0_145 = arith.constant 0 : index
    %120 = vector.load %arg5[%c1_143, %c0_144, %c0_145] : memref<4x4x1xf32, #tpu.memory_space<vmem>>, vector<1x4x1xf32>
    %121 = vector.shape_cast %120 : vector<1x4x1xf32> to vector<4x1xf32>
    %122 = vector.broadcast %121 : vector<4x1xf32> to vector<4x256xf32>
    %123 = arith.addf %119, %122 : vector<4x256xf32>
    %cst_146 = arith.constant 0.000000e+00 : f32
    %124 = vector.broadcast %cst_146 : f32 to vector<4x256xf32>
    %125 = arith.maximumf %123, %124 : vector<4x256xf32>
    %c1_147 = arith.constant 1 : index
    %c0_148 = arith.constant 0 : index
    %c0_149 = arith.constant 0 : index
    %126 = vector.load %arg6[%c1_147, %c0_148, %c0_149] : memref<4x8x40xf32, #tpu.memory_space<vmem>>, vector<1x8x40xf32>
    %127 = vector.shape_cast %126 : vector<1x8x40xf32> to vector<8x40xf32>
    %c0_150 = arith.constant 0 : index
    %c128_151 = arith.constant 128 : index
    %128 = vector.load %arg10[%c0_150, %c128_151] : memref<4x512xf32, #tpu.memory_space<vmem>>, vector<4x256xf32>
    tpu.vector_store %arg10[%c0_150, %c128_151], %125 {strides = array<i32>} : memref<4x512xf32, #tpu.memory_space<vmem>>, vector<4x256xf32>,
    %c0_152 = arith.constant 0 : index
    %c111_153 = arith.constant 111 : index
    %129 = vector.load %arg10[%c0_152, %c111_153] : memref<4x512xf32, #tpu.memory_space<vmem>>, vector<4x256xf32>
    %130 = arith.mulf %129, %8 : vector<4x256xf32>
    %c0_154 = arith.constant 0 : index
    %c0_155 = arith.constant 0 : index
    %131 = vector.load %arg11[%c0_154, %c0_155] : memref<40x256xf32, #tpu.memory_space<vmem>>, vector<4x256xf32>
    tpu.vector_store %arg11[%c0_154, %c0_155], %130 {strides = array<i32>} : memref<40x256xf32, #tpu.memory_space<vmem>>, vector<4x256xf32>,
    %c0_156 = arith.constant 0 : index
    %c112_157 = arith.constant 112 : index
    %132 = vector.load %arg10[%c0_156, %c112_157] : memref<4x512xf32, #tpu.memory_space<vmem>>, vector<4x256xf32>
    %c4_158 = arith.constant 4 : index
    %c0_159 = arith.constant 0 : index
    %133 = vector.load %arg11[%c4_158, %c0_159] : memref<40x256xf32, #tpu.memory_space<vmem>>, vector<4x256xf32>
    tpu.vector_store %arg11[%c4_158, %c0_159], %132 {strides = array<i32>} : memref<40x256xf32, #tpu.memory_space<vmem>>, vector<4x256xf32>,
    %c0_160 = arith.constant 0 : index
    %c113_161 = arith.constant 113 : index
    %134 = vector.load %arg10[%c0_160, %c113_161] : memref<4x512xf32, #tpu.memory_space<vmem>>, vector<4x256xf32>
    %135 = arith.mulf %134, %11 : vector<4x256xf32>
    %c8_162 = arith.constant 8 : index
    %c0_163 = arith.constant 0 : index
    %136 = vector.load %arg11[%c8_162, %c0_163] : memref<40x256xf32, #tpu.memory_space<vmem>>, vector<4x256xf32>
    tpu.vector_store %arg11[%c8_162, %c0_163], %135 {strides = array<i32>} : memref<40x256xf32, #tpu.memory_space<vmem>>, vector<4x256xf32>,
    %c0_164 = arith.constant 0 : index
    %c127_165 = arith.constant 127 : index
    %137 = vector.load %arg10[%c0_164, %c127_165] : memref<4x512xf32, #tpu.memory_space<vmem>>, vector<4x256xf32>
    %138 = arith.mulf %137, %8 : vector<4x256xf32>
    %c12_166 = arith.constant 12 : index
    %c0_167 = arith.constant 0 : index
    %139 = vector.load %arg11[%c12_166, %c0_167] : memref<40x256xf32, #tpu.memory_space<vmem>>, vector<4x256xf32>
    tpu.vector_store %arg11[%c12_166, %c0_167], %138 {strides = array<i32>} : memref<40x256xf32, #tpu.memory_space<vmem>>, vector<4x256xf32>,
    %c0_168 = arith.constant 0 : index
    %c128_169 = arith.constant 128 : index
    %140 = vector.load %arg10[%c0_168, %c128_169] : memref<4x512xf32, #tpu.memory_space<vmem>>, vector<4x256xf32>
    %c16_170 = arith.constant 16 : index
    %c0_171 = arith.constant 0 : index
    %141 = vector.load %arg11[%c16_170, %c0_171] : memref<40x256xf32, #tpu.memory_space<vmem>>, vector<4x256xf32>
    tpu.vector_store %arg11[%c16_170, %c0_171], %140 {strides = array<i32>} : memref<40x256xf32, #tpu.memory_space<vmem>>, vector<4x256xf32>,
    %c0_172 = arith.constant 0 : index
    %c129_173 = arith.constant 129 : index
    %142 = vector.load %arg10[%c0_172, %c129_173] : memref<4x512xf32, #tpu.memory_space<vmem>>, vector<4x256xf32>
    %143 = arith.mulf %142, %11 : vector<4x256xf32>
    %c20_174 = arith.constant 20 : index
    %c0_175 = arith.constant 0 : index
    %144 = vector.load %arg11[%c20_174, %c0_175] : memref<40x256xf32, #tpu.memory_space<vmem>>, vector<4x256xf32>
    tpu.vector_store %arg11[%c20_174, %c0_175], %143 {strides = array<i32>} : memref<40x256xf32, #tpu.memory_space<vmem>>, vector<4x256xf32>,
    %c0_176 = arith.constant 0 : index
    %c143_177 = arith.constant 143 : index
    %145 = vector.load %arg10[%c0_176, %c143_177] : memref<4x512xf32, #tpu.memory_space<vmem>>, vector<4x256xf32>
    %146 = arith.mulf %145, %8 : vector<4x256xf32>
    %c24_178 = arith.constant 24 : index
    %c0_179 = arith.constant 0 : index
    %147 = vector.load %arg11[%c24_178, %c0_179] : memref<40x256xf32, #tpu.memory_space<vmem>>, vector<4x256xf32>
    tpu.vector_store %arg11[%c24_178, %c0_179], %146 {strides = array<i32>} : memref<40x256xf32, #tpu.memory_space<vmem>>, vector<4x256xf32>,
    %c0_180 = arith.constant 0 : index
    %c144_181 = arith.constant 144 : index
    %148 = vector.load %arg10[%c0_180, %c144_181] : memref<4x512xf32, #tpu.memory_space<vmem>>, vector<4x256xf32>
    %c28_182 = arith.constant 28 : index
    %c0_183 = arith.constant 0 : index
    %149 = vector.load %arg11[%c28_182, %c0_183] : memref<40x256xf32, #tpu.memory_space<vmem>>, vector<4x256xf32>
    tpu.vector_store %arg11[%c28_182, %c0_183], %148 {strides = array<i32>} : memref<40x256xf32, #tpu.memory_space<vmem>>, vector<4x256xf32>,
    %c0_184 = arith.constant 0 : index
    %c145_185 = arith.constant 145 : index
    %150 = vector.load %arg10[%c0_184, %c145_185] : memref<4x512xf32, #tpu.memory_space<vmem>>, vector<4x256xf32>
    %151 = arith.mulf %150, %11 : vector<4x256xf32>
    %c32_186 = arith.constant 32 : index
    %c0_187 = arith.constant 0 : index
    %152 = vector.load %arg11[%c32_186, %c0_187] : memref<40x256xf32, #tpu.memory_space<vmem>>, vector<4x256xf32>
    tpu.vector_store %arg11[%c32_186, %c0_187], %151 {strides = array<i32>} : memref<40x256xf32, #tpu.memory_space<vmem>>, vector<4x256xf32>,
    %c0_188 = arith.constant 0 : index
    %c0_189 = arith.constant 0 : index
    %153 = vector.load %arg11[%c0_188, %c0_189] : memref<40x256xf32, #tpu.memory_space<vmem>>, vector<40x256xf32>
    %cst_190 = arith.constant dense<0.000000e+00> : vector<8x256xf32>
    %154 = tpu.matmul %127, %153, %cst_190 {dimension_numbers = #tpu.dot_dimension_numbers<[1], [0], [0], [1], [0, 0, 1, 1], [], []>} : vector<8x40xf32>, vector<40x256xf32>, vector<8x256xf32> -> vector<8x256xf32>
    %155 = arith.addf %88, %154 : vector<8x256xf32>
    %c8_191 = arith.constant 8 : index
    %c0_192 = arith.constant 0 : index
    %156 = vector.load %arg12[%c8_191, %c0_192] : memref<16x256xf32, #tpu.memory_space<vmem>>, vector<4x256xf32>
    %157 = arith.addf %125, %156 : vector<4x256xf32>
    %c2 = arith.constant 2 : index
    %c0_193 = arith.constant 0 : index
    %c0_194 = arith.constant 0 : index
    %158 = vector.load %arg4[%c2, %c0_193, %c0_194] : memref<4x4x40xf32, #tpu.memory_space<vmem>>, vector<1x4x40xf32>
    %159 = vector.shape_cast %158 : vector<1x4x40xf32> to vector<4x40xf32>
    %c0_195 = arith.constant 0 : index
    %c128_196 = arith.constant 128 : index
    %160 = vector.load %arg10[%c0_195, %c128_196] : memref<4x512xf32, #tpu.memory_space<vmem>>, vector<4x256xf32>
    tpu.vector_store %arg10[%c0_195, %c128_196], %157 {strides = array<i32>} : memref<4x512xf32, #tpu.memory_space<vmem>>, vector<4x256xf32>,
    %c0_197 = arith.constant 0 : index
    %c111_198 = arith.constant 111 : index
    %161 = vector.load %arg10[%c0_197, %c111_198] : memref<4x512xf32, #tpu.memory_space<vmem>>, vector<4x256xf32>
    %162 = arith.mulf %161, %8 : vector<4x256xf32>
    %c0_199 = arith.constant 0 : index
    %c0_200 = arith.constant 0 : index
    %163 = vector.load %arg11[%c0_199, %c0_200] : memref<40x256xf32, #tpu.memory_space<vmem>>, vector<4x256xf32>
    tpu.vector_store %arg11[%c0_199, %c0_200], %162 {strides = array<i32>} : memref<40x256xf32, #tpu.memory_space<vmem>>, vector<4x256xf32>,
    %c0_201 = arith.constant 0 : index
    %c112_202 = arith.constant 112 : index
    %164 = vector.load %arg10[%c0_201, %c112_202] : memref<4x512xf32, #tpu.memory_space<vmem>>, vector<4x256xf32>
    %c4_203 = arith.constant 4 : index
    %c0_204 = arith.constant 0 : index
    %165 = vector.load %arg11[%c4_203, %c0_204] : memref<40x256xf32, #tpu.memory_space<vmem>>, vector<4x256xf32>
    tpu.vector_store %arg11[%c4_203, %c0_204], %164 {strides = array<i32>} : memref<40x256xf32, #tpu.memory_space<vmem>>, vector<4x256xf32>,
    %c0_205 = arith.constant 0 : index
    %c113_206 = arith.constant 113 : index
    %166 = vector.load %arg10[%c0_205, %c113_206] : memref<4x512xf32, #tpu.memory_space<vmem>>, vector<4x256xf32>
    %167 = arith.mulf %166, %11 : vector<4x256xf32>
    %c8_207 = arith.constant 8 : index
    %c0_208 = arith.constant 0 : index
    %168 = vector.load %arg11[%c8_207, %c0_208] : memref<40x256xf32, #tpu.memory_space<vmem>>, vector<4x256xf32>
    tpu.vector_store %arg11[%c8_207, %c0_208], %167 {strides = array<i32>} : memref<40x256xf32, #tpu.memory_space<vmem>>, vector<4x256xf32>,
    %c0_209 = arith.constant 0 : index
    %c127_210 = arith.constant 127 : index
    %169 = vector.load %arg10[%c0_209, %c127_210] : memref<4x512xf32, #tpu.memory_space<vmem>>, vector<4x256xf32>
    %170 = arith.mulf %169, %8 : vector<4x256xf32>
    %c12_211 = arith.constant 12 : index
    %c0_212 = arith.constant 0 : index
    %171 = vector.load %arg11[%c12_211, %c0_212] : memref<40x256xf32, #tpu.memory_space<vmem>>, vector<4x256xf32>
    tpu.vector_store %arg11[%c12_211, %c0_212], %170 {strides = array<i32>} : memref<40x256xf32, #tpu.memory_space<vmem>>, vector<4x256xf32>,
    %c0_213 = arith.constant 0 : index
    %c128_214 = arith.constant 128 : index
    %172 = vector.load %arg10[%c0_213, %c128_214] : memref<4x512xf32, #tpu.memory_space<vmem>>, vector<4x256xf32>
    %c16_215 = arith.constant 16 : index
    %c0_216 = arith.constant 0 : index
    %173 = vector.load %arg11[%c16_215, %c0_216] : memref<40x256xf32, #tpu.memory_space<vmem>>, vector<4x256xf32>
    tpu.vector_store %arg11[%c16_215, %c0_216], %172 {strides = array<i32>} : memref<40x256xf32, #tpu.memory_space<vmem>>, vector<4x256xf32>,
    %c0_217 = arith.constant 0 : index
    %c129_218 = arith.constant 129 : index
    %174 = vector.load %arg10[%c0_217, %c129_218] : memref<4x512xf32, #tpu.memory_space<vmem>>, vector<4x256xf32>
    %175 = arith.mulf %174, %11 : vector<4x256xf32>
    %c20_219 = arith.constant 20 : index
    %c0_220 = arith.constant 0 : index
    %176 = vector.load %arg11[%c20_219, %c0_220] : memref<40x256xf32, #tpu.memory_space<vmem>>, vector<4x256xf32>
    tpu.vector_store %arg11[%c20_219, %c0_220], %175 {strides = array<i32>} : memref<40x256xf32, #tpu.memory_space<vmem>>, vector<4x256xf32>,
    %c0_221 = arith.constant 0 : index
    %c143_222 = arith.constant 143 : index
    %177 = vector.load %arg10[%c0_221, %c143_222] : memref<4x512xf32, #tpu.memory_space<vmem>>, vector<4x256xf32>
    %178 = arith.mulf %177, %8 : vector<4x256xf32>
    %c24_223 = arith.constant 24 : index
    %c0_224 = arith.constant 0 : index
    %179 = vector.load %arg11[%c24_223, %c0_224] : memref<40x256xf32, #tpu.memory_space<vmem>>, vector<4x256xf32>
    tpu.vector_store %arg11[%c24_223, %c0_224], %178 {strides = array<i32>} : memref<40x256xf32, #tpu.memory_space<vmem>>, vector<4x256xf32>,
    %c0_225 = arith.constant 0 : index
    %c144_226 = arith.constant 144 : index
    %180 = vector.load %arg10[%c0_225, %c144_226] : memref<4x512xf32, #tpu.memory_space<vmem>>, vector<4x256xf32>
    %c28_227 = arith.constant 28 : index
    %c0_228 = arith.constant 0 : index
    %181 = vector.load %arg11[%c28_227, %c0_228] : memref<40x256xf32, #tpu.memory_space<vmem>>, vector<4x256xf32>
    tpu.vector_store %arg11[%c28_227, %c0_228], %180 {strides = array<i32>} : memref<40x256xf32, #tpu.memory_space<vmem>>, vector<4x256xf32>,
    %c0_229 = arith.constant 0 : index
    %c145_230 = arith.constant 145 : index
    %182 = vector.load %arg10[%c0_229, %c145_230] : memref<4x512xf32, #tpu.memory_space<vmem>>, vector<4x256xf32>
    %183 = arith.mulf %182, %11 : vector<4x256xf32>
    %c32_231 = arith.constant 32 : index
    %c0_232 = arith.constant 0 : index
    %184 = vector.load %arg11[%c32_231, %c0_232] : memref<40x256xf32, #tpu.memory_space<vmem>>, vector<4x256xf32>
    tpu.vector_store %arg11[%c32_231, %c0_232], %183 {strides = array<i32>} : memref<40x256xf32, #tpu.memory_space<vmem>>, vector<4x256xf32>,
    %c0_233 = arith.constant 0 : index
    %c0_234 = arith.constant 0 : index
    %185 = vector.load %arg11[%c0_233, %c0_234] : memref<40x256xf32, #tpu.memory_space<vmem>>, vector<40x256xf32>
    %cst_235 = arith.constant dense<0.000000e+00> : vector<4x256xf32>
    %186 = tpu.matmul %159, %185, %cst_235 {dimension_numbers = #tpu.dot_dimension_numbers<[1], [0], [0], [1], [0, 0, 1, 1], [], []>} : vector<4x40xf32>, vector<40x256xf32>, vector<4x256xf32> -> vector<4x256xf32>
    %c2_236 = arith.constant 2 : index
    %c0_237 = arith.constant 0 : index
    %c0_238 = arith.constant 0 : index
    %187 = vector.load %arg5[%c2_236, %c0_237, %c0_238] : memref<4x4x1xf32, #tpu.memory_space<vmem>>, vector<1x4x1xf32>
    %188 = vector.shape_cast %187 : vector<1x4x1xf32> to vector<4x1xf32>
    %189 = vector.broadcast %188 : vector<4x1xf32> to vector<4x256xf32>
    %190 = arith.addf %186, %189 : vector<4x256xf32>
    %cst_239 = arith.constant 0.000000e+00 : f32
    %191 = vector.broadcast %cst_239 : f32 to vector<4x256xf32>
    %192 = arith.maximumf %190, %191 : vector<4x256xf32>
    %c2_240 = arith.constant 2 : index
    %c0_241 = arith.constant 0 : index
    %c0_242 = arith.constant 0 : index
    %193 = vector.load %arg6[%c2_240, %c0_241, %c0_242] : memref<4x8x40xf32, #tpu.memory_space<vmem>>, vector<1x8x40xf32>
    %194 = vector.shape_cast %193 : vector<1x8x40xf32> to vector<8x40xf32>
    %c0_243 = arith.constant 0 : index
    %c128_244 = arith.constant 128 : index
    %195 = vector.load %arg10[%c0_243, %c128_244] : memref<4x512xf32, #tpu.memory_space<vmem>>, vector<4x256xf32>
    tpu.vector_store %arg10[%c0_243, %c128_244], %192 {strides = array<i32>} : memref<4x512xf32, #tpu.memory_space<vmem>>, vector<4x256xf32>,
    %c0_245 = arith.constant 0 : index
    %c111_246 = arith.constant 111 : index
    %196 = vector.load %arg10[%c0_245, %c111_246] : memref<4x512xf32, #tpu.memory_space<vmem>>, vector<4x256xf32>
    %197 = arith.mulf %196, %8 : vector<4x256xf32>
    %c0_247 = arith.constant 0 : index
    %c0_248 = arith.constant 0 : index
    %198 = vector.load %arg11[%c0_247, %c0_248] : memref<40x256xf32, #tpu.memory_space<vmem>>, vector<4x256xf32>
    tpu.vector_store %arg11[%c0_247, %c0_248], %197 {strides = array<i32>} : memref<40x256xf32, #tpu.memory_space<vmem>>, vector<4x256xf32>,
    %c0_249 = arith.constant 0 : index
    %c112_250 = arith.constant 112 : index
    %199 = vector.load %arg10[%c0_249, %c112_250] : memref<4x512xf32, #tpu.memory_space<vmem>>, vector<4x256xf32>
    %c4_251 = arith.constant 4 : index
    %c0_252 = arith.constant 0 : index
    %200 = vector.load %arg11[%c4_251, %c0_252] : memref<40x256xf32, #tpu.memory_space<vmem>>, vector<4x256xf32>
    tpu.vector_store %arg11[%c4_251, %c0_252], %199 {strides = array<i32>} : memref<40x256xf32, #tpu.memory_space<vmem>>, vector<4x256xf32>,
    %c0_253 = arith.constant 0 : index
    %c113_254 = arith.constant 113 : index
    %201 = vector.load %arg10[%c0_253, %c113_254] : memref<4x512xf32, #tpu.memory_space<vmem>>, vector<4x256xf32>
    %202 = arith.mulf %201, %11 : vector<4x256xf32>
    %c8_255 = arith.constant 8 : index
    %c0_256 = arith.constant 0 : index
    %203 = vector.load %arg11[%c8_255, %c0_256] : memref<40x256xf32, #tpu.memory_space<vmem>>, vector<4x256xf32>
    tpu.vector_store %arg11[%c8_255, %c0_256], %202 {strides = array<i32>} : memref<40x256xf32, #tpu.memory_space<vmem>>, vector<4x256xf32>,
    %c0_257 = arith.constant 0 : index
    %c127_258 = arith.constant 127 : index
    %204 = vector.load %arg10[%c0_257, %c127_258] : memref<4x512xf32, #tpu.memory_space<vmem>>, vector<4x256xf32>
    %205 = arith.mulf %204, %8 : vector<4x256xf32>
    %c12_259 = arith.constant 12 : index
    %c0_260 = arith.constant 0 : index
    %206 = vector.load %arg11[%c12_259, %c0_260] : memref<40x256xf32, #tpu.memory_space<vmem>>, vector<4x256xf32>
    tpu.vector_store %arg11[%c12_259, %c0_260], %205 {strides = array<i32>} : memref<40x256xf32, #tpu.memory_space<vmem>>, vector<4x256xf32>,
    %c0_261 = arith.constant 0 : index
    %c128_262 = arith.constant 128 : index
    %207 = vector.load %arg10[%c0_261, %c128_262] : memref<4x512xf32, #tpu.memory_space<vmem>>, vector<4x256xf32>
    %c16_263 = arith.constant 16 : index
    %c0_264 = arith.constant 0 : index
    %208 = vector.load %arg11[%c16_263, %c0_264] : memref<40x256xf32, #tpu.memory_space<vmem>>, vector<4x256xf32>
    tpu.vector_store %arg11[%c16_263, %c0_264], %207 {strides = array<i32>} : memref<40x256xf32, #tpu.memory_space<vmem>>, vector<4x256xf32>,
    %c0_265 = arith.constant 0 : index
    %c129_266 = arith.constant 129 : index
    %209 = vector.load %arg10[%c0_265, %c129_266] : memref<4x512xf32, #tpu.memory_space<vmem>>, vector<4x256xf32>
    %210 = arith.mulf %209, %11 : vector<4x256xf32>
    %c20_267 = arith.constant 20 : index
    %c0_268 = arith.constant 0 : index
    %211 = vector.load %arg11[%c20_267, %c0_268] : memref<40x256xf32, #tpu.memory_space<vmem>>, vector<4x256xf32>
    tpu.vector_store %arg11[%c20_267, %c0_268], %210 {strides = array<i32>} : memref<40x256xf32, #tpu.memory_space<vmem>>, vector<4x256xf32>,
    %c0_269 = arith.constant 0 : index
    %c143_270 = arith.constant 143 : index
    %212 = vector.load %arg10[%c0_269, %c143_270] : memref<4x512xf32, #tpu.memory_space<vmem>>, vector<4x256xf32>
    %213 = arith.mulf %212, %8 : vector<4x256xf32>
    %c24_271 = arith.constant 24 : index
    %c0_272 = arith.constant 0 : index
    %214 = vector.load %arg11[%c24_271, %c0_272] : memref<40x256xf32, #tpu.memory_space<vmem>>, vector<4x256xf32>
    tpu.vector_store %arg11[%c24_271, %c0_272], %213 {strides = array<i32>} : memref<40x256xf32, #tpu.memory_space<vmem>>, vector<4x256xf32>,
    %c0_273 = arith.constant 0 : index
    %c144_274 = arith.constant 144 : index
    %215 = vector.load %arg10[%c0_273, %c144_274] : memref<4x512xf32, #tpu.memory_space<vmem>>, vector<4x256xf32>
    %c28_275 = arith.constant 28 : index
    %c0_276 = arith.constant 0 : index
    %216 = vector.load %arg11[%c28_275, %c0_276] : memref<40x256xf32, #tpu.memory_space<vmem>>, vector<4x256xf32>
    tpu.vector_store %arg11[%c28_275, %c0_276], %215 {strides = array<i32>} : memref<40x256xf32, #tpu.memory_space<vmem>>, vector<4x256xf32>,
    %c0_277 = arith.constant 0 : index
    %c145_278 = arith.constant 145 : index
    %217 = vector.load %arg10[%c0_277, %c145_278] : memref<4x512xf32, #tpu.memory_space<vmem>>, vector<4x256xf32>
    %218 = arith.mulf %217, %11 : vector<4x256xf32>
    %c32_279 = arith.constant 32 : index
    %c0_280 = arith.constant 0 : index
    %219 = vector.load %arg11[%c32_279, %c0_280] : memref<40x256xf32, #tpu.memory_space<vmem>>, vector<4x256xf32>
    tpu.vector_store %arg11[%c32_279, %c0_280], %218 {strides = array<i32>} : memref<40x256xf32, #tpu.memory_space<vmem>>, vector<4x256xf32>,
    %c0_281 = arith.constant 0 : index
    %c0_282 = arith.constant 0 : index
    %220 = vector.load %arg11[%c0_281, %c0_282] : memref<40x256xf32, #tpu.memory_space<vmem>>, vector<40x256xf32>
    %cst_283 = arith.constant dense<0.000000e+00> : vector<8x256xf32>
    %221 = tpu.matmul %194, %220, %cst_283 {dimension_numbers = #tpu.dot_dimension_numbers<[1], [0], [0], [1], [0, 0, 1, 1], [], []>} : vector<8x40xf32>, vector<40x256xf32>, vector<8x256xf32> -> vector<8x256xf32>
    %222 = arith.addf %155, %221 : vector<8x256xf32>
    %c12_284 = arith.constant 12 : index
    %c0_285 = arith.constant 0 : index
    %223 = vector.load %arg12[%c12_284, %c0_285] : memref<16x256xf32, #tpu.memory_space<vmem>>, vector<4x256xf32>
    %224 = arith.addf %192, %223 : vector<4x256xf32>
    %c3 = arith.constant 3 : index
    %c0_286 = arith.constant 0 : index
    %c0_287 = arith.constant 0 : index
    %225 = vector.load %arg4[%c3, %c0_286, %c0_287] : memref<4x4x40xf32, #tpu.memory_space<vmem>>, vector<1x4x40xf32>
    %226 = vector.shape_cast %225 : vector<1x4x40xf32> to vector<4x40xf32>
    %c0_288 = arith.constant 0 : index
    %c128_289 = arith.constant 128 : index
    %227 = vector.load %arg10[%c0_288, %c128_289] : memref<4x512xf32, #tpu.memory_space<vmem>>, vector<4x256xf32>
    tpu.vector_store %arg10[%c0_288, %c128_289], %224 {strides = array<i32>} : memref<4x512xf32, #tpu.memory_space<vmem>>, vector<4x256xf32>,
    %c0_290 = arith.constant 0 : index
    %c111_291 = arith.constant 111 : index
    %228 = vector.load %arg10[%c0_290, %c111_291] : memref<4x512xf32, #tpu.memory_space<vmem>>, vector<4x256xf32>
    %229 = arith.mulf %228, %8 : vector<4x256xf32>
    %c0_292 = arith.constant 0 : index
    %c0_293 = arith.constant 0 : index
    %230 = vector.load %arg11[%c0_292, %c0_293] : memref<40x256xf32, #tpu.memory_space<vmem>>, vector<4x256xf32>
    tpu.vector_store %arg11[%c0_292, %c0_293], %229 {strides = array<i32>} : memref<40x256xf32, #tpu.memory_space<vmem>>, vector<4x256xf32>,
    %c0_294 = arith.constant 0 : index
    %c112_295 = arith.constant 112 : index
    %231 = vector.load %arg10[%c0_294, %c112_295] : memref<4x512xf32, #tpu.memory_space<vmem>>, vector<4x256xf32>
    %c4_296 = arith.constant 4 : index
    %c0_297 = arith.constant 0 : index
    %232 = vector.load %arg11[%c4_296, %c0_297] : memref<40x256xf32, #tpu.memory_space<vmem>>, vector<4x256xf32>
    tpu.vector_store %arg11[%c4_296, %c0_297], %231 {strides = array<i32>} : memref<40x256xf32, #tpu.memory_space<vmem>>, vector<4x256xf32>,
    %c0_298 = arith.constant 0 : index
    %c113_299 = arith.constant 113 : index
    %233 = vector.load %arg10[%c0_298, %c113_299] : memref<4x512xf32, #tpu.memory_space<vmem>>, vector<4x256xf32>
    %234 = arith.mulf %233, %11 : vector<4x256xf32>
    %c8_300 = arith.constant 8 : index
    %c0_301 = arith.constant 0 : index
    %235 = vector.load %arg11[%c8_300, %c0_301] : memref<40x256xf32, #tpu.memory_space<vmem>>, vector<4x256xf32>
    tpu.vector_store %arg11[%c8_300, %c0_301], %234 {strides = array<i32>} : memref<40x256xf32, #tpu.memory_space<vmem>>, vector<4x256xf32>,
    %c0_302 = arith.constant 0 : index
    %c127_303 = arith.constant 127 : index
    %236 = vector.load %arg10[%c0_302, %c127_303] : memref<4x512xf32, #tpu.memory_space<vmem>>, vector<4x256xf32>
    %237 = arith.mulf %236, %8 : vector<4x256xf32>
    %c12_304 = arith.constant 12 : index
    %c0_305 = arith.constant 0 : index
    %238 = vector.load %arg11[%c12_304, %c0_305] : memref<40x256xf32, #tpu.memory_space<vmem>>, vector<4x256xf32>
    tpu.vector_store %arg11[%c12_304, %c0_305], %237 {strides = array<i32>} : memref<40x256xf32, #tpu.memory_space<vmem>>, vector<4x256xf32>,
    %c0_306 = arith.constant 0 : index
    %c128_307 = arith.constant 128 : index
    %239 = vector.load %arg10[%c0_306, %c128_307] : memref<4x512xf32, #tpu.memory_space<vmem>>, vector<4x256xf32>
    %c16_308 = arith.constant 16 : index
    %c0_309 = arith.constant 0 : index
    %240 = vector.load %arg11[%c16_308, %c0_309] : memref<40x256xf32, #tpu.memory_space<vmem>>, vector<4x256xf32>
    tpu.vector_store %arg11[%c16_308, %c0_309], %239 {strides = array<i32>} : memref<40x256xf32, #tpu.memory_space<vmem>>, vector<4x256xf32>,
    %c0_310 = arith.constant 0 : index
    %c129_311 = arith.constant 129 : index
    %241 = vector.load %arg10[%c0_310, %c129_311] : memref<4x512xf32, #tpu.memory_space<vmem>>, vector<4x256xf32>
    %242 = arith.mulf %241, %11 : vector<4x256xf32>
    %c20_312 = arith.constant 20 : index
    %c0_313 = arith.constant 0 : index
    %243 = vector.load %arg11[%c20_312, %c0_313] : memref<40x256xf32, #tpu.memory_space<vmem>>, vector<4x256xf32>
    tpu.vector_store %arg11[%c20_312, %c0_313], %242 {strides = array<i32>} : memref<40x256xf32, #tpu.memory_space<vmem>>, vector<4x256xf32>,
    %c0_314 = arith.constant 0 : index
    %c143_315 = arith.constant 143 : index
    %244 = vector.load %arg10[%c0_314, %c143_315] : memref<4x512xf32, #tpu.memory_space<vmem>>, vector<4x256xf32>
    %245 = arith.mulf %244, %8 : vector<4x256xf32>
    %c24_316 = arith.constant 24 : index
    %c0_317 = arith.constant 0 : index
    %246 = vector.load %arg11[%c24_316, %c0_317] : memref<40x256xf32, #tpu.memory_space<vmem>>, vector<4x256xf32>
    tpu.vector_store %arg11[%c24_316, %c0_317], %245 {strides = array<i32>} : memref<40x256xf32, #tpu.memory_space<vmem>>, vector<4x256xf32>,
    %c0_318 = arith.constant 0 : index
    %c144_319 = arith.constant 144 : index
    %247 = vector.load %arg10[%c0_318, %c144_319] : memref<4x512xf32, #tpu.memory_space<vmem>>, vector<4x256xf32>
    %c28_320 = arith.constant 28 : index
    %c0_321 = arith.constant 0 : index
    %248 = vector.load %arg11[%c28_320, %c0_321] : memref<40x256xf32, #tpu.memory_space<vmem>>, vector<4x256xf32>
    tpu.vector_store %arg11[%c28_320, %c0_321], %247 {strides = array<i32>} : memref<40x256xf32, #tpu.memory_space<vmem>>, vector<4x256xf32>,
    %c0_322 = arith.constant 0 : index
    %c145_323 = arith.constant 145 : index
    %249 = vector.load %arg10[%c0_322, %c145_323] : memref<4x512xf32, #tpu.memory_space<vmem>>, vector<4x256xf32>
    %250 = arith.mulf %249, %11 : vector<4x256xf32>
    %c32_324 = arith.constant 32 : index
    %c0_325 = arith.constant 0 : index
    %251 = vector.load %arg11[%c32_324, %c0_325] : memref<40x256xf32, #tpu.memory_space<vmem>>, vector<4x256xf32>
    tpu.vector_store %arg11[%c32_324, %c0_325], %250 {strides = array<i32>} : memref<40x256xf32, #tpu.memory_space<vmem>>, vector<4x256xf32>,
    %c0_326 = arith.constant 0 : index
    %c0_327 = arith.constant 0 : index
    %252 = vector.load %arg11[%c0_326, %c0_327] : memref<40x256xf32, #tpu.memory_space<vmem>>, vector<40x256xf32>
    %cst_328 = arith.constant dense<0.000000e+00> : vector<4x256xf32>
    %253 = tpu.matmul %226, %252, %cst_328 {dimension_numbers = #tpu.dot_dimension_numbers<[1], [0], [0], [1], [0, 0, 1, 1], [], []>} : vector<4x40xf32>, vector<40x256xf32>, vector<4x256xf32> -> vector<4x256xf32>
    %c3_329 = arith.constant 3 : index
    %c0_330 = arith.constant 0 : index
    %c0_331 = arith.constant 0 : index
    %254 = vector.load %arg5[%c3_329, %c0_330, %c0_331] : memref<4x4x1xf32, #tpu.memory_space<vmem>>, vector<1x4x1xf32>
    %255 = vector.shape_cast %254 : vector<1x4x1xf32> to vector<4x1xf32>
    %256 = vector.broadcast %255 : vector<4x1xf32> to vector<4x256xf32>
    %257 = arith.addf %253, %256 : vector<4x256xf32>
    %cst_332 = arith.constant 0.000000e+00 : f32
    %258 = vector.broadcast %cst_332 : f32 to vector<4x256xf32>
    %259 = arith.maximumf %257, %258 : vector<4x256xf32>
    %c3_333 = arith.constant 3 : index
    %c0_334 = arith.constant 0 : index
    %c0_335 = arith.constant 0 : index
    %260 = vector.load %arg6[%c3_333, %c0_334, %c0_335] : memref<4x8x40xf32, #tpu.memory_space<vmem>>, vector<1x8x40xf32>
    %261 = vector.shape_cast %260 : vector<1x8x40xf32> to vector<8x40xf32>
    %c0_336 = arith.constant 0 : index
    %c128_337 = arith.constant 128 : index
    %262 = vector.load %arg10[%c0_336, %c128_337] : memref<4x512xf32, #tpu.memory_space<vmem>>, vector<4x256xf32>
    tpu.vector_store %arg10[%c0_336, %c128_337], %259 {strides = array<i32>} : memref<4x512xf32, #tpu.memory_space<vmem>>, vector<4x256xf32>,
    %c0_338 = arith.constant 0 : index
    %c111_339 = arith.constant 111 : index
    %263 = vector.load %arg10[%c0_338, %c111_339] : memref<4x512xf32, #tpu.memory_space<vmem>>, vector<4x256xf32>
    %264 = arith.mulf %263, %8 : vector<4x256xf32>
    %c0_340 = arith.constant 0 : index
    %c0_341 = arith.constant 0 : index
    %265 = vector.load %arg11[%c0_340, %c0_341] : memref<40x256xf32, #tpu.memory_space<vmem>>, vector<4x256xf32>
    tpu.vector_store %arg11[%c0_340, %c0_341], %264 {strides = array<i32>} : memref<40x256xf32, #tpu.memory_space<vmem>>, vector<4x256xf32>,
    %c0_342 = arith.constant 0 : index
    %c112_343 = arith.constant 112 : index
    %266 = vector.load %arg10[%c0_342, %c112_343] : memref<4x512xf32, #tpu.memory_space<vmem>>, vector<4x256xf32>
    %c4_344 = arith.constant 4 : index
    %c0_345 = arith.constant 0 : index
    %267 = vector.load %arg11[%c4_344, %c0_345] : memref<40x256xf32, #tpu.memory_space<vmem>>, vector<4x256xf32>
    tpu.vector_store %arg11[%c4_344, %c0_345], %266 {strides = array<i32>} : memref<40x256xf32, #tpu.memory_space<vmem>>, vector<4x256xf32>,
    %c0_346 = arith.constant 0 : index
    %c113_347 = arith.constant 113 : index
    %268 = vector.load %arg10[%c0_346, %c113_347] : memref<4x512xf32, #tpu.memory_space<vmem>>, vector<4x256xf32>
    %269 = arith.mulf %268, %11 : vector<4x256xf32>
    %c8_348 = arith.constant 8 : index
    %c0_349 = arith.constant 0 : index
    %270 = vector.load %arg11[%c8_348, %c0_349] : memref<40x256xf32, #tpu.memory_space<vmem>>, vector<4x256xf32>
    tpu.vector_store %arg11[%c8_348, %c0_349], %269 {strides = array<i32>} : memref<40x256xf32, #tpu.memory_space<vmem>>, vector<4x256xf32>,
    %c0_350 = arith.constant 0 : index
    %c127_351 = arith.constant 127 : index
    %271 = vector.load %arg10[%c0_350, %c127_351] : memref<4x512xf32, #tpu.memory_space<vmem>>, vector<4x256xf32>
    %272 = arith.mulf %271, %8 : vector<4x256xf32>
    %c12_352 = arith.constant 12 : index
    %c0_353 = arith.constant 0 : index
    %273 = vector.load %arg11[%c12_352, %c0_353] : memref<40x256xf32, #tpu.memory_space<vmem>>, vector<4x256xf32>
    tpu.vector_store %arg11[%c12_352, %c0_353], %272 {strides = array<i32>} : memref<40x256xf32, #tpu.memory_space<vmem>>, vector<4x256xf32>,
    %c0_354 = arith.constant 0 : index
    %c128_355 = arith.constant 128 : index
    %274 = vector.load %arg10[%c0_354, %c128_355] : memref<4x512xf32, #tpu.memory_space<vmem>>, vector<4x256xf32>
    %c16_356 = arith.constant 16 : index
    %c0_357 = arith.constant 0 : index
    %275 = vector.load %arg11[%c16_356, %c0_357] : memref<40x256xf32, #tpu.memory_space<vmem>>, vector<4x256xf32>
    tpu.vector_store %arg11[%c16_356, %c0_357], %274 {strides = array<i32>} : memref<40x256xf32, #tpu.memory_space<vmem>>, vector<4x256xf32>,
    %c0_358 = arith.constant 0 : index
    %c129_359 = arith.constant 129 : index
    %276 = vector.load %arg10[%c0_358, %c129_359] : memref<4x512xf32, #tpu.memory_space<vmem>>, vector<4x256xf32>
    %277 = arith.mulf %276, %11 : vector<4x256xf32>
    %c20_360 = arith.constant 20 : index
    %c0_361 = arith.constant 0 : index
    %278 = vector.load %arg11[%c20_360, %c0_361] : memref<40x256xf32, #tpu.memory_space<vmem>>, vector<4x256xf32>
    tpu.vector_store %arg11[%c20_360, %c0_361], %277 {strides = array<i32>} : memref<40x256xf32, #tpu.memory_space<vmem>>, vector<4x256xf32>,
    %c0_362 = arith.constant 0 : index
    %c143_363 = arith.constant 143 : index
    %279 = vector.load %arg10[%c0_362, %c143_363] : memref<4x512xf32, #tpu.memory_space<vmem>>, vector<4x256xf32>
    %280 = arith.mulf %279, %8 : vector<4x256xf32>
    %c24_364 = arith.constant 24 : index
    %c0_365 = arith.constant 0 : index
    %281 = vector.load %arg11[%c24_364, %c0_365] : memref<40x256xf32, #tpu.memory_space<vmem>>, vector<4x256xf32>
    tpu.vector_store %arg11[%c24_364, %c0_365], %280 {strides = array<i32>} : memref<40x256xf32, #tpu.memory_space<vmem>>, vector<4x256xf32>,
    %c0_366 = arith.constant 0 : index
    %c144_367 = arith.constant 144 : index
    %282 = vector.load %arg10[%c0_366, %c144_367] : memref<4x512xf32, #tpu.memory_space<vmem>>, vector<4x256xf32>
    %c28_368 = arith.constant 28 : index
    %c0_369 = arith.constant 0 : index
    %283 = vector.load %arg11[%c28_368, %c0_369] : memref<40x256xf32, #tpu.memory_space<vmem>>, vector<4x256xf32>
    tpu.vector_store %arg11[%c28_368, %c0_369], %282 {strides = array<i32>} : memref<40x256xf32, #tpu.memory_space<vmem>>, vector<4x256xf32>,
    %c0_370 = arith.constant 0 : index
    %c145_371 = arith.constant 145 : index
    %284 = vector.load %arg10[%c0_370, %c145_371] : memref<4x512xf32, #tpu.memory_space<vmem>>, vector<4x256xf32>
    %285 = arith.mulf %284, %11 : vector<4x256xf32>
    %c32_372 = arith.constant 32 : index
    %c0_373 = arith.constant 0 : index
    %286 = vector.load %arg11[%c32_372, %c0_373] : memref<40x256xf32, #tpu.memory_space<vmem>>, vector<4x256xf32>
    tpu.vector_store %arg11[%c32_372, %c0_373], %285 {strides = array<i32>} : memref<40x256xf32, #tpu.memory_space<vmem>>, vector<4x256xf32>,
    %c0_374 = arith.constant 0 : index
    %c0_375 = arith.constant 0 : index
    %287 = vector.load %arg11[%c0_374, %c0_375] : memref<40x256xf32, #tpu.memory_space<vmem>>, vector<40x256xf32>
    %cst_376 = arith.constant dense<0.000000e+00> : vector<8x256xf32>
    %288 = tpu.matmul %261, %287, %cst_376 {dimension_numbers = #tpu.dot_dimension_numbers<[1], [0], [0], [1], [0, 0, 1, 1], [], []>} : vector<8x40xf32>, vector<40x256xf32>, vector<8x256xf32> -> vector<8x256xf32>
    %289 = arith.addf %222, %288 : vector<8x256xf32>
    %cst_377 = arith.constant 1.000000e-01 : f32
    %290 = vector.broadcast %cst_377 : f32 to vector<8x256xf32>
    %291 = arith.mulf %289, %290 : vector<8x256xf32>
    %c0_378 = arith.constant 0 : index
    %c0_379 = arith.constant 0 : index
    %c0_380 = arith.constant 0 : index
    %292 = vector.load %arg1[%c0_378, %c0_379, %c0_380] : memref<1x8x256xf32, #tpu.memory_space<vmem>>, vector<1x8x256xf32>
    %293 = vector.shape_cast %292 : vector<1x8x256xf32> to vector<8x256xf32>
    %294 = arith.addf %291, %293 : vector<8x256xf32>
    %c0_381 = arith.constant 0 : index
    %c0_382 = arith.constant 0 : index
    %c0_383 = arith.constant 0 : index
    %295 = vector.load %arg9[%c0_381, %c0_382, %c0_383] : memref<1x8x256xf32, #tpu.memory_space<vmem>>, vector<1x8x256xf32>
    %296 = vector.shape_cast %295 : vector<1x8x256xf32> to vector<8x256xf32>
    %297 = vector.shape_cast %294 : vector<8x256xf32> to vector<1x8x256xf32>
    tpu.vector_store %arg9[%c0_381, %c0_382, %c0_383], %297 {strides = array<i32>} : memref<1x8x256xf32, #tpu.memory_space<vmem>>, vector<1x8x256xf32>,
    return
  }
  func.func @transform_0(%arg0: i32) -> (i32, i32, i32) {
    %c0_i32 = arith.constant 0 : i32
    %c0_i32_0 = arith.constant 0 : i32
    %c0_i32_1 = arith.constant 0 : i32
    return %arg0, %c0_i32, %c0_i32_0 : i32, i32, i32
  }
  func.func @transform_1(%arg0: i32) -> (i32, i32) {
    %c0_i32 = arith.constant 0 : i32
    %c0_i32_0 = arith.constant 0 : i32
    %c0_i32_1 = arith.constant 0 : i32
    return %c0_i32, %c0_i32_0 : i32, i32
  }
  func.func @transform_2(%arg0: i32) -> (i32, i32) {
    %c0_i32 = arith.constant 0 : i32
    %c0_i32_0 = arith.constant 0 : i32
    %c0_i32_1 = arith.constant 0 : i32
    return %c0_i32, %c0_i32_0 : i32, i32
  }
  func.func @transform_3(%arg0: i32) -> (i32, i32, i32) {
    %c0_i32 = arith.constant 0 : i32
    %c0_i32_0 = arith.constant 0 : i32
    %c0_i32_1 = arith.constant 0 : i32
    %c0_i32_2 = arith.constant 0 : i32
    return %c0_i32, %c0_i32_0, %c0_i32_1 : i32, i32, i32
  }
  func.func @transform_4(%arg0: i32) -> (i32, i32, i32) {
    %c0_i32 = arith.constant 0 : i32
    %c0_i32_0 = arith.constant 0 : i32
    %c0_i32_1 = arith.constant 0 : i32
    %c0_i32_2 = arith.constant 0 : i32
    return %c0_i32, %c0_i32_0, %c0_i32_1 : i32, i32, i32
  }
  func.func @transform_5(%arg0: i32) -> (i32, i32, i32) {
    %c0_i32 = arith.constant 0 : i32
    %c0_i32_0 = arith.constant 0 : i32
    %c0_i32_1 = arith.constant 0 : i32
    %c0_i32_2 = arith.constant 0 : i32
    return %c0_i32, %c0_i32_0, %c0_i32_1 : i32, i32, i32
  }
  func.func @transform_6(%arg0: i32) -> (i32, i32) {
    %c0_i32 = arith.constant 0 : i32
    %c0_i32_0 = arith.constant 0 : i32
    %c0_i32_1 = arith.constant 0 : i32
    return %c0_i32, %c0_i32_0 : i32, i32
  }
  func.func @transform_7(%arg0: i32) -> (i32, i32) {
    %c0_i32 = arith.constant 0 : i32
    %c0_i32_0 = arith.constant 0 : i32
    %c0_i32_1 = arith.constant 0 : i32
    return %c0_i32, %c0_i32_0 : i32, i32
  }
  func.func @transform_8(%arg0: i32) -> (i32, i32, i32) {
    %c0_i32 = arith.constant 0 : i32
    %c0_i32_0 = arith.constant 0 : i32
    %c0_i32_1 = arith.constant 0 : i32
    return %arg0, %c0_i32, %c0_i32_0 : i32, i32, i32
  }
}

</mosaic_0001>

<bundles_post_ra>
// kernel: tpu_custom_call.1
= control target key start
LH: loop header
LB: loop body
LE: loop exit
PB: predicated region body
PF: predicated region fallthrough
CT: control target
= control target key end

     0   :  { %13 = vsyncpa [#allocation6], 0  ;;  %s3706_s0 = inlined_call_operand.vmem [shape: f32[2,8,256], index: 0, kind: input, shape index: {}]   ;;  %s3707_s1 = inlined_call_operand.vmem [shape: f32[16,8], index: 1, kind: input, shape index: {}]   ;;  %s3708_s2 = inlined_call_operand.vmem [shape: f32[16,1], index: 2, kind: input, shape index: {}]   ;;  %s3709_s3 = inlined_call_operand.vmem [shape: f32[4,4,40], index: 3, kind: input, shape index: {}]   ;;  %s3710_s4 = inlined_call_operand.vmem [shape: f32[4,4,1], index: 4, kind: input, shape index: {}]   ;;  %s3711_s5 = inlined_call_operand.vmem [shape: f32[4,8,40], index: 5, kind: input, shape index: {}]   ;;  %s3712_s6 = inlined_call_operand.vmem [shape: f32[8,1], index: 6, kind: input, shape index: {}]   ;;  %s3713_s7 = inlined_call_operand.vmem [shape: f32[2,256], index: 7, kind: input, shape index: {}]   ;;  %s3714_s8 = inlined_call_operand.hbm [shape: f32[2,8,256], index: 8, kind: output, shape index: {}]  }
   0x1   :  { %15 = vsyncpa [#allocation6 + $0x1], 0  ;;  %s2944_s27 = smov 0   ;;  %s2946_s28 = smov 0  }
   0x2   :  { %s2948_s29 = smov 0   ;;  %s2950_s30 = smov 0  }
   0x3 LB: > { %s2965_s9 = sadd.s32 4294967295, %s2886_s30   ;;  %s2627_s10 = sadd.s32 4294967294, %s2886_s30   ;;  %s2886_s30 = sphi %s2950_s30, %s3720_s30   ;;  %s2882_s29 = sphi %s2948_s29, %s3719_s29   ;;  %s2878_s28 = sphi %s2946_s28, %s3718_s28   ;;  %s2874_s27 = sphi %s2944_s27, %s3717_s27  }
   0x4   : > { %s2969_s11 = sadd.s32 1, %s2886_s30   ;;  %s201_s12 = sadd.s32 1, %s2882_s29 }
   0x5   : > { %s198_s13 = ssub.s32 %s2886_s30, %s2969_s11  ;;  %p211_p0 = scmp.ne.s32.totalorder %s2882_s29, %s2878_s28 }
   0x6   : > { %p199_p1 = scmp.eq.s32.totalorder %s198_s13, 0  ;;  %p212_p2 = scmp.eq.s32.totalorder %s2965_s9, 1 }
   0x7   : > { %p217_p3 = scmp.ne.s32.totalorder %s2878_s28, %s2874_s27  ;;  %p218_p4 = scmp.eq.s32.totalorder %s2627_s10, 1 }
   0x8   : > { %s2980_s14 = scalar_select %p199_p1, %s2882_s29, %s201_s12  }
   0x9   : > { %p2982_p5 = por %p212_p2, %p211_p0  ;;  %p2986_p6 = por %p218_p4, %p217_p3 }
   0xa   : > { %p2630_p7 = scmp.ge.s32.totalorder %s2886_s30, 1  ;;  %p265_p8 = scmp.lt.s32.totalorder %s2886_s30, 3 }
   0xc   : > { %p266_p9 = pnand %p2630_p7, %p265_p8 }
   0xd   : > { %p299_p10 = scmp.lt.s32.totalorder (!%p266_p9), %s2965_s9, 1  ;;  %v333_v0 = vld [vmem:[%s3708_s2] sm:$0xff] (!%p266_p9)  ;;  %v310_v1 = vlaneseq (!%p266_p9)  ;;  %v2888_v2 = vmov (!%p266_p9), 0.0   ;;  %v2889_v3 = vmov (!%p266_p9), 0   ;;  %vm345_vm0 = vcmask (!%p266_p9), 64512   ;;  %s2890_s17 = smov (!%p266_p9), 113  }
   0xe   : > { %269 = sbr.rel (%p266_p9) target bundleno = 2389 (0x955), region = 52  ;;  %416 = vmatprep.mubr.f32.mxu0 (!%p266_p9), %v2888_v2  ;;  %304 = vst [vmem:[#allocation2] sm:$0xf] (!%p266_p9), %v2888_v2  ;;  %305 = vst [vmem:[#allocation2 + $0xc] sm:$0xf] (!%p266_p9), %v2888_v2  ;;  %2782 = vset.pattern.permute.xlu0 (!%p266_p9), %v2889_v3  ;;  %v329_v11 = vld [vmem:[%s3707_s1] sm:$0xff] (!%p266_p9) }
   0xf   : > { %306 = vst [vmem:[#allocation3 + $0x40] sm:$0xf0] (!%p266_p9), %v2888_v2  ;;  %307 = vst [vmem:[#allocation3 + $0x48] sm:$0xf0] (!%p266_p9), %v2888_v2  ;;  %337 = vperm.xlu0 (!%p266_p9), %2782, %v333_v0   ;;  %v311_v4 = vshrl.u32 (!%p266_p9), %v310_v1, 7  ;;  %2783 = vset.pattern.permute.xlu1 (!%p266_p9), %v2889_v3  ;;  %s2891_s18 = smov (!%p266_p9), 111  }
  0x10   : > { %v2634_v5 = vld [vmem:[%s3713_s7 + $0x1] ss:$2 sm:$0x3] (!%p266_p9)  ;;  %v308_v6 = vld [vmem:[%s3713_s7] ss:$2 sm:$0x3] (!%p266_p9)  ;;  %735 = vmatprep.mubr.f32.mxu1 (!%p266_p9), %v2888_v2 }
  0x11   : > { %v312_v7 = vsub.s32 (!%p266_p9), 0, %v311_v4  ;;  %v316_v8 = vsub.s32 (!%p266_p9), 1, %v311_v4  ;;  %s2893_s20 = smov (!%p266_p9), 15   ;;  %s2894_s21 = smov (!%p266_p9), 1   ;;  %vm527_vm1 = vcmask (!%p266_p9), 1039360   ;;  %vm453_vm2 = vcmask (!%p266_p9), 908288  }
  0x12   : > { %s2895_s22 = smov (!%p266_p9), 17   ;;  %s2896_s23 = smov (!%p266_p9), 112   ;;  %vm500_vm3 = vcmask (!%p266_p9), 924672   ;;  %vm543_vm4 = vcmask (!%p266_p9), 7168   ;;  %vm515_vm5 = vcmask (!%p266_p9), 121856   ;;  %vm468_vm6 = vcmask (!%p266_p9), 138240  }
  0x13   : > { %v324_v12 = vrot.slane (!%p266_p9), %v2634_v5, %v312_v7  ;;  %v328_v13 = vrot.slane (!%p266_p9), %v2634_v5, %v316_v8  ;;  %v313_v14 = vrot.slane (!%p266_p9), %v308_v6, %v312_v7  ;;  %v317_v15 = vrot.slane (!%p266_p9), %v308_v6, %v316_v8 }
  0x14   : > { %vm619_vm7 = vcmask (!%p266_p9), 916480   ;;  %vm487_vm8 = vcmask (!%p266_p9), 130048   ;;  %vm667_vm9 = vcmask (!%p266_p9), 326656  }
  0x15   : > { %s300_s19 = scalar_select %p299_p10, %s2965_s9, 1  ;;  %v496_v16 = vcombine.low %v324_v12, %v328_v13  ;;  %v449_v17 = vcombine.low %v313_v14, %v317_v15  ;;  %v2784_v18 = vld [vmem:[#allocation2 + $0xc] ss:$0 sps:$4 sm:$0xff]  }
  0x16   : > { %v557_v24 = vld [vmem:[#allocation2 + $0xc] sm:$0xf] }
  0x17   : > { %s2659_s24 = sshll.u32 %s300_s19, 4  ;;  %497 = vrot.lane.b32.xlu1 %v496_v16, %s2890_s17  ;;  %450 = vrot.lane.b32.xlu0 %v449_v17, %s2891_s18  ;;  %s2892_s19 = smov 127   ;;  %v583_v27 = vld [vmem:[#allocation2 + $0xc] sm:$0xf] }
  0x18   : > { %s3012_s10 = scalar_lea.vmem %s3706_s0, %s2659_s24  ;;  %s2897_s24 = smov 16   ;;  %v627_v13 = vld [vmem:[#allocation2 + $0xc] sm:$0xf] }
  0x19   : > { %v332_v9 = vld [vmem:[%s3012_s10 + $0x8] sm:$0xff]  ;;  %v331_v10 = vld [vmem:[%s3012_s10] sm:$0xff] }
  0x1a   : > { %352 = vmatprep.subr.mxu0 %v332_v9  ;;  %v890_v9 = vld [vmem:[#allocation2 + $0xc] sm:$0xf] }
  0x1b   : > { %353 = vmatpush1.msra.mxu0 %v331_v10  ;;  %524 = vrot.lane.b32.xlu1 %v449_v17, %s2892_s19  ;;  %v833_v15 = vld [vmem:[#allocation2 + $0xc] sm:$0xf] }
  0x1c   : > { %2635 = vmatmul.mubr.msk.f32.vlgmr.msra.gmra.mrb[0].mxu0 %vm345_vm0, %v329_v11  ;;  %584 = vrot.lane.b32.xlu0 %v449_v17, %s2893_s20 }
  0x1d   : > { %422 = vmatprep.mubr.f32.mxu0 %v2888_v2 }
  0x1f   : > { %558 = vrot.lane.b32.xlu1 %v496_v16, %s2894_s21 }
  0x20   : > { %628 = vrot.lane.b32.xlu0 %v496_v16, %s2895_s22  ;;  %v661_v16 = vld [vmem:[%s3710_s4] sm:$0xf] }
  0x24   : > { %617 = vrot.lane.b32.xlu0 %v2784_v18, %s2896_s23 }
  0x89   : > { %v498_v19 = vpop.permute.xlu1 %497 }
  0x8a   : > { %v3054_v48 = vrot.slane %v498_v19, 4 }
  0x8c   : > { %v3070_v56 = vsel %vm500_vm3, %v3054_v48, %v498_v19  ;;  %v853_v19 = vld [vmem:[#allocation2 + $0xc] sm:$0xf] }
  0x8d   : > { %v525_v20 = vpop.permute.xlu1 %524 }
  0x8e   : > { %v338_v21 = vpop.permute.xlu0 %337  ;;  %v3044_v41 = vrot.slane %v525_v20, 4 }
  0x90   : > { %v3051_v45 = vsel %vm527_vm1, %v3044_v41, %v525_v20 }
  0x91   : > { %v559_v23 = vpop.permute.xlu1 %558 }
  0x92   : > { %v451_v22 = vpop.permute.xlu0 %450  ;;  %v3028_v25 = vrot.slane %v559_v23, 4 }
  0x93   : > { %v3042_v40 = vrot.slane %v451_v22, 4 }
  0x94   : > { %v565_v29 = vmul.f32 %v3028_v25, %v557_v24  ;;  %v3076_v59 = vsel %vm543_vm4, %v3028_v25, %v559_v23  ;;  %v835_v17 = vmul.f32 %v833_v15, %v3028_v25 }
  0x95   : > { %v3060_v50 = vsel %vm453_vm2, %v3042_v40, %v451_v22  ;;  %v2787_v22 = vld [vmem:[#allocation2 + $0xc] ss:$0 sps:$4 sm:$0xff]  }
  0x96   : > { %v3030_v26 = vpop.permute.xlu0 %584  ;;  %v569_v31 = vcombine.low %v565_v29, %v565_v29  ;;  %v839_v18 = vcombine.low %v835_v17, %v835_v17 }
  0x97   : > { %v3033_v28 = vrot.slane %v3030_v26, 4 }
  0x99   : > { %v591_v30 = vmul.f32 %v3033_v28, %v583_v27  ;;  %v3087_v0 = vsel %vm515_vm5, %v3033_v28, %v3030_v26  ;;  %v855_v20 = vmul.f32 %v853_v19, %v3033_v28  ;;  %v1114_v26 = vld [vmem:[#allocation2 + $0xc] sm:$0xf] }
  0x9a   : > { %v629_v57 = vpop.permute.xlu0 %628  ;;  %v1116_v27 = vmul.f32 %v1114_v26, %v3033_v28 }
  0x9b   : > { %599 = vrot.lane.b32.xlu0 %v591_v30, %s2890_s17  ;;  %v3079_v61 = vrot.slane %v629_v57, 4 }
  0x9d   : > { %v3091_v1 = vsel %vm468_vm6, %v3079_v61, %v629_v57  ;;  %v892_v11 = vmul.f32 %v890_v9, %v3079_v61  ;;  %v635_v14 = vmul.f32 %v3079_v61, %v627_v13 }
  0x9e   : > { %v618_v29 = vpop.permute.xlu0 %617 }
  0x9f   : > { %574 = vrot.lane.b32.xlu0 %v569_v31, %s2892_s19 }
  0xef   : > { %v418_v32 = vpop.f32.mrb[0].mxu0 }
  0xf0   : > { %v419_v33 = vadd.f32 %v418_v32, %v338_v21  ;;  %v420_v34 = vpop.f32.mrb[1].mxu0 }
  0xf1   : > { %v421_v35 = vadd.f32 %v420_v34, %v338_v21  ;;  %v1094_v21 = vld [vmem:[#allocation2 + $0xc] sm:$0xf] }
  0xf2   : > { %429 = vst [vmem:[#allocation4] sm:$0xff] %v419_v33  ;;  %v1096_v23 = vmul.f32 %v1094_v21, %v3028_v25 }
  0xf3   : > { %430 = vst [vmem:[#allocation4 + $0x8] sm:$0xff] %v421_v35 }
  0xf4   : > { %v1100_v24 = vcombine.low %v1096_v23, %v1096_v23 }
  0xf9   : > { %v3039_v36 = vld [vmem:[#allocation4] sm:$0xf] }
  0xfa   : > { %v440_v37 = vld [vmem:[#allocation4 + $0x8] sm:$0xf]  ;;  %v2809_v12 = vcombine.low %v3039_v36, %v3039_v36 }
  0xfb   : > { %v444_v38 = vcombine.low %v3039_v36, %v440_v37  ;;  %v2808_v39 = vcombine.low %v440_v37, %v440_v37 }
  0xfd   : > { %446 = vst [vmem:[#allocation2 + $0x4] sm:$0xff] %v444_v38  ;;  %554 = vst [vmem:[#allocation3 + $0x20] sm:$0xf] %v444_v38  ;;  %v564_v62 = vmul.f32 %v3076_v59, %v444_v38  ;;  %v590_v4 = vmul.f32 %v3087_v0, %v444_v38  ;;  %v634_v5 = vmul.f32 %v3091_v1, %v444_v38 }
  0xfe   : > { %555 = vst [vmem:[#allocation3 + $0x28] sm:$0xf] %v2808_v39 }
  0xff   : > { %v638_v7 = vcombine.high %v634_v5, %v634_v5  ;;  %v594_v8 = vcombine.high %v590_v4, %v590_v4  ;;  %v568_v10 = vcombine.low %v564_v62, %v564_v62 }
 0x104   : > { %v475_v42 = vld [vmem:[#allocation2] sm:$0xff]  ;;  %v448_v43 = vld [vmem:[#allocation2 + $0x8] sm:$0xf] }
 0x105   : > { %483 = vrot.lane.b32.xlu1 %v475_v42, %s2897_s24  ;;  %v458_v44 = vmul.f32 %v3042_v40, %v448_v43  ;;  %v2785_v46 = vld [vmem:[#allocation2 + $0x8] ss:$0 sps:$4 sm:$0xff]   ;;  %v531_v49 = vmul.f32 %v3051_v45, %v475_v42  ;;  %v457_v53 = vmul.f32 %v475_v42, %v3060_v50  ;;  %v479_v54 = vcombine.low %v475_v42, %v475_v42 }
 0x106   : > { %v495_v47 = vld [vmem:[#allocation2 + $0x8] sm:$0xf]  ;;  %v504_v58 = vmul.f32 %v3070_v56, %v475_v42 }
 0x107   : > { %466 = vrot.lane.b32.xlu0 %v458_v44, %s2895_s22  ;;  %v505_v51 = vmul.f32 %v3054_v48, %v495_v47  ;;  %v523_v52 = vld [vmem:[#allocation2 + $0x8] sm:$0xf]  ;;  %v535_v63 = vcombine.low %v531_v49, %v531_v49  ;;  %v461_v3 = vcombine.high %v457_v53, %v457_v53 }
 0x108   : > { %v532_v55 = vmul.f32 %v3044_v41, %v523_v52  ;;  %v508_v6 = vcombine.high %v504_v58, %v504_v58 }
 0x109   : > { %615 = vrot.lane.b32.xlu1 %v444_v38, %s2896_s23 }
 0x10a   : > { %v536_v60 = vcombine.low %v532_v55, %v532_v55 }
 0x10b   : > { %485 = vrot.lane.b32.xlu0 %v2785_v46, %s2897_s24 }
 0x10d   : > { %539 = vrot.lane.b32.xlu1 %v531_v49, %s2894_s21  ;;  %v600_v30 = vpop.permute.xlu0 %599 }
 0x10f   : > { %513 = vrot.lane.b32.xlu0 %v505_v51, %s2893_s20 }
 0x111   : > { %462 = vrot.lane.b32.xlu1 %v457_v53, %s2895_s22  ;;  %v575_v31 = vpop.permute.xlu0 %574 }
 0x113   : > { %481 = vrot.lane.b32.xlu0 %v479_v54, %s2897_s24 }
 0x115   : > { %509 = vrot.lane.b32.xlu1 %v504_v58, %s2893_s20 }
 0x117   : > { %541 = vrot.lane.b32.xlu0 %v536_v60, %s2894_s21 }
 0x119   : > { %572 = vrot.lane.b32.xlu1 %v564_v62, %s2892_s19 }
 0x11b   : > { %537 = vrot.lane.b32.xlu0 %v535_v63, %s2894_s21 }
 0x11d   : > { %464 = vrot.lane.b32.xlu1 %v461_v3, %s2895_s22 }
 0x11f   : > { %595 = vrot.lane.b32.xlu0 %v590_v4, %s2890_s17 }
 0x121   : > { %511 = vrot.lane.b32.xlu1 %v508_v6, %s2893_s20 }
 0x123   : > { %641 = vrot.lane.b32.xlu0 %v638_v7, %s2891_s18 }
 0x125   : > { %597 = vrot.lane.b32.xlu1 %v594_v8, %s2890_s17 }
 0x127   : > { %639 = vrot.lane.b32.xlu0 %v634_v5, %s2891_s18 }
 0x129   : > { %570 = vrot.lane.b32.xlu1 %v568_v10, %s2892_s19 }
 0x12b   : > { %900 = vrot.lane.b32.xlu0 %v892_v11, %s2891_s18 }
 0x12d   : > { %613 = vrot.lane.b32.xlu1 %v2809_v12, %s2896_s23 }
 0x131   : > { %643 = vrot.lane.b32.xlu1 %v635_v14, %s2891_s18 }
 0x135   : > { %664 = vperm.xlu1 %2783, %v661_v16  }
 0x139   : > { %844 = vrot.lane.b32.xlu1 %v839_v18, %s2892_s19 }
 0x13d   : > { %863 = vrot.lane.b32.xlu1 %v855_v20, %s2890_s17 }
 0x141   : > { %881 = vrot.lane.b32.xlu1 %v2787_v22, %s2896_s23 }
 0x145   : > { %1105 = vrot.lane.b32.xlu1 %v1100_v24, %s2892_s19 }
 0x149   : > { %1124 = vrot.lane.b32.xlu1 %v1116_v27, %s2890_s17 }
 0x177   : > { %v484_v32 = vpop.permute.xlu1 %483 }
 0x179   : > { %v467_v33 = vpop.permute.xlu0 %466 }
 0x17b   : > { %v616_v34 = vpop.permute.xlu1 %615 }
 0x17c   : > { %v621_v35 = vsel %vm619_vm7, %v616_v34, %v618_v29 }
 0x17d   : > { %625 = vst [vmem:[#allocation3 + $0x38] sm:$0xf0] %v621_v35  ;;  %v486_v36 = vpop.permute.xlu0 %485 }
 0x17e   : > { %v489_v37 = vsel %vm487_vm8, %v484_v32, %v486_v36 }
 0x17f   : > { %493 = vst [vmem:[#allocation3 + $0x8] sm:$0xf0] %v489_v37  ;;  %v540_v38 = vpop.permute.xlu1 %539  ;;  %v994_v37 = vld [vmem:[#allocation4] sm:$0xf0] }
 0x181   : > { %v514_v39 = vpop.permute.xlu0 %513 }
 0x183   : > { %v463_v42 = vpop.permute.xlu1 %462 }
 0x185   : > { %v482_v43 = vpop.permute.xlu0 %481 }
 0x186   : > { %v488_v44 = vsel %vm487_vm8, %v482_v43, %v484_v32 }
 0x187   : > { %492 = vst [vmem:[#allocation3] sm:$0xf0] %v488_v44  ;;  %v510_v46 = vpop.permute.xlu1 %509 }
 0x189   : > { %v542_v47 = vpop.permute.xlu0 %541 }
 0x18a   : > { %v545_v49 = vsel %vm543_vm4, %v540_v38, %v542_v47 }
 0x18b   : > { %549 = vst [vmem:[#allocation3 + $0x18] sm:$0xf0] %v545_v49  ;;  %v573_v51 = vpop.permute.xlu1 %572 }
 0x18c   : > { %v577_v52 = vsel %vm527_vm1, %v573_v51, %v575_v31  ;;  %v441_v31 = vld [vmem:[%s3709_s3] sm:$0xf] }
 0x18d   : > { %581 = vst [vmem:[#allocation3 + $0x28] sm:$0xf0] %v577_v52  ;;  %v538_v53 = vpop.permute.xlu0 %537 }
 0x18e   : > { %v544_v54 = vsel %vm543_vm4, %v538_v53, %v540_v38 }
 0x18f   : > { %548 = vst [vmem:[#allocation3 + $0x10] sm:$0xf0] %v544_v54  ;;  %v465_v55 = vpop.permute.xlu1 %464 }
 0x190   : > { %v469_v57 = vsel %vm468_vm6, %v463_v42, %v465_v55  ;;  %v470_v58 = vsel %vm468_vm6, %v465_v55, %v467_v33  ;;  %v2788_v33 = vld [vmem:[#allocation2 + $0xc] ss:$0 sps:$4 sm:$0xff]  }
 0x191   : > { %473 = vst [vmem:[#allocation3] sm:$0xf] %v469_v57  ;;  %474 = vst [vmem:[#allocation3 + $0x8] sm:$0xf] %v470_v58  ;;  %v596_v60 = vpop.permute.xlu0 %595  ;;  %1142 = vrot.lane.b32.xlu1 %v2788_v33, %s2896_s23  ;;  %v995_v42 = vld [vmem:[#allocation4 + $0x8] sm:$0xf0] }
 0x192   : > { %v999_v49 = vrot.slane %v995_v42, 4 }
 0x193   : > { %v512_v62 = vpop.permute.xlu1 %511 }
 0x194   : > { %v516_v63 = vsel %vm515_vm5, %v510_v46, %v512_v62  ;;  %v517_v3 = vsel %vm515_vm5, %v512_v62, %v514_v39  ;;  %v656_v19 = vld [vmem:[#allocation3 + $0x28] sm:$0xff]  ;;  %v998_v46 = vrot.slane %v994_v37, 4 }
 0x195   : > { %520 = vst [vmem:[#allocation3 + $0x10] sm:$0xf] %v516_v63  ;;  %521 = vst [vmem:[#allocation3 + $0x18] sm:$0xf] %v517_v3  ;;  %v642_v4 = vpop.permute.xlu0 %641 }
 0x197   : > { %v598_v5 = vpop.permute.xlu1 %597 }
 0x198   : > { %v601_v6 = vsel %vm500_vm3, %v596_v60, %v598_v5  ;;  %v602_v7 = vsel %vm500_vm3, %v598_v5, %v600_v30  ;;  %v651_v10 = vld [vmem:[#allocation3] sm:$0xff]  ;;  %v652_v12 = vld [vmem:[#allocation3 + $0x8] sm:$0xff] }
 0x199   : > { %605 = vst [vmem:[#allocation3 + $0x30] sm:$0xf] %v601_v6  ;;  %606 = vst [vmem:[#allocation3 + $0x38] sm:$0xf] %v602_v7  ;;  %v640_v8 = vpop.permute.xlu0 %639 }
 0x19a   : > { %v645_v9 = vsel %vm453_vm2, %v640_v8, %v642_v4 }
 0x19b   : > { %649 = vst [vmem:[#allocation3 + $0x40] sm:$0xf] %v645_v9  ;;  %v571_v11 = vpop.permute.xlu1 %570 }
 0x19c   : > { %v653_v13 = vld [vmem:[#allocation3 + $0x10] sm:$0xff]  ;;  %v654_v14 = vld [vmem:[#allocation3 + $0x18] sm:$0xff]  ;;  %v576_v15 = vsel %vm527_vm1, %v571_v11, %v573_v51 }
 0x19d   : > { %580 = vst [vmem:[#allocation3 + $0x20] sm:$0xf0] %v576_v15  ;;  %v2661_v16 = vpack.c.bf16 %v654_v14, %v652_v12  ;;  %v2663_v17 = vpack.c.bf16 %v653_v13, %v651_v10 }
 0x19f   : > { %2662 = vmatprep.subr.bf16.mxu1 %v2661_v16  ;;  %v614_v18 = vpop.permute.xlu1 %613 }
 0x1a0   : > { %v658_v20 = vld [vmem:[#allocation3 + $0x38] sm:$0xff]  ;;  %v620_v21 = vsel %vm619_vm7, %v614_v18, %v616_v34  ;;  %2664 = vmatpush1.bf16.msra.mxu1 %v2663_v17 }
 0x1a1   : > { %624 = vst [vmem:[#allocation3 + $0x30] sm:$0xf0] %v620_v21  ;;  %v2665_v22 = vpack.c.bf16 %v658_v20, %v656_v19  ;;  %v330_v34 = vld [vmem:[%s3707_s1 + $0x8] sm:$0xff] }
 0x1a2   : > { %v659_v32 = vld [vmem:[#allocation3 + $0x40] sm:$0xff]  ;;  %2636 = vmatmul.mubr.msk.f32.gmra.mrb[2].mxu0 %vm345_vm0, %v330_v34 }
 0x1a3   : > { %2666 = vmatprep.subr.bf16.mxu1 %v2665_v22  ;;  %v644_v23 = vpop.permute.xlu1 %643  ;;  %985 = vmatprep.mubr.f32.mxu0 %v2888_v2 }
 0x1a4   : > { %v646_v24 = vsel %vm453_vm2, %v642_v4, %v644_v23  ;;  %v655_v26 = vld [vmem:[#allocation3 + $0x20] sm:$0xff] }
 0x1a5   : > { %650 = vst [vmem:[#allocation3 + $0x48] sm:$0xf] %v646_v24 }
 0x1a8   : > { %v657_v27 = vld [vmem:[#allocation3 + $0x30] sm:$0xff] }
 0x1a9   : > { %v2667_v29 = vpack.c.bf16 %v657_v27, %v655_v26 }
 0x1ab   : > { %2668 = vmatpush1.bf16.msra.mxu1 %v2667_v29 }
 0x1ac   : > { %v660_v30 = vld [vmem:[#allocation3 + $0x48] sm:$0xff] }
 0x1ad   : > { %679 = vmatprep.subr.mxu1 %v660_v30 }
 0x1af   : > { %680 = vmatpush1.msra.mxu1 %v659_v32 }
 0x1b0   : > { %2637 = vmatmul.mubr.msk.f32.vlgmr.msra.gmra.mrb[0].mxu1 %vm667_vm9, %v441_v31 }
 0x1b1   : > { %1253 = vmatprep.mubr.f32.mxu1 %v2888_v2 }
 0x1b4   : > { %v665_v35 = vpop.permute.xlu1 %664 }
 0x283   : > { %v737_v36 = vpop.f32.mrb[0].mxu1 }
 0x284   : > { %v738_v38 = vadd.f32 %v737_v36, %v665_v35  ;;  %v739_v39 = vpop.f32.mrb[1].mxu1 }
 0x285   : > { %v740_v43 = vadd.f32 %v739_v39, %v665_v35 }
 0x286   : > { %v742_v44 = vmax.f32 %v738_v38, 0.0 }
 0x287   : > { %v743_v47 = vmax.f32 %v740_v43, 0.0 }
 0x288   : > { %v3149_v51 = vadd.f32 %v998_v46, %v742_v44  ;;  %v2811_v13 = vcombine.low %v742_v44, %v742_v44 }
 0x289   : > { %v747_v52 = vcombine.low %v742_v44, %v743_v47  ;;  %v3151_v53 = vadd.f32 %v999_v49, %v743_v47  ;;  %v2810_v55 = vcombine.low %v743_v47, %v743_v47  ;;  %v1352_v44 = vld [vmem:[#allocation2 + $0xc] sm:$0xf]  ;;  %v2640_v47 = vld [vmem:[%s3710_s4 + $0x4] sm:$0xf] }
 0x28a   : > { %v1354_v49 = vmul.f32 %v1352_v44, %v3028_v25 }
 0x28b   : > { %749 = vst [vmem:[#allocation2 + $0x4] sm:$0xff] %v747_v52  ;;  %v3155_v54 = vcombine.low %v3149_v51, %v3151_v53  ;;  %830 = vst [vmem:[#allocation3 + $0x20] sm:$0xf] %v747_v52  ;;  %v854_v9 = vmul.f32 %v747_v52, %v3087_v0  ;;  %v834_v10 = vmul.f32 %v747_v52, %v3076_v59 }
 0x28c   : > { %831 = vst [vmem:[#allocation3 + $0x28] sm:$0xf] %v2810_v55  ;;  %v891_v11 = vmul.f32 %v747_v52, %v3091_v1  ;;  %v1358_v55 = vcombine.low %v1354_v49, %v1354_v49 }
 0x28d   : > { %v858_v19 = vcombine.high %v854_v9, %v854_v9  ;;  %v838_v21 = vcombine.low %v834_v10, %v834_v10  ;;  %v1115_v36 = vmul.f32 %v3155_v54, %v3087_v0  ;;  %v1152_v37 = vmul.f32 %v3155_v54, %v3091_v1 }
 0x28e   : > { %v895_v18 = vcombine.high %v891_v11, %v891_v11  ;;  %v1095_v38 = vmul.f32 %v3155_v54, %v3076_v59 }
 0x28f   : > { %v1156_v42 = vcombine.high %v1152_v37, %v1152_v37 }
 0x292   : > { %v769_v57 = vld [vmem:[#allocation2] sm:$0xff]  ;;  %v751_v58 = vld [vmem:[#allocation2 + $0x8] sm:$0xf] }
 0x293   : > { %777 = vrot.lane.b32.xlu0 %v769_v57, %s2897_s24  ;;  %v753_v60 = vmul.f32 %v751_v58, %v3042_v40  ;;  %v2789_v62 = vld [vmem:[#allocation2 + $0x8] ss:$0 sps:$4 sm:$0xff]   ;;  %v808_v4 = vmul.f32 %v769_v57, %v3051_v45  ;;  %v752_v6 = vmul.f32 %v769_v57, %v3060_v50  ;;  %v773_v7 = vcombine.low %v769_v57, %v769_v57 }
 0x294   : > { %v788_v63 = vld [vmem:[#allocation2 + $0x8] sm:$0xf]  ;;  %v789_v8 = vmul.f32 %v769_v57, %v3070_v56  ;;  %v1372_v57 = vld [vmem:[#allocation2 + $0xc] sm:$0xf]  ;;  %v1099_v58 = vcombine.low %v1095_v38, %v1095_v38 }
 0x295   : > { %v807_v3 = vld [vmem:[#allocation2 + $0x8] sm:$0xf]  ;;  %761 = vrot.lane.b32.xlu1 %v753_v60, %s2895_s22  ;;  %v790_v5 = vmul.f32 %v788_v63, %v3054_v48  ;;  %v756_v15 = vcombine.high %v752_v6, %v752_v6  ;;  %v812_v16 = vcombine.low %v808_v4, %v808_v4  ;;  %v1374_v60 = vmul.f32 %v1372_v57, %v3033_v28  ;;  %v845_v63 = vpop.permute.xlu1 %844 }
 0x296   : > { %1010 = vst [vmem:[#allocation2 + $0x4] sm:$0xff] %v3155_v54  ;;  %v809_v12 = vmul.f32 %v807_v3, %v3044_v41  ;;  %v793_v17 = vcombine.high %v789_v8, %v789_v8  ;;  %v2812_v3 = vcombine.low %v3149_v51, %v3149_v51  ;;  %v1627_v51 = vld [vmem:[#allocation2 + $0xc] sm:$0xf] }
 0x297   : > { %879 = vrot.lane.b32.xlu0 %v747_v52, %s2896_s23  ;;  %v1119_v52 = vcombine.high %v1115_v36, %v1115_v36 }
 0x298   : > { %v813_v14 = vcombine.low %v809_v12, %v809_v12  ;;  %v1409_v12 = vld [vmem:[#allocation2 + $0xc] sm:$0xf] }
 0x299   : > { %779 = vrot.lane.b32.xlu1 %v2789_v62, %s2897_s24  ;;  %v1607_v62 = vld [vmem:[#allocation2 + $0xc] sm:$0xf] }
 0x29b   : > { %816 = vrot.lane.b32.xlu0 %v808_v4, %s2894_s21  ;;  %v2793_v4 = vld [vmem:[#allocation2 + $0xc] ss:$0 sps:$4 sm:$0xff]  }
 0x29d   : > { %798 = vrot.lane.b32.xlu1 %v790_v5, %s2893_s20  ;;  %v1030_v20 = vld [vmem:[#allocation2] sm:$0xff]  ;;  %v1012_v23 = vld [vmem:[#allocation2 + $0x8] sm:$0xf]  ;;  %v1151_v5 = vld [vmem:[#allocation2 + $0xc] sm:$0xf] }
 0x29e   : > { %v1069_v22 = vmul.f32 %v1030_v20, %v3051_v45  ;;  %v1013_v24 = vmul.f32 %v1030_v20, %v3060_v50  ;;  %v1014_v26 = vmul.f32 %v1012_v23, %v3042_v40  ;;  %v1050_v27 = vmul.f32 %v1030_v20, %v3070_v56  ;;  %v2791_v29 = vld [vmem:[#allocation2 + $0x8] ss:$0 sps:$4 sm:$0xff]  }
 0x29f   : > { %757 = vrot.lane.b32.xlu0 %v752_v6, %s2895_s22  ;;  %v1049_v30 = vld [vmem:[#allocation2 + $0x8] sm:$0xf]  ;;  %v1034_v34 = vcombine.low %v1030_v20, %v1030_v20  ;;  %v1609_v6 = vmul.f32 %v1607_v62, %v3028_v25 }
 0x2a0   : > { %v1017_v31 = vcombine.high %v1013_v24, %v1013_v24  ;;  %v1051_v32 = vmul.f32 %v1049_v30, %v3054_v48  ;;  %v1054_v33 = vcombine.high %v1050_v27, %v1050_v27  ;;  %v1068_v35 = vld [vmem:[#allocation2 + $0x8] sm:$0xf]  ;;  %v1073_v46 = vcombine.low %v1069_v22, %v1069_v22 }
 0x2a1   : > { %775 = vrot.lane.b32.xlu1 %v773_v7, %s2897_s24  ;;  %v1070_v39 = vmul.f32 %v1068_v35, %v3044_v41  ;;  %v1153_v7 = vmul.f32 %v1151_v5, %v3079_v61 }
 0x2a3   : > { %794 = vrot.lane.b32.xlu0 %v789_v8, %s2893_s20  ;;  %v1074_v43 = vcombine.low %v1070_v39, %v1070_v39  ;;  %v3232_v8 = vpop.permute.xlu1 %863 }
 0x2a5   : > { %859 = vrot.lane.b32.xlu1 %v854_v9, %s2890_s17  ;;  %v1613_v9 = vcombine.low %v1609_v6, %v1609_v6 }
 0x2a7   : > { %842 = vrot.lane.b32.xlu0 %v834_v10, %s2892_s19  ;;  %v334_v10 = vld [vmem:[%s3708_s2 + $0x8] sm:$0xff] }
 0x2a9   : > { %896 = vrot.lane.b32.xlu1 %v891_v11, %s2891_s18  ;;  %v3239_v11 = vpop.f32.mrb[2].mxu0 }
 0x2ab   : > { %877 = vrot.lane.b32.xlu0 %v2811_v13, %s2896_s23  ;;  %v3241_v13 = vpop.f32.mrb[3].mxu0 }
 0x2ad   : > { %818 = vrot.lane.b32.xlu1 %v813_v14, %s2894_s21  ;;  %v1629_v14 = vmul.f32 %v1627_v51, %v3033_v28 }
 0x2af   : > { %759 = vrot.lane.b32.xlu0 %v756_v15, %s2895_s22  ;;  %v882_v15 = vpop.permute.xlu1 %881 }
 0x2b1   : > { %814 = vrot.lane.b32.xlu1 %v812_v16, %s2894_s21  ;;  %v1411_v16 = vmul.f32 %v1409_v12, %v3079_v61 }
 0x2b3   : > { %796 = vrot.lane.b32.xlu0 %v793_v17, %s2893_s20  ;;  %v3247_v17 = vpop.permute.xlu1 %1105 }
 0x2b5   : > { %898 = vrot.lane.b32.xlu1 %v895_v18, %s2891_s18 }
 0x2b7   : > { %861 = vrot.lane.b32.xlu0 %v858_v19, %s2890_s17  ;;  %v3249_v18 = vpop.permute.xlu1 %1124  ;;  %v901_v19 = vpop.permute.xlu0 %900 }
 0x2b9   : > { %1038 = vrot.lane.b32.xlu1 %v1030_v20, %s2897_s24 }
 0x2bb   : > { %840 = vrot.lane.b32.xlu0 %v838_v21, %s2892_s19  ;;  %v3251_v20 = vpop.permute.xlu1 %1142 }
 0x2bd   : > { %1077 = vrot.lane.b32.xlu1 %v1069_v22, %s2894_s21 }
 0x2bf   : > { %1140 = vrot.lane.b32.xlu0 %v3155_v54, %s2896_s23 }
 0x2c1   : > { %1018 = vrot.lane.b32.xlu1 %v1013_v24, %s2895_s22 }
 0x2c3   : > { %1022 = vrot.lane.b32.xlu0 %v1014_v26, %s2895_s22 }
 0x2c5   : > { %1055 = vrot.lane.b32.xlu1 %v1050_v27, %s2893_s20 }
 0x2c7   : > { %1040 = vrot.lane.b32.xlu0 %v2791_v29, %s2897_s24 }
 0x2c9   : > { %1020 = vrot.lane.b32.xlu1 %v1017_v31, %s2895_s22 }
 0x2cb   : > { %1059 = vrot.lane.b32.xlu0 %v1051_v32, %s2893_s20 }
 0x2cd   : > { %1057 = vrot.lane.b32.xlu1 %v1054_v33, %s2893_s20 }
 0x2cf   : > { %1036 = vrot.lane.b32.xlu0 %v1034_v34, %s2897_s24 }
 0x2d1   : > { %1120 = vrot.lane.b32.xlu1 %v1115_v36, %s2890_s17 }
 0x2d3   : > { %1103 = vrot.lane.b32.xlu0 %v1095_v38, %s2892_s19 }
 0x2d5   : > { %1159 = vrot.lane.b32.xlu1 %v1156_v42, %s2891_s18 }
 0x2d7   : > { %1079 = vrot.lane.b32.xlu0 %v1074_v43, %s2894_s21 }
 0x2d9   : > { %1157 = vrot.lane.b32.xlu1 %v1152_v37, %s2891_s18 }
 0x2db   : > { %1075 = vrot.lane.b32.xlu0 %v1073_v46, %s2894_s21 }
 0x2dd   : > { %1183 = vperm.xlu1 %2783, %v2640_v47   ;;  %v2813_v47 = vcombine.low %v3151_v53, %v3151_v53 }
 0x2df   : > { %1122 = vrot.lane.b32.xlu0 %v1119_v52, %s2890_s17 }
 0x2e1   : > { %1363 = vrot.lane.b32.xlu1 %v1358_v55, %s2892_s19 }
 0x2e3   : > { %1101 = vrot.lane.b32.xlu0 %v1099_v58, %s2892_s19 }
 0x2e5   : > { %1382 = vrot.lane.b32.xlu1 %v1374_v60, %s2890_s17 }
 0x2e7   : > { %1138 = vrot.lane.b32.xlu0 %v2812_v3, %s2896_s23 }
 0x2e9   : > { %1400 = vrot.lane.b32.xlu1 %v2793_v4, %s2896_s23 }
 0x2eb   : > { %1161 = vrot.lane.b32.xlu0 %v1153_v7, %s2891_s18 }
 0x2ed   : > { %1618 = vrot.lane.b32.xlu1 %v1613_v9, %s2892_s19 }
 0x2ef   : > { %342 = vperm.xlu0 %2782, %v334_v10  }
 0x2f1   : > { %1637 = vrot.lane.b32.xlu1 %v1629_v14, %s2890_s17 }
 0x2f3   : > { %1419 = vrot.lane.b32.xlu0 %v1411_v16, %s2891_s18 }
 0x305   : > { %v778_v21 = vpop.permute.xlu0 %777 }
 0x307   : > { %v762_v22 = vpop.permute.xlu1 %761 }
 0x309   : > { %v880_v23 = vpop.permute.xlu0 %879 }
 0x30a   : > { %v884_v24 = vsel %vm619_vm7, %v880_v23, %v882_v15 }
 0x30b   : > { %888 = vst [vmem:[#allocation3 + $0x38] sm:$0xf0] %v884_v24  ;;  %v780_v26 = vpop.permute.xlu1 %779 }
 0x30c   : > { %v782_v27 = vsel %vm487_vm8, %v778_v21, %v780_v26 }
 0x30d   : > { %786 = vst [vmem:[#allocation3 + $0x8] sm:$0xf0] %v782_v27  ;;  %v817_v29 = vpop.permute.xlu0 %816 }
 0x30f   : > { %v799_v30 = vpop.permute.xlu1 %798 }
 0x311   : > { %v758_v31 = vpop.permute.xlu0 %757 }
 0x313   : > { %v776_v32 = vpop.permute.xlu1 %775 }
 0x314   : > { %v781_v33 = vsel %vm487_vm8, %v776_v32, %v778_v21 }
 0x315   : > { %785 = vst [vmem:[#allocation3] sm:$0xf0] %v781_v33  ;;  %v795_v34 = vpop.permute.xlu0 %794 }
 0x317   : > { %v860_v35 = vpop.permute.xlu1 %859 }
 0x319   : > { %v843_v36 = vpop.permute.xlu0 %842 }
 0x31a   : > { %v847_v37 = vsel %vm527_vm1, %v843_v36, %v845_v63 }
 0x31b   : > { %851 = vst [vmem:[#allocation3 + $0x28] sm:$0xf0] %v847_v37  ;;  %v897_v38 = vpop.permute.xlu1 %896 }
 0x31d   : > { %v878_v39 = vpop.permute.xlu0 %877 }
 0x31e   : > { %v883_v42 = vsel %vm619_vm7, %v878_v39, %v880_v23 }
 0x31f   : > { %887 = vst [vmem:[#allocation3 + $0x30] sm:$0xf0] %v883_v42  ;;  %v819_v43 = vpop.permute.xlu1 %818 }
 0x320   : > { %v821_v44 = vsel %vm543_vm4, %v817_v29, %v819_v43 }
 0x321   : > { %825 = vst [vmem:[#allocation3 + $0x18] sm:$0xf0] %v821_v44  ;;  %v760_v46 = vpop.permute.xlu0 %759 }
 0x322   : > { %v913_v49 = vld [vmem:[#allocation3 + $0x28] sm:$0xff]  ;;  %v763_v52 = vsel %vm468_vm6, %v758_v31, %v760_v46  ;;  %v764_v55 = vsel %vm468_vm6, %v760_v46, %v762_v22 }
 0x323   : > { %767 = vst [vmem:[#allocation3] sm:$0xf] %v763_v52  ;;  %768 = vst [vmem:[#allocation3 + $0x8] sm:$0xf] %v764_v55  ;;  %v815_v57 = vpop.permute.xlu1 %814 }
 0x324   : > { %1092 = vst [vmem:[#allocation3 + $0x28] sm:$0xf] %v2813_v47  ;;  %v820_v58 = vsel %vm543_vm4, %v815_v57, %v817_v29 }
 0x325   : > { %824 = vst [vmem:[#allocation3 + $0x10] sm:$0xf0] %v820_v58  ;;  %v797_v60 = vpop.permute.xlu0 %796 }
 0x326   : > { %v800_v62 = vsel %vm515_vm5, %v795_v34, %v797_v60  ;;  %v801_v63 = vsel %vm515_vm5, %v797_v60, %v799_v30 }
 0x327   : > { %804 = vst [vmem:[#allocation3 + $0x10] sm:$0xf] %v800_v62  ;;  %805 = vst [vmem:[#allocation3 + $0x18] sm:$0xf] %v801_v63  ;;  %v899_v53 = vpop.permute.xlu1 %898 }
 0x328   : > { %v902_v3 = vsel %vm453_vm2, %v897_v38, %v899_v53  ;;  %v903_v4 = vsel %vm453_vm2, %v899_v53, %v901_v19 }
 0x329   : > { %906 = vst [vmem:[#allocation3 + $0x40] sm:$0xf] %v902_v3  ;;  %907 = vst [vmem:[#allocation3 + $0x48] sm:$0xf] %v903_v4  ;;  %v862_v5 = vpop.permute.xlu0 %861 }
 0x32a   : > { %v865_v6 = vsel %vm500_vm3, %v860_v35, %v862_v5  ;;  %v866_v7 = vsel %vm500_vm3, %v862_v5, %v3232_v8  ;;  %v908_v10 = vld [vmem:[#allocation3] sm:$0xff]  ;;  %v909_v12 = vld [vmem:[#allocation3 + $0x8] sm:$0xff] }
 0x32b   : > { %869 = vst [vmem:[#allocation3 + $0x30] sm:$0xf] %v865_v6  ;;  %870 = vst [vmem:[#allocation3 + $0x38] sm:$0xf] %v866_v7  ;;  %v1039_v9 = vpop.permute.xlu1 %1038 }
 0x32d   : > { %v841_v51 = vpop.permute.xlu0 %840 }
 0x32e   : > { %v910_v14 = vld [vmem:[#allocation3 + $0x10] sm:$0xff]  ;;  %v911_v15 = vld [vmem:[#allocation3 + $0x18] sm:$0xff]  ;;  %v846_v16 = vsel %vm527_vm1, %v841_v51, %v843_v36 }
 0x32f   : > { %850 = vst [vmem:[#allocation3 + $0x20] sm:$0xf0] %v846_v16  ;;  %v1078_v19 = vpop.permute.xlu1 %1077  ;;  %v2669_v21 = vpack.c.bf16 %v911_v15, %v909_v12  ;;  %v2671_v22 = vpack.c.bf16 %v910_v14, %v908_v10 }
 0x330   : > { %v917_v35 = vld [vmem:[#allocation3 + $0x48] sm:$0xff]  ;;  %v916_v39 = vld [vmem:[#allocation3 + $0x40] sm:$0xff] }
 0x331   : > { %v3272_v23 = vpop.permute.xlu0 %1140  ;;  %2670 = vmatprep.subr.bf16.mxu0 %v2669_v21 }
 0x332   : > { %v915_v24 = vld [vmem:[#allocation3 + $0x38] sm:$0xff]  ;;  %v1145_v8 = vsel %vm619_vm7, %v3272_v23, %v3251_v20  ;;  %2672 = vmatpush1.bf16.msra.mxu0 %v2671_v22  ;;  %v914_v30 = vld [vmem:[#allocation3 + $0x30] sm:$0xff] }
 0x333   : > { %1149 = vst [vmem:[#allocation3 + $0x38] sm:$0xf0] %v1145_v8  ;;  %v1019_v26 = vpop.permute.xlu1 %1018  ;;  %v2673_v27 = vpack.c.bf16 %v915_v24, %v913_v49 }
 0x335   : > { %v1023_v29 = vpop.permute.xlu0 %1022  ;;  %2674 = vmatprep.subr.bf16.mxu0 %v2673_v27 }
 0x336   : > { %v912_v31 = vld [vmem:[#allocation3 + $0x20] sm:$0xff] }
 0x337   : > { %v1056_v32 = vpop.permute.xlu1 %1055  ;;  %v2675_v33 = vpack.c.bf16 %v914_v30, %v912_v31  ;;  %1091 = vst [vmem:[#allocation3 + $0x20] sm:$0xf] %v3155_v54  ;;  %v2639_v31 = vld [vmem:[%s3709_s3 + $0x4] sm:$0xf] }
 0x339   : > { %v1041_v34 = vpop.permute.xlu0 %1040  ;;  %2676 = vmatpush1.bf16.msra.mxu0 %v2675_v33 }
 0x33a   : > { %v1043_v36 = vsel %vm487_vm8, %v1039_v9, %v1041_v34  ;;  %929 = vmatprep.subr.mxu0 %v917_v35  ;;  %v2794_v35 = vld [vmem:[#allocation2 + $0xc] ss:$0 sps:$4 sm:$0xff]  }
 0x33b   : > { %1047 = vst [vmem:[#allocation3 + $0x8] sm:$0xf0] %v1043_v36  ;;  %v1021_v20 = vpop.permute.xlu1 %1020  ;;  %1655 = vrot.lane.b32.xlu1 %v2794_v35, %s2896_s23 }
 0x33c   : > { %v1024_v37 = vsel %vm468_vm6, %v1019_v26, %v1021_v20  ;;  %v1025_v38 = vsel %vm468_vm6, %v1021_v20, %v1023_v29 }
 0x33d   : > { %1028 = vst [vmem:[#allocation3] sm:$0xf] %v1024_v37  ;;  %1029 = vst [vmem:[#allocation3 + $0x8] sm:$0xf] %v1025_v38  ;;  %v1060_v42 = vpop.permute.xlu0 %1059  ;;  %930 = vmatpush1.msra.mxu0 %v916_v39 }
 0x33f   : > { %v1058_v43 = vpop.permute.xlu1 %1057 }
 0x340   : > { %v1061_v54 = vsel %vm515_vm5, %v1056_v32, %v1058_v43  ;;  %v1062_v44 = vsel %vm515_vm5, %v1058_v43, %v1060_v42 }
 0x341   : > { %1065 = vst [vmem:[#allocation3 + $0x10] sm:$0xf] %v1061_v54  ;;  %1066 = vst [vmem:[#allocation3 + $0x18] sm:$0xf] %v1062_v44  ;;  %v1037_v46 = vpop.permute.xlu0 %1036 }
 0x342   : > { %v1042_v47 = vsel %vm487_vm8, %v1037_v46, %v1039_v9 }
 0x343   : > { %1046 = vst [vmem:[#allocation3] sm:$0xf0] %v1042_v47  ;;  %v1121_v49 = vpop.permute.xlu1 %1120 }
 0x344   : > { %v1170_v6 = vld [vmem:[#allocation3 + $0x8] sm:$0xff] }
 0x345   : > { %v1104_v52 = vpop.permute.xlu0 %1103 }
 0x346   : > { %v1108_v55 = vsel %vm527_vm1, %v1104_v52, %v3247_v17 }
 0x347   : > { %1112 = vst [vmem:[#allocation3 + $0x28] sm:$0xf0] %v1108_v55  ;;  %v1160_v57 = vpop.permute.xlu1 %1159 }
 0x349   : > { %v1080_v58 = vpop.permute.xlu0 %1079 }
 0x34a   : > { %v1082_v60 = vsel %vm543_vm4, %v1078_v19, %v1080_v58  ;;  %v1169_v12 = vld [vmem:[#allocation3] sm:$0xff] }
 0x34b   : > { %1086 = vst [vmem:[#allocation3 + $0x18] sm:$0xf0] %v1082_v60  ;;  %v1158_v62 = vpop.permute.xlu1 %1157 }
 0x34c   : > { %v1163_v63 = vsel %vm453_vm2, %v1158_v62, %v1160_v57 }
 0x34d   : > { %1167 = vst [vmem:[#allocation3 + $0x40] sm:$0xf] %v1163_v63  ;;  %v1076_v53 = vpop.permute.xlu0 %1075 }
 0x34e   : > { %v1081_v3 = vsel %vm543_vm4, %v1076_v53, %v1078_v19  ;;  %v1174_v21 = vld [vmem:[#allocation3 + $0x28] sm:$0xff] }
 0x34f   : > { %1085 = vst [vmem:[#allocation3 + $0x10] sm:$0xf0] %v1081_v3 }
 0x351   : > { %v1123_v4 = vpop.permute.xlu0 %1122 }
 0x352   : > { %v1126_v5 = vsel %vm500_vm3, %v1121_v49, %v1123_v4  ;;  %v1127_v17 = vsel %vm500_vm3, %v1123_v4, %v3249_v18  ;;  %v1172_v7 = vld [vmem:[#allocation3 + $0x18] sm:$0xff] }
 0x353   : > { %1130 = vst [vmem:[#allocation3 + $0x30] sm:$0xf] %v1126_v5  ;;  %1131 = vst [vmem:[#allocation3 + $0x38] sm:$0xf] %v1127_v17  ;;  %v2677_v9 = vpack.c.bf16 %v1172_v7, %v1170_v6 }
 0x355   : > { %v1102_v10 = vpop.permute.xlu0 %1101  ;;  %2678 = vmatprep.subr.bf16.mxu1 %v2677_v9 }
 0x356   : > { %v1107_v51 = vsel %vm527_vm1, %v1102_v10, %v1104_v52  ;;  %v1171_v14 = vld [vmem:[#allocation3 + $0x10] sm:$0xff] }
 0x357   : > { %1111 = vst [vmem:[#allocation3 + $0x20] sm:$0xf0] %v1107_v51  ;;  %v2679_v15 = vpack.c.bf16 %v1171_v14, %v1169_v12 }
 0x359   : > { %v1139_v16 = vpop.permute.xlu0 %1138  ;;  %2680 = vmatpush1.bf16.msra.mxu1 %v2679_v15 }
 0x35a   : > { %v1144_v19 = vsel %vm619_vm7, %v1139_v16, %v3272_v23  ;;  %v1176_v18 = vld [vmem:[#allocation3 + $0x38] sm:$0xff]  ;;  %v1177_v23 = vld [vmem:[#allocation3 + $0x40] sm:$0xff] }
 0x35b   : > { %1148 = vst [vmem:[#allocation3 + $0x30] sm:$0xf0] %v1144_v19  ;;  %v2681_v22 = vpack.c.bf16 %v1176_v18, %v1174_v21  ;;  %v744_v19 = vld [vmem:[%s3711_s5] sm:$0xff] }
 0x35c   : > { %v1184_v36 = vpop.permute.xlu1 %1183  ;;  %2638 = vmatmul.mubr.msk.f32.vlgmr.msra.gmra.mrb[4].mxu0 %vm667_vm9, %v744_v19 }
 0x35d   : > { %v1162_v24 = vpop.permute.xlu0 %1161  ;;  %2682 = vmatprep.subr.bf16.mxu1 %v2681_v22  ;;  %1504 = vmatprep.mubr.f32.mxu0 %v2888_v2 }
 0x35e   : > { %v1164_v8 = vsel %vm453_vm2, %v1160_v57, %v1162_v24  ;;  %v1173_v26 = vld [vmem:[#allocation3 + $0x20] sm:$0xff] }
 0x35f   : > { %1168 = vst [vmem:[#allocation3 + $0x48] sm:$0xf] %v1164_v8 }
 0x362   : > { %v1175_v27 = vld [vmem:[#allocation3 + $0x30] sm:$0xff] }
 0x363   : > { %v2683_v29 = vpack.c.bf16 %v1175_v27, %v1173_v26 }
 0x365   : > { %2684 = vmatpush1.bf16.msra.mxu1 %v2683_v29 }
 0x366   : > { %v1178_v30 = vld [vmem:[#allocation3 + $0x48] sm:$0xff] }
 0x367   : > { %1197 = vmatprep.subr.mxu1 %v1178_v30 }
 0x369   : > { %1198 = vmatpush1.msra.mxu1 %v1177_v23 }
 0x36a   : > { %2641 = vmatmul.mubr.msk.f32.vlgmr.msra.gmra.mrb[2].mxu1 %vm667_vm9, %v2639_v31 }
 0x36b   : > { %1766 = vmatprep.mubr.f32.mxu1 %v2888_v2 }
 0x36e   : > { %v343_v32 = vpop.permute.xlu0 %342 }
 0x36f   : > { %v425_v33 = vadd.f32 %v3239_v11, %v343_v32  ;;  %v427_v34 = vadd.f32 %v3241_v13, %v343_v32 }
 0x371   : > { %431 = vst [vmem:[#allocation4 + $0x10] sm:$0xff] %v425_v33  ;;  %432 = vst [vmem:[#allocation4 + $0x18] sm:$0xff] %v427_v34 }
 0x378   : > { %v1513_v43 = vld [vmem:[#allocation4 + $0x10] sm:$0xf]  ;;  %v1514_v46 = vld [vmem:[#allocation4 + $0x18] sm:$0xf] }
 0x43d   : > { %v1255_v20 = vpop.f32.mrb[2].mxu1 }
 0x43e   : > { %v1256_v37 = vadd.f32 %v1255_v20, %v1184_v36  ;;  %v1257_v38 = vpop.f32.mrb[3].mxu1 }
 0x43f   : > { %v1258_v39 = vadd.f32 %v1257_v38, %v1184_v36 }
 0x440   : > { %v1260_v42 = vmax.f32 %v1256_v37, 0.0 }
 0x441   : > { %v1261_v54 = vmax.f32 %v1258_v39, 0.0 }
 0x442   : > { %v3304_v44 = vadd.f32 %v1513_v43, %v1260_v42  ;;  %v2815_v10 = vcombine.low %v1260_v42, %v1260_v42  ;;  %v1922_v43 = vld [vmem:[#allocation2 + $0xc] sm:$0xf] }
 0x443   : > { %v1266_v47 = vcombine.low %v1260_v42, %v1261_v54  ;;  %v3306_v11 = vadd.f32 %v1514_v46, %v1261_v54  ;;  %v2814_v49 = vcombine.low %v1261_v54, %v1261_v54  ;;  %v1924_v46 = vmul.f32 %v1922_v43, %v3079_v61 }
 0x445   : > { %v3310_v13 = vcombine.low %v3304_v44, %v3306_v11  ;;  %1268 = vst [vmem:[#allocation2 + $0x4] sm:$0xff] %v1266_v47  ;;  %1349 = vst [vmem:[#allocation3 + $0x20] sm:$0xf] %v1266_v47  ;;  %v1373_v17 = vmul.f32 %v1266_v47, %v3087_v0  ;;  %v1353_v6 = vmul.f32 %v1266_v47, %v3076_v59 }
 0x446   : > { %1350 = vst [vmem:[#allocation3 + $0x28] sm:$0xf] %v2814_v49  ;;  %v1410_v7 = vmul.f32 %v1266_v47, %v3091_v1 }
 0x447   : > { %v1377_v21 = vcombine.high %v1373_v17, %v1373_v17  ;;  %v1357_v22 = vcombine.low %v1353_v6, %v1353_v6  ;;  %v1628_v36 = vmul.f32 %v3310_v13, %v3087_v0  ;;  %v1665_v20 = vmul.f32 %v3310_v13, %v3091_v1 }
 0x448   : > { %v1414_v16 = vcombine.high %v1410_v7, %v1410_v7  ;;  %v1608_v37 = vmul.f32 %v3310_v13, %v3076_v59 }
 0x449   : > { %v1669_v39 = vcombine.high %v1665_v20, %v1665_v20 }
 0x44a   : > { %v1612_v49 = vcombine.low %v1608_v37, %v1608_v37 }
 0x44c   : > { %v1288_v52 = vld [vmem:[#allocation2] sm:$0xff]  ;;  %v1270_v55 = vld [vmem:[#allocation2 + $0x8] sm:$0xf] }
 0x44d   : > { %1296 = vrot.lane.b32.xlu0 %v1288_v52, %s2897_s24  ;;  %v1272_v57 = vmul.f32 %v1270_v55, %v3042_v40  ;;  %v2795_v58 = vld [vmem:[#allocation2 + $0x8] ss:$0 sps:$4 sm:$0xff]   ;;  %v1327_v63 = vmul.f32 %v1288_v52, %v3051_v45  ;;  %v1271_v3 = vmul.f32 %v1288_v52, %v3060_v50  ;;  %v1292_v4 = vcombine.low %v1288_v52, %v1288_v52 }
 0x44e   : > { %v1307_v60 = vld [vmem:[#allocation2 + $0x8] sm:$0xf]  ;;  %v1308_v5 = vmul.f32 %v1288_v52, %v3070_v56  ;;  %v1364_v52 = vpop.permute.xlu1 %1363  ;;  %v2816_v55 = vcombine.low %v3304_v44, %v3304_v44  ;;  %v1885_v44 = vld [vmem:[#allocation2 + $0xc] sm:$0xf] }
 0x44f   : > { %v1326_v62 = vld [vmem:[#allocation2 + $0x8] sm:$0xf]  ;;  %1280 = vrot.lane.b32.xlu1 %v1272_v57, %s2895_s22  ;;  %v1309_v53 = vmul.f32 %v1307_v60, %v3054_v48  ;;  %v1275_v12 = vcombine.high %v1271_v3, %v1271_v3  ;;  %v1331_v14 = vcombine.low %v1327_v63, %v1327_v63  ;;  %v1664_v57 = vld [vmem:[#allocation2 + $0xc] sm:$0xf] }
 0x450   : > { %1523 = vst [vmem:[#allocation2 + $0x4] sm:$0xff] %v3310_v13  ;;  %v1328_v9 = vmul.f32 %v1326_v62, %v3044_v41  ;;  %v1312_v15 = vcombine.high %v1308_v5, %v1308_v5  ;;  %v1865_v60 = vld [vmem:[#allocation2 + $0xc] sm:$0xf] }
 0x451   : > { %1398 = vrot.lane.b32.xlu0 %v1266_v47, %s2896_s23  ;;  %v1632_v47 = vcombine.high %v1628_v36, %v1628_v36 }
 0x452   : > { %v1332_v51 = vcombine.low %v1328_v9, %v1328_v9  ;;  %v3385_v62 = vpop.permute.xlu1 %1382 }
 0x453   : > { %1298 = vrot.lane.b32.xlu1 %v2795_v58, %s2897_s24  ;;  %v1666_v58 = vmul.f32 %v1664_v57, %v3079_v61 }
 0x455   : > { %1335 = vrot.lane.b32.xlu0 %v1327_v63, %s2894_s21  ;;  %v2645_v63 = vld [vmem:[%s3710_s4 + $0x8] sm:$0xf] }
 0x457   : > { %1317 = vrot.lane.b32.xlu1 %v1309_v53, %s2893_s20  ;;  %v1543_v18 = vld [vmem:[#allocation2] sm:$0xff]  ;;  %v1525_v8 = vld [vmem:[#allocation2 + $0x8] sm:$0xf]  ;;  %v1867_v53 = vmul.f32 %v1865_v60, %v3028_v25 }
 0x458   : > { %v1582_v24 = vmul.f32 %v1543_v18, %v3051_v45  ;;  %v1526_v26 = vmul.f32 %v1543_v18, %v3060_v50  ;;  %v1527_v27 = vmul.f32 %v1525_v8, %v3042_v40  ;;  %v1563_v29 = vmul.f32 %v1543_v18, %v3070_v56  ;;  %v2797_v30 = vld [vmem:[#allocation2 + $0x8] ss:$0 sps:$4 sm:$0xff]  }
 0x459   : > { %1276 = vrot.lane.b32.xlu0 %v1271_v3, %s2895_s22  ;;  %v1562_v31 = vld [vmem:[#allocation2 + $0x8] sm:$0xf]  ;;  %v1547_v34 = vcombine.low %v1543_v18, %v1543_v18  ;;  %v1401_v3 = vpop.permute.xlu1 %1400 }
 0x45a   : > { %v1530_v23 = vcombine.high %v1526_v26, %v1526_v26  ;;  %v1564_v32 = vmul.f32 %v1562_v31, %v3054_v48  ;;  %v1567_v33 = vcombine.high %v1563_v29, %v1563_v29  ;;  %v1581_v35 = vld [vmem:[#allocation2 + $0x8] sm:$0xf]  ;;  %v1586_v54 = vcombine.low %v1582_v24, %v1582_v24 }
 0x45b   : > { %1294 = vrot.lane.b32.xlu1 %v1292_v4, %s2897_s24  ;;  %v1583_v38 = vmul.f32 %v1581_v35, %v3044_v41  ;;  %v1871_v4 = vcombine.low %v1867_v53, %v1867_v53 }
 0x45d   : > { %1313 = vrot.lane.b32.xlu0 %v1308_v5, %s2893_s20  ;;  %v1587_v42 = vcombine.low %v1583_v38, %v1583_v38  ;;  %v1887_v5 = vmul.f32 %v1885_v44, %v3033_v28 }
 0x45f   : > { %1378 = vrot.lane.b32.xlu1 %v1373_v17, %s2890_s17  ;;  %v2126_v17 = vld [vmem:[#allocation2 + $0xc] sm:$0xf] }
 0x460   : > { %v2128_v9 = vmul.f32 %v2126_v17, %v3028_v25 }
 0x461   : > { %1361 = vrot.lane.b32.xlu0 %v1353_v6, %s2892_s19  ;;  %v3394_v6 = vpop.permute.xlu1 %1618 }
 0x463   : > { %1415 = vrot.lane.b32.xlu1 %v1410_v7, %s2891_s18  ;;  %v2799_v7 = vld [vmem:[#allocation2 + $0xc] ss:$0 sps:$4 sm:$0xff]  }
 0x465   : > { %1396 = vrot.lane.b32.xlu0 %v2815_v10, %s2896_s23  ;;  %v3399_v10 = vpop.permute.xlu1 %1637 }
 0x467   : > { %1337 = vrot.lane.b32.xlu1 %v1332_v51, %s2894_s21  ;;  %v2132_v51 = vcombine.low %v2128_v9, %v2128_v9 }
 0x469   : > { %1278 = vrot.lane.b32.xlu0 %v1275_v12, %s2895_s22  ;;  %v2146_v12 = vld [vmem:[#allocation2 + $0xc] sm:$0xf] }
 0x46b   : > { %1333 = vrot.lane.b32.xlu1 %v1331_v14, %s2894_s21  ;;  %v1420_v14 = vpop.permute.xlu0 %1419 }
 0x46d   : > { %1315 = vrot.lane.b32.xlu0 %v1312_v15, %s2893_s20  ;;  %v2148_v15 = vmul.f32 %v2146_v12, %v3033_v28 }
 0x46f   : > { %1417 = vrot.lane.b32.xlu1 %v1414_v16, %s2891_s18  ;;  %v3403_v16 = vpop.permute.xlu1 %1655 }
 0x471   : > { %1380 = vrot.lane.b32.xlu0 %v1377_v21, %s2890_s17 }
 0x473   : > { %1551 = vrot.lane.b32.xlu1 %v1543_v18, %s2897_s24 }
 0x475   : > { %1359 = vrot.lane.b32.xlu0 %v1357_v22, %s2892_s19 }
 0x477   : > { %1590 = vrot.lane.b32.xlu1 %v1582_v24, %s2894_s21 }
 0x479   : > { %1653 = vrot.lane.b32.xlu0 %v3310_v13, %s2896_s23 }
 0x47b   : > { %1531 = vrot.lane.b32.xlu1 %v1526_v26, %s2895_s22 }
 0x47d   : > { %1535 = vrot.lane.b32.xlu0 %v1527_v27, %s2895_s22 }
 0x47f   : > { %1568 = vrot.lane.b32.xlu1 %v1563_v29, %s2893_s20 }
 0x481   : > { %1553 = vrot.lane.b32.xlu0 %v2797_v30, %s2897_s24 }
 0x483   : > { %1533 = vrot.lane.b32.xlu1 %v1530_v23, %s2895_s22 }
 0x485   : > { %1572 = vrot.lane.b32.xlu0 %v1564_v32, %s2893_s20 }
 0x487   : > { %1570 = vrot.lane.b32.xlu1 %v1567_v33, %s2893_s20 }
 0x489   : > { %1549 = vrot.lane.b32.xlu0 %v1547_v34, %s2897_s24 }
 0x48b   : > { %1633 = vrot.lane.b32.xlu1 %v1628_v36, %s2890_s17 }
 0x48d   : > { %1616 = vrot.lane.b32.xlu0 %v1608_v37, %s2892_s19 }
 0x48f   : > { %1672 = vrot.lane.b32.xlu1 %v1669_v39, %s2891_s18 }
 0x491   : > { %1592 = vrot.lane.b32.xlu0 %v1587_v42, %s2894_s21  ;;  %v2817_v42 = vcombine.low %v3306_v11, %v3306_v11 }
 0x493   : > { %1670 = vrot.lane.b32.xlu1 %v1665_v20, %s2891_s18 }
 0x495   : > { %1588 = vrot.lane.b32.xlu0 %v1586_v54, %s2894_s21 }
 0x497   : > { %1932 = vrot.lane.b32.xlu1 %v1924_v46, %s2891_s18 }
 0x499   : > { %1635 = vrot.lane.b32.xlu0 %v1632_v47, %s2890_s17 }
 0x49d   : > { %1614 = vrot.lane.b32.xlu0 %v1612_v49, %s2892_s19 }
 0x4a1   : > { %1651 = vrot.lane.b32.xlu0 %v2816_v55, %s2896_s23 }
 0x4a5   : > { %1674 = vrot.lane.b32.xlu0 %v1666_v58, %s2891_s18 }
 0x4a9   : > { %1696 = vperm.xlu0 %2782, %v2645_v63  }
 0x4ad   : > { %1876 = vrot.lane.b32.xlu0 %v1871_v4, %s2892_s19 }
 0x4b1   : > { %1895 = vrot.lane.b32.xlu0 %v1887_v5, %s2890_s17 }
 0x4b5   : > { %1913 = vrot.lane.b32.xlu0 %v2799_v7, %s2896_s23 }
 0x4b9   : > { %2137 = vrot.lane.b32.xlu0 %v2132_v51, %s2892_s19 }
 0x4bd   : > { %2156 = vrot.lane.b32.xlu0 %v2148_v15, %s2890_s17 }
 0x4bf   : > { %v1297_v19 = vpop.permute.xlu0 %1296 }
 0x4c1   : > { %v1281_v21 = vpop.permute.xlu1 %1280 }
 0x4c3   : > { %v1399_v18 = vpop.permute.xlu0 %1398 }
 0x4c4   : > { %v1403_v22 = vsel %vm619_vm7, %v1399_v18, %v1401_v3 }
 0x4c5   : > { %1407 = vst [vmem:[#allocation3 + $0x38] sm:$0xf0] %v1403_v22  ;;  %v1299_v24 = vpop.permute.xlu1 %1298 }
 0x4c6   : > { %v1301_v8 = vsel %vm487_vm8, %v1297_v19, %v1299_v24 }
 0x4c7   : > { %1305 = vst [vmem:[#allocation3 + $0x8] sm:$0xf0] %v1301_v8  ;;  %v1336_v26 = vpop.permute.xlu0 %1335 }
 0x4c9   : > { %v1318_v27 = vpop.permute.xlu1 %1317 }
 0x4cb   : > { %v1277_v29 = vpop.permute.xlu0 %1276 }
 0x4cd   : > { %v1295_v30 = vpop.permute.xlu1 %1294 }
 0x4ce   : > { %v1300_v31 = vsel %vm487_vm8, %v1295_v30, %v1297_v19 }
 0x4cf   : > { %1304 = vst [vmem:[#allocation3] sm:$0xf0] %v1300_v31  ;;  %v1314_v23 = vpop.permute.xlu0 %1313 }
 0x4d1   : > { %v1379_v32 = vpop.permute.xlu1 %1378 }
 0x4d3   : > { %v1362_v33 = vpop.permute.xlu0 %1361 }
 0x4d4   : > { %v1366_v34 = vsel %vm527_vm1, %v1362_v33, %v1364_v52 }
 0x4d5   : > { %1370 = vst [vmem:[#allocation3 + $0x28] sm:$0xf0] %v1366_v34  ;;  %v1416_v35 = vpop.permute.xlu1 %1415 }
 0x4d7   : > { %v1397_v36 = vpop.permute.xlu0 %1396 }
 0x4d8   : > { %v1402_v20 = vsel %vm619_vm7, %v1397_v36, %v1399_v18 }
 0x4d9   : > { %1406 = vst [vmem:[#allocation3 + $0x30] sm:$0xf0] %v1402_v20  ;;  %v1338_v37 = vpop.permute.xlu1 %1337 }
 0x4da   : > { %v1340_v38 = vsel %vm543_vm4, %v1336_v26, %v1338_v37 }
 0x4db   : > { %1344 = vst [vmem:[#allocation3 + $0x18] sm:$0xf0] %v1340_v38  ;;  %v1279_v39 = vpop.permute.xlu0 %1278 }
 0x4dc   : > { %v1282_v43 = vsel %vm468_vm6, %v1277_v29, %v1279_v39  ;;  %v1283_v54 = vsel %vm468_vm6, %v1279_v39, %v1281_v21  ;;  %v1432_v46 = vld [vmem:[#allocation3 + $0x28] sm:$0xff] }
 0x4dd   : > { %1286 = vst [vmem:[#allocation3] sm:$0xf] %v1282_v43  ;;  %1287 = vst [vmem:[#allocation3 + $0x8] sm:$0xf] %v1283_v54  ;;  %v1334_v47 = vpop.permute.xlu1 %1333 }
 0x4de   : > { %1605 = vst [vmem:[#allocation3 + $0x28] sm:$0xf] %v2817_v42  ;;  %v1339_v49 = vsel %vm543_vm4, %v1334_v47, %v1336_v26 }
 0x4df   : > { %1343 = vst [vmem:[#allocation3 + $0x10] sm:$0xf0] %v1339_v49  ;;  %v1316_v52 = vpop.permute.xlu0 %1315 }
 0x4e0   : > { %v1319_v55 = vsel %vm515_vm5, %v1314_v23, %v1316_v52  ;;  %v1320_v57 = vsel %vm515_vm5, %v1316_v52, %v1318_v27 }
 0x4e1   : > { %1323 = vst [vmem:[#allocation3 + $0x10] sm:$0xf] %v1319_v55  ;;  %1324 = vst [vmem:[#allocation3 + $0x18] sm:$0xf] %v1320_v57  ;;  %v1418_v11 = vpop.permute.xlu1 %1417 }
 0x4e2   : > { %v1421_v58 = vsel %vm453_vm2, %v1416_v35, %v1418_v11  ;;  %v1422_v60 = vsel %vm453_vm2, %v1418_v11, %v1420_v14 }
 0x4e3   : > { %1425 = vst [vmem:[#allocation3 + $0x40] sm:$0xf] %v1421_v58  ;;  %1426 = vst [vmem:[#allocation3 + $0x48] sm:$0xf] %v1422_v60  ;;  %v1381_v63 = vpop.permute.xlu0 %1380 }
 0x4e4   : > { %v1384_v53 = vsel %vm500_vm3, %v1379_v32, %v1381_v63  ;;  %v1385_v3 = vsel %vm500_vm3, %v1381_v63, %v3385_v62  ;;  %v1428_v5 = vld [vmem:[#allocation3 + $0x8] sm:$0xff]  ;;  %v1427_v9 = vld [vmem:[#allocation3] sm:$0xff] }
 0x4e5   : > { %1388 = vst [vmem:[#allocation3 + $0x30] sm:$0xf] %v1384_v53  ;;  %1389 = vst [vmem:[#allocation3 + $0x38] sm:$0xf] %v1385_v3  ;;  %v1552_v4 = vpop.permute.xlu1 %1551 }
 0x4e7   : > { %v1360_v44 = vpop.permute.xlu0 %1359 }
 0x4e8   : > { %v1365_v17 = vsel %vm527_vm1, %v1360_v44, %v1362_v33  ;;  %v1430_v7 = vld [vmem:[#allocation3 + $0x18] sm:$0xff]  ;;  %v1429_v51 = vld [vmem:[#allocation3 + $0x10] sm:$0xff] }
 0x4e9   : > { %1369 = vst [vmem:[#allocation3 + $0x20] sm:$0xf0] %v1365_v17  ;;  %v1591_v12 = vpop.permute.xlu1 %1590  ;;  %v2685_v14 = vpack.c.bf16 %v1430_v7, %v1428_v5  ;;  %v2687_v15 = vpack.c.bf16 %v1429_v51, %v1427_v9 }
 0x4ea   : > { %v1436_v31 = vld [vmem:[#allocation3 + $0x48] sm:$0xff]  ;;  %v1435_v34 = vld [vmem:[#allocation3 + $0x40] sm:$0xff] }
 0x4eb   : > { %v3425_v19 = vpop.permute.xlu0 %1653  ;;  %2686 = vmatprep.subr.bf16.mxu0 %v2685_v14 }
 0x4ec   : > { %v1434_v21 = vld [vmem:[#allocation3 + $0x38] sm:$0xff]  ;;  %v1658_v62 = vsel %vm619_vm7, %v3425_v19, %v3403_v16  ;;  %2688 = vmatpush1.bf16.msra.mxu0 %v2687_v15  ;;  %v1433_v26 = vld [vmem:[#allocation3 + $0x30] sm:$0xff] }
 0x4ed   : > { %1662 = vst [vmem:[#allocation3 + $0x38] sm:$0xf0] %v1658_v62  ;;  %v1532_v18 = vpop.permute.xlu1 %1531  ;;  %v2689_v22 = vpack.c.bf16 %v1434_v21, %v1432_v46 }
 0x4ef   : > { %v1536_v24 = vpop.permute.xlu0 %1535  ;;  %2690 = vmatprep.subr.bf16.mxu0 %v2689_v22 }
 0x4f0   : > { %v1431_v8 = vld [vmem:[#allocation3 + $0x20] sm:$0xff] }
 0x4f1   : > { %v1569_v27 = vpop.permute.xlu1 %1568  ;;  %v2691_v29 = vpack.c.bf16 %v1433_v26, %v1431_v8  ;;  %1604 = vst [vmem:[#allocation3 + $0x20] sm:$0xf] %v3310_v13  ;;  %v2800_v8 = vld [vmem:[#allocation2 + $0xc] ss:$0 sps:$4 sm:$0xff]  }
 0x4f2   : > { %2174 = vrot.lane.b32.xlu0 %v2800_v8, %s2896_s23 }
 0x4f3   : > { %v1554_v30 = vpop.permute.xlu0 %1553  ;;  %2692 = vmatpush1.bf16.msra.mxu0 %v2691_v29  ;;  %v2026_v29 = vld [vmem:[#allocation4 + $0x10] sm:$0xf0] }
 0x4f4   : > { %v1556_v23 = vsel %vm487_vm8, %v1552_v4, %v1554_v30  ;;  %1448 = vmatprep.subr.mxu0 %v1436_v31 }
 0x4f5   : > { %1560 = vst [vmem:[#allocation3 + $0x8] sm:$0xf0] %v1556_v23  ;;  %v1534_v16 = vpop.permute.xlu1 %1533  ;;  %v2027_v23 = vld [vmem:[#allocation4 + $0x18] sm:$0xf0] }
 0x4f6   : > { %v1537_v32 = vsel %vm468_vm6, %v1532_v18, %v1534_v16  ;;  %v1538_v33 = vsel %vm468_vm6, %v1534_v16, %v1536_v24  ;;  %v2644_v24 = vld [vmem:[%s3709_s3 + $0x8] sm:$0xf] }
 0x4f7   : > { %1541 = vst [vmem:[#allocation3] sm:$0xf] %v1537_v32  ;;  %1542 = vst [vmem:[#allocation3 + $0x8] sm:$0xf] %v1538_v33  ;;  %v1573_v35 = vpop.permute.xlu0 %1572  ;;  %1449 = vmatpush1.msra.mxu0 %v1435_v34  ;;  %v2030_v33 = vrot.slane %v2026_v29, 4 }
 0x4f9   : > { %v1571_v36 = vpop.permute.xlu1 %1570 }
 0x4fa   : > { %v1574_v13 = vsel %vm515_vm5, %v1569_v27, %v1571_v36  ;;  %v1575_v20 = vsel %vm515_vm5, %v1571_v36, %v1573_v35  ;;  %v2031_v35 = vrot.slane %v2027_v23, 4 }
 0x4fb   : > { %1578 = vst [vmem:[#allocation3 + $0x10] sm:$0xf] %v1574_v13  ;;  %1579 = vst [vmem:[#allocation3 + $0x18] sm:$0xf] %v1575_v20  ;;  %v1550_v37 = vpop.permute.xlu0 %1549 }
 0x4fc   : > { %v1555_v38 = vsel %vm487_vm8, %v1550_v37, %v1552_v4 }
 0x4fd   : > { %1559 = vst [vmem:[#allocation3] sm:$0xf0] %v1555_v38  ;;  %v1634_v39 = vpop.permute.xlu1 %1633 }
 0x4fe   : > { %v1683_v60 = vld [vmem:[#allocation3 + $0x8] sm:$0xff] }
 0x4ff   : > { %v1617_v42 = vpop.permute.xlu0 %1616 }
 0x500   : > { %v1621_v43 = vsel %vm527_vm1, %v1617_v42, %v3394_v6 }
 0x501   : > { %1625 = vst [vmem:[#allocation3 + $0x28] sm:$0xf0] %v1621_v43  ;;  %v1673_v54 = vpop.permute.xlu1 %1672 }
 0x503   : > { %v1593_v46 = vpop.permute.xlu0 %1592 }
 0x504   : > { %v1595_v47 = vsel %vm543_vm4, %v1591_v12, %v1593_v46  ;;  %v1682_v44 = vld [vmem:[#allocation3] sm:$0xff] }
 0x505   : > { %1599 = vst [vmem:[#allocation3 + $0x18] sm:$0xf0] %v1595_v47  ;;  %v1671_v49 = vpop.permute.xlu1 %1670 }
 0x506   : > { %v1676_v52 = vsel %vm453_vm2, %v1671_v49, %v1673_v54 }
 0x507   : > { %1680 = vst [vmem:[#allocation3 + $0x40] sm:$0xf] %v1676_v52  ;;  %v1589_v55 = vpop.permute.xlu0 %1588 }
 0x508   : > { %v1594_v57 = vsel %vm543_vm4, %v1589_v55, %v1591_v12  ;;  %v1687_v51 = vld [vmem:[#allocation3 + $0x28] sm:$0xff] }
 0x509   : > { %1598 = vst [vmem:[#allocation3 + $0x10] sm:$0xf0] %v1594_v57 }
 0x50b   : > { %v1636_v11 = vpop.permute.xlu0 %1635 }
 0x50c   : > { %v1639_v58 = vsel %vm500_vm3, %v1634_v39, %v1636_v11  ;;  %v1640_v6 = vsel %vm500_vm3, %v1636_v11, %v3399_v10  ;;  %v1685_v63 = vld [vmem:[#allocation3 + $0x18] sm:$0xff] }
 0x50d   : > { %1643 = vst [vmem:[#allocation3 + $0x30] sm:$0xf] %v1639_v58  ;;  %1644 = vst [vmem:[#allocation3 + $0x38] sm:$0xf] %v1640_v6  ;;  %v2693_v53 = vpack.c.bf16 %v1685_v63, %v1683_v60 }
 0x50f   : > { %v1615_v3 = vpop.permute.xlu0 %1614  ;;  %2694 = vmatprep.subr.bf16.mxu1 %v2693_v53 }
 0x510   : > { %v1620_v4 = vsel %vm527_vm1, %v1615_v3, %v1617_v42  ;;  %v1684_v5 = vld [vmem:[#allocation3 + $0x10] sm:$0xff] }
 0x511   : > { %1624 = vst [vmem:[#allocation3 + $0x20] sm:$0xf0] %v1620_v4  ;;  %v2695_v17 = vpack.c.bf16 %v1684_v5, %v1682_v44 }
 0x513   : > { %v1652_v7 = vpop.permute.xlu0 %1651  ;;  %2696 = vmatpush1.bf16.msra.mxu1 %v2695_v17  ;;  %v2642_v17 = vld [vmem:[%s3711_s5 + $0x8] sm:$0xff] }
 0x514   : > { %v1657_v9 = vsel %vm619_vm7, %v1652_v7, %v3425_v19  ;;  %v1689_v10 = vld [vmem:[#allocation3 + $0x38] sm:$0xff]  ;;  %v1690_v19 = vld [vmem:[#allocation3 + $0x40] sm:$0xff]  ;;  %2643 = vmatmul.mubr.msk.f32.vlgmr.msra.gmra.mrb[4].mxu0 %vm667_vm9, %v2642_v17 }
 0x515   : > { %1661 = vst [vmem:[#allocation3 + $0x30] sm:$0xf0] %v1657_v9  ;;  %v2697_v12 = vpack.c.bf16 %v1689_v10, %v1687_v51  ;;  %2017 = vmatprep.mubr.f32.mxu0 %v2888_v2 }
 0x517   : > { %v1675_v14 = vpop.permute.xlu0 %1674  ;;  %2698 = vmatprep.subr.bf16.mxu1 %v2697_v12 }
 0x518   : > { %v1677_v15 = vsel %vm453_vm2, %v1673_v54, %v1675_v14  ;;  %v1686_v21 = vld [vmem:[#allocation3 + $0x20] sm:$0xff] }
 0x519   : > { %1681 = vst [vmem:[#allocation3 + $0x48] sm:$0xf] %v1677_v15 }
 0x51c   : > { %v1688_v62 = vld [vmem:[#allocation3 + $0x30] sm:$0xff] }
 0x51d   : > { %v2699_v18 = vpack.c.bf16 %v1688_v62, %v1686_v21 }
 0x51f   : > { %2700 = vmatpush1.bf16.msra.mxu1 %v2699_v18 }
 0x520   : > { %v1691_v22 = vld [vmem:[#allocation3 + $0x48] sm:$0xff] }
 0x521   : > { %1710 = vmatprep.subr.mxu1 %v1691_v22 }
 0x523   : > { %1711 = vmatpush1.msra.mxu1 %v1690_v19 }
 0x524   : > { %2646 = vmatmul.mubr.msk.f32.vlgmr.msra.gmra.mrb[4].mxu1 %vm667_vm9, %v2644_v24 }
 0x525   : > { %2285 = vmatprep.mubr.f32.mxu1 %v2888_v2 }
 0x528   : > { %v1697_v26 = vpop.permute.xlu0 %1696 }
 0x5f7   : > { %v1768_v27 = vpop.f32.mrb[4].mxu1 }
 0x5f8   : > { %v1769_v30 = vadd.f32 %v1768_v27, %v1697_v26  ;;  %v1770_v31 = vpop.f32.mrb[5].mxu1 }
 0x5f9   : > { %v1771_v16 = vadd.f32 %v1770_v31, %v1697_v26 }
 0x5fa   : > { %v1773_v32 = vmax.f32 %v1769_v30, 0.0 }
 0x5fb   : > { %v1774_v34 = vmax.f32 %v1771_v16, 0.0 }
 0x5fc   : > { %v3455_v36 = vadd.f32 %v2030_v33, %v1773_v32  ;;  %v2819_v53 = vcombine.low %v1773_v32, %v1773_v32 }
 0x5fd   : > { %v1779_v13 = vcombine.low %v1773_v32, %v1774_v34  ;;  %v3457_v20 = vadd.f32 %v2031_v35, %v1774_v34  ;;  %v2818_v38 = vcombine.low %v1774_v34, %v1774_v34 }
 0x5ff   : > { %v3461_v37 = vcombine.low %v3455_v36, %v3457_v20  ;;  %1781 = vst [vmem:[#allocation2 + $0x4] sm:$0xff] %v1779_v13  ;;  %1862 = vst [vmem:[#allocation3 + $0x20] sm:$0xf] %v1779_v13  ;;  %v1886_v58 = vmul.f32 %v1779_v13, %v3087_v0  ;;  %v1866_v6 = vmul.f32 %v1779_v13, %v3076_v59 }
 0x600   : > { %1863 = vst [vmem:[#allocation3 + $0x28] sm:$0xf] %v2818_v38  ;;  %v1923_v60 = vmul.f32 %v1779_v13, %v3091_v1  ;;  %v2820_v38 = vcombine.low %v3455_v36, %v3455_v36  ;;  %v2404_v36 = vld [vmem:[#allocation2 + $0xc] sm:$0xf] }
 0x601   : > { %v1890_v9 = vcombine.high %v1886_v58, %v1886_v58  ;;  %v1870_v10 = vcombine.low %v1866_v6, %v1866_v6  ;;  %v2147_v29 = vmul.f32 %v3461_v37, %v3087_v0  ;;  %v2184_v30 = vmul.f32 %v3461_v37, %v3091_v1 }
 0x602   : > { %v1927_v7 = vcombine.high %v1923_v60, %v1923_v60  ;;  %v2127_v31 = vmul.f32 %v3461_v37, %v3076_v59 }
 0x603   : > { %v2188_v16 = vcombine.high %v2184_v30, %v2184_v30  ;;  %v2151_v34 = vcombine.high %v2147_v29, %v2147_v29 }
 0x604   : > { %v2131_v35 = vcombine.low %v2127_v31, %v2127_v31 }
 0x606   : > { %v1801_v39 = vld [vmem:[#allocation2] sm:$0xff]  ;;  %v1783_v42 = vld [vmem:[#allocation2 + $0x8] sm:$0xf] }
 0x607   : > { %1809 = vrot.lane.b32.xlu1 %v1801_v39, %s2897_s24  ;;  %v1785_v43 = vmul.f32 %v1783_v42, %v3042_v40  ;;  %v2801_v54 = vld [vmem:[#allocation2 + $0x8] ss:$0 sps:$4 sm:$0xff]   ;;  %v1840_v49 = vmul.f32 %v1801_v39, %v3051_v45  ;;  %v1784_v55 = vmul.f32 %v1801_v39, %v3060_v50  ;;  %v1805_v57 = vcombine.low %v1801_v39, %v1801_v39 }
 0x608   : > { %v1820_v46 = vld [vmem:[#allocation2 + $0x8] sm:$0xf]  ;;  %v1821_v11 = vmul.f32 %v1801_v39, %v3070_v56  ;;  %v2183_v39 = vld [vmem:[#allocation2 + $0xc] sm:$0xf] }
 0x609   : > { %v1839_v47 = vld [vmem:[#allocation2 + $0x8] sm:$0xf]  ;;  %1793 = vrot.lane.b32.xlu0 %v1785_v43, %s2895_s22  ;;  %v1822_v52 = vmul.f32 %v1820_v46, %v3054_v48  ;;  %v1788_v4 = vcombine.high %v1784_v55, %v1784_v55  ;;  %v1844_v44 = vcombine.low %v1840_v49, %v1840_v49  ;;  %v2185_v42 = vmul.f32 %v2183_v39, %v3079_v61  ;;  %v2384_v43 = vld [vmem:[#allocation2 + $0xc] sm:$0xf] }
 0x60a   : > { %2042 = vst [vmem:[#allocation2 + $0x4] sm:$0xff] %v3461_v37  ;;  %v1841_v63 = vmul.f32 %v1839_v47, %v3044_v41  ;;  %v1825_v5 = vcombine.high %v1821_v11, %v1821_v11  ;;  %v2650_v46 = vld [vmem:[%s3710_s4 + $0xc] sm:$0xf]  ;;  %v2386_v47 = vmul.f32 %v2384_v43, %v3028_v25 }
 0x60b   : > { %1911 = vrot.lane.b32.xlu1 %v1779_v13, %s2896_s23  ;;  %v1877_v13 = vpop.permute.xlu0 %1876 }
 0x60c   : > { %v1845_v3 = vcombine.low %v1841_v63, %v1841_v63 }
 0x60d   : > { %1811 = vrot.lane.b32.xlu0 %v2801_v54, %s2897_s24 }
 0x60f   : > { %1848 = vrot.lane.b32.xlu1 %v1840_v49, %s2894_s21  ;;  %v3534_v54 = vpop.permute.xlu0 %1895 }
 0x611   : > { %1830 = vrot.lane.b32.xlu0 %v1822_v52, %s2893_s20  ;;  %v2062_v51 = vld [vmem:[#allocation2] sm:$0xff]  ;;  %v2044_v14 = vld [vmem:[#allocation2 + $0x8] sm:$0xf]  ;;  %v2390_v52 = vcombine.low %v2386_v47, %v2386_v47 }
 0x612   : > { %v2101_v12 = vmul.f32 %v2062_v51, %v3051_v45  ;;  %v2045_v15 = vmul.f32 %v2062_v51, %v3060_v50  ;;  %v2046_v21 = vmul.f32 %v2044_v14, %v3042_v40  ;;  %v2082_v62 = vmul.f32 %v2062_v51, %v3070_v56  ;;  %v2804_v18 = vld [vmem:[#allocation2 + $0x8] ss:$0 sps:$4 sm:$0xff]  }
 0x613   : > { %1789 = vrot.lane.b32.xlu1 %v1784_v55, %s2895_s22  ;;  %v2081_v22 = vld [vmem:[#allocation2 + $0x8] sm:$0xf]  ;;  %v2066_v26 = vcombine.low %v2062_v51, %v2062_v51  ;;  %v1914_v49 = vpop.permute.xlu0 %1913  ;;  %v2406_v55 = vmul.f32 %v2404_v36, %v3033_v28 }
 0x614   : > { %v2049_v24 = vcombine.high %v2045_v15, %v2045_v15  ;;  %v2083_v19 = vmul.f32 %v2081_v22, %v3054_v48  ;;  %v2086_v8 = vcombine.high %v2082_v62, %v2082_v62  ;;  %v2100_v27 = vld [vmem:[#allocation2 + $0x8] sm:$0xf]  ;;  %v2105_v33 = vcombine.low %v2101_v12, %v2101_v12 }
 0x615   : > { %1807 = vrot.lane.b32.xlu0 %v1805_v57, %s2897_s24  ;;  %v2102_v23 = vmul.f32 %v2100_v27, %v3044_v41 }
 0x617   : > { %1826 = vrot.lane.b32.xlu1 %v1821_v11, %s2893_s20  ;;  %v2106_v32 = vcombine.low %v2102_v23, %v2102_v23  ;;  %v3543_v57 = vpop.permute.xlu0 %2137 }
 0x619   : > { %1891 = vrot.lane.b32.xlu0 %v1886_v58, %s2890_s17  ;;  %v1933_v58 = vpop.permute.xlu1 %1932 }
 0x61b   : > { %1874 = vrot.lane.b32.xlu1 %v1866_v6, %s2892_s19  ;;  %v3546_v11 = vpop.permute.xlu0 %2156 }
 0x61d   : > { %1928 = vrot.lane.b32.xlu0 %v1923_v60, %s2891_s18 }
 0x61f   : > { %1909 = vrot.lane.b32.xlu1 %v2819_v53, %s2896_s23  ;;  %v3548_v6 = vpop.permute.xlu0 %2174 }
 0x621   : > { %1850 = vrot.lane.b32.xlu0 %v1845_v3, %s2894_s21 }
 0x623   : > { %1791 = vrot.lane.b32.xlu1 %v1788_v4, %s2895_s22 }
 0x625   : > { %1846 = vrot.lane.b32.xlu0 %v1844_v44, %s2894_s21 }
 0x627   : > { %1828 = vrot.lane.b32.xlu1 %v1825_v5, %s2893_s20 }
 0x629   : > { %1930 = vrot.lane.b32.xlu0 %v1927_v7, %s2891_s18 }
 0x62b   : > { %1893 = vrot.lane.b32.xlu1 %v1890_v9, %s2890_s17 }
 0x62d   : > { %2070 = vrot.lane.b32.xlu0 %v2062_v51, %s2897_s24 }
 0x62f   : > { %1872 = vrot.lane.b32.xlu1 %v1870_v10, %s2892_s19 }
 0x631   : > { %2109 = vrot.lane.b32.xlu0 %v2101_v12, %s2894_s21 }
 0x633   : > { %2172 = vrot.lane.b32.xlu1 %v3461_v37, %s2896_s23 }
 0x635   : > { %2050 = vrot.lane.b32.xlu0 %v2045_v15, %s2895_s22 }
 0x637   : > { %2054 = vrot.lane.b32.xlu1 %v2046_v21, %s2895_s22 }
 0x639   : > { %2087 = vrot.lane.b32.xlu0 %v2082_v62, %s2893_s20 }
 0x63b   : > { %2072 = vrot.lane.b32.xlu1 %v2804_v18, %s2897_s24 }
 0x63d   : > { %2052 = vrot.lane.b32.xlu0 %v2049_v24, %s2895_s22  ;;  %v2821_v24 = vcombine.low %v3457_v20, %v3457_v20 }
 0x63f   : > { %2091 = vrot.lane.b32.xlu1 %v2083_v19, %s2893_s20 }
 0x641   : > { %2089 = vrot.lane.b32.xlu0 %v2086_v8, %s2893_s20 }
 0x643   : > { %2068 = vrot.lane.b32.xlu1 %v2066_v26, %s2897_s24 }
 0x645   : > { %2152 = vrot.lane.b32.xlu0 %v2147_v29, %s2890_s17 }
 0x647   : > { %2135 = vrot.lane.b32.xlu1 %v2127_v31, %s2892_s19 }
 0x649   : > { %2191 = vrot.lane.b32.xlu0 %v2188_v16, %s2891_s18 }
 0x64b   : > { %2111 = vrot.lane.b32.xlu1 %v2106_v32, %s2894_s21 }
 0x64d   : > { %2189 = vrot.lane.b32.xlu0 %v2184_v30, %s2891_s18 }
 0x64f   : > { %2107 = vrot.lane.b32.xlu1 %v2105_v33, %s2894_s21 }
 0x653   : > { %2154 = vrot.lane.b32.xlu1 %v2151_v34, %s2890_s17 }
 0x657   : > { %2133 = vrot.lane.b32.xlu1 %v2131_v35, %s2892_s19 }
 0x65b   : > { %2170 = vrot.lane.b32.xlu1 %v2820_v38, %s2896_s23 }
 0x65f   : > { %2193 = vrot.lane.b32.xlu1 %v2185_v42, %s2891_s18 }
 0x663   : > { %2215 = vperm.xlu1 %2783, %v2650_v46  }
 0x667   : > { %2395 = vrot.lane.b32.xlu1 %v2390_v52, %s2892_s19 }
 0x66b   : > { %2414 = vrot.lane.b32.xlu1 %v2406_v55, %s2890_s17 }
 0x679   : > { %v1810_v60 = vpop.permute.xlu1 %1809 }
 0x67b   : > { %v1794_v63 = vpop.permute.xlu0 %1793 }
 0x67d   : > { %v1912_v25 = vpop.permute.xlu1 %1911 }
 0x67e   : > { %v1916_v53 = vsel %vm619_vm7, %v1912_v25, %v1914_v49 }
 0x67f   : > { %1920 = vst [vmem:[#allocation3 + $0x38] sm:$0xf0] %v1916_v53  ;;  %v1812_v3 = vpop.permute.xlu0 %1811 }
 0x680   : > { %v1814_v4 = vsel %vm487_vm8, %v1810_v60, %v1812_v3 }
 0x681   : > { %1818 = vst [vmem:[#allocation3 + $0x8] sm:$0xf0] %v1814_v4  ;;  %v1849_v28 = vpop.permute.xlu1 %1848 }
 0x683   : > { %v1831_v44 = vpop.permute.xlu0 %1830 }
 0x685   : > { %v1790_v5 = vpop.permute.xlu1 %1789 }
 0x687   : > { %v1808_v17 = vpop.permute.xlu0 %1807 }
 0x688   : > { %v1813_v7 = vsel %vm487_vm8, %v1808_v17, %v1810_v60 }
 0x689   : > { %1817 = vst [vmem:[#allocation3] sm:$0xf0] %v1813_v7  ;;  %v1827_v9 = vpop.permute.xlu1 %1826 }
 0x68b   : > { %v1892_v51 = vpop.permute.xlu0 %1891 }
 0x68d   : > { %v1875_v10 = vpop.permute.xlu1 %1874 }
 0x68e   : > { %v1879_v12 = vsel %vm527_vm1, %v1875_v10, %v1877_v13 }
 0x68f   : > { %1883 = vst [vmem:[#allocation3 + $0x28] sm:$0xf0] %v1879_v12  ;;  %v1929_v14 = vpop.permute.xlu0 %1928 }
 0x691   : > { %v1910_v15 = vpop.permute.xlu1 %1909 }
 0x692   : > { %v1915_v21 = vsel %vm619_vm7, %v1910_v15, %v1912_v25 }
 0x693   : > { %1919 = vst [vmem:[#allocation3 + $0x30] sm:$0xf0] %v1915_v21  ;;  %v1851_v62 = vpop.permute.xlu0 %1850 }
 0x694   : > { %v1853_v18 = vsel %vm543_vm4, %v1849_v28, %v1851_v62 }
 0x695   : > { %1857 = vst [vmem:[#allocation3 + $0x18] sm:$0xf0] %v1853_v18  ;;  %v1792_v22 = vpop.permute.xlu1 %1791 }
 0x696   : > { %v1795_v19 = vsel %vm468_vm6, %v1790_v5, %v1792_v22  ;;  %v1796_v8 = vsel %vm468_vm6, %v1792_v22, %v1794_v63  ;;  %v1945_v26 = vld [vmem:[#allocation3 + $0x28] sm:$0xff] }
 0x697   : > { %1799 = vst [vmem:[#allocation3] sm:$0xf] %v1795_v19  ;;  %1800 = vst [vmem:[#allocation3 + $0x8] sm:$0xf] %v1796_v8  ;;  %v1847_v27 = vpop.permute.xlu0 %1846 }
 0x698   : > { %2124 = vst [vmem:[#allocation3 + $0x28] sm:$0xf] %v2821_v24  ;;  %v1852_v29 = vsel %vm543_vm4, %v1847_v27, %v1849_v28 }
 0x699   : > { %1856 = vst [vmem:[#allocation3 + $0x10] sm:$0xf0] %v1852_v29  ;;  %v1829_v30 = vpop.permute.xlu1 %1828 }
 0x69a   : > { %v1832_v31 = vsel %vm515_vm5, %v1827_v9, %v1829_v30  ;;  %v1833_v23 = vsel %vm515_vm5, %v1829_v30, %v1831_v44 }
 0x69b   : > { %1836 = vst [vmem:[#allocation3 + $0x10] sm:$0xf] %v1832_v31  ;;  %1837 = vst [vmem:[#allocation3 + $0x18] sm:$0xf] %v1833_v23  ;;  %v1931_v20 = vpop.permute.xlu0 %1930 }
 0x69c   : > { %v1934_v16 = vsel %vm453_vm2, %v1929_v14, %v1931_v20  ;;  %v1935_v32 = vsel %vm453_vm2, %v1931_v20, %v1933_v58 }
 0x69d   : > { %1938 = vst [vmem:[#allocation3 + $0x40] sm:$0xf] %v1934_v16  ;;  %1939 = vst [vmem:[#allocation3 + $0x48] sm:$0xf] %v1935_v32  ;;  %v1894_v33 = vpop.permute.xlu1 %1893 }
 0x69e   : > { %v1897_v34 = vsel %vm500_vm3, %v1892_v51, %v1894_v33  ;;  %v1898_v35 = vsel %vm500_vm3, %v1894_v33, %v3534_v54  ;;  %v1941_v39 = vld [vmem:[#allocation3 + $0x8] sm:$0xff]  ;;  %v1940_v46 = vld [vmem:[#allocation3] sm:$0xff] }
 0x69f   : > { %1901 = vst [vmem:[#allocation3 + $0x30] sm:$0xf] %v1897_v34  ;;  %1902 = vst [vmem:[#allocation3 + $0x38] sm:$0xf] %v1898_v35  ;;  %v2071_v13 = vpop.permute.xlu0 %2070 }
 0x6a1   : > { %v1873_v38 = vpop.permute.xlu1 %1872 }
 0x6a2   : > { %v1878_v42 = vsel %vm527_vm1, %v1873_v38, %v1875_v10  ;;  %v1943_v43 = vld [vmem:[#allocation3 + $0x18] sm:$0xff]  ;;  %v1942_v47 = vld [vmem:[#allocation3 + $0x10] sm:$0xff] }
 0x6a3   : > { %1882 = vst [vmem:[#allocation3 + $0x20] sm:$0xf0] %v1878_v42  ;;  %v2110_v49 = vpop.permute.xlu0 %2109  ;;  %v2701_v52 = vpack.c.bf16 %v1943_v43, %v1941_v39  ;;  %v2703_v36 = vpack.c.bf16 %v1942_v47, %v1940_v46 }
 0x6a4   : > { %v1949_v5 = vld [vmem:[#allocation3 + $0x48] sm:$0xff]  ;;  %v1948_v51 = vld [vmem:[#allocation3 + $0x40] sm:$0xff] }
 0x6a5   : > { %2702 = vmatprep.subr.bf16.mxu0 %v2701_v52  ;;  %v3569_v55 = vpop.permute.xlu1 %2172 }
 0x6a6   : > { %v2177_v54 = vsel %vm619_vm7, %v3569_v55, %v3548_v6  ;;  %2704 = vmatpush1.bf16.msra.mxu0 %v2703_v36  ;;  %v1947_v58 = vld [vmem:[#allocation3 + $0x38] sm:$0xff]  ;;  %v1946_v3 = vld [vmem:[#allocation3 + $0x30] sm:$0xff] }
 0x6a7   : > { %v2051_v60 = vpop.permute.xlu0 %2050  ;;  %v2705_v63 = vpack.c.bf16 %v1947_v58, %v1945_v26  ;;  %2181 = vst [vmem:[#allocation3 + $0x38] sm:$0xf0] %v2177_v54 }
 0x6a9   : > { %2706 = vmatprep.subr.bf16.mxu0 %v2705_v63  ;;  %v2055_v25 = vpop.permute.xlu1 %2054  ;;  %v2805_v63 = vld [vmem:[#allocation2 + $0xc] ss:$0 sps:$4 sm:$0xff]  }
 0x6aa   : > { %v1944_v53 = vld [vmem:[#allocation3 + $0x20] sm:$0xff]  ;;  %2432 = vrot.lane.b32.xlu1 %v2805_v63, %s2896_s23 }
 0x6ab   : > { %v2088_v4 = vpop.permute.xlu0 %2087  ;;  %v2707_v28 = vpack.c.bf16 %v1946_v3, %v1944_v53  ;;  %2123 = vst [vmem:[#allocation3 + $0x20] sm:$0xf] %v3461_v37 }
 0x6ad   : > { %2708 = vmatpush1.bf16.msra.mxu0 %v2707_v28  ;;  %v2073_v44 = vpop.permute.xlu1 %2072 }
 0x6ae   : > { %v2075_v17 = vsel %vm487_vm8, %v2071_v13, %v2073_v44  ;;  %1961 = vmatprep.subr.mxu0 %v1949_v5 }
 0x6af   : > { %2079 = vst [vmem:[#allocation3 + $0x8] sm:$0xf0] %v2075_v17  ;;  %v2053_v6 = vpop.permute.xlu0 %2052 }
 0x6b0   : > { %v2056_v7 = vsel %vm468_vm6, %v2051_v60, %v2053_v6  ;;  %v2057_v9 = vsel %vm468_vm6, %v2053_v6, %v2055_v25  ;;  %v2649_v60 = vld [vmem:[%s3709_s3 + $0xc] sm:$0xf] }
 0x6b1   : > { %2060 = vst [vmem:[#allocation3] sm:$0xf] %v2056_v7  ;;  %2061 = vst [vmem:[#allocation3 + $0x8] sm:$0xf] %v2057_v9  ;;  %1962 = vmatpush1.msra.mxu0 %v1948_v51  ;;  %v2092_v10 = vpop.permute.xlu1 %2091 }
 0x6b3   : > { %v2090_v12 = vpop.permute.xlu0 %2089 }
 0x6b4   : > { %v2093_v37 = vsel %vm515_vm5, %v2088_v4, %v2090_v12  ;;  %v2094_v14 = vsel %vm515_vm5, %v2090_v12, %v2092_v10 }
 0x6b5   : > { %2097 = vst [vmem:[#allocation3 + $0x10] sm:$0xf] %v2093_v37  ;;  %2098 = vst [vmem:[#allocation3 + $0x18] sm:$0xf] %v2094_v14  ;;  %v2069_v15 = vpop.permute.xlu1 %2068 }
 0x6b6   : > { %v2074_v21 = vsel %vm487_vm8, %v2069_v15, %v2071_v13 }
 0x6b7   : > { %2078 = vst [vmem:[#allocation3] sm:$0xf0] %v2074_v21  ;;  %v2153_v62 = vpop.permute.xlu0 %2152 }
 0x6b8   : > { %v2202_v20 = vld [vmem:[#allocation3 + $0x8] sm:$0xff] }
 0x6b9   : > { %v2136_v18 = vpop.permute.xlu1 %2135 }
 0x6ba   : > { %v2140_v22 = vsel %vm527_vm1, %v2136_v18, %v3543_v57 }
 0x6bb   : > { %2144 = vst [vmem:[#allocation3 + $0x28] sm:$0xf0] %v2140_v22  ;;  %v2192_v24 = vpop.permute.xlu0 %2191 }
 0x6bd   : > { %v2112_v19 = vpop.permute.xlu1 %2111 }
 0x6be   : > { %v2114_v8 = vsel %vm543_vm4, %v2110_v49, %v2112_v19  ;;  %v2201_v35 = vld [vmem:[#allocation3] sm:$0xff] }
 0x6bf   : > { %2118 = vst [vmem:[#allocation3 + $0x18] sm:$0xf0] %v2114_v8  ;;  %v2190_v26 = vpop.permute.xlu0 %2189 }
 0x6c0   : > { %v2195_v27 = vsel %vm453_vm2, %v2190_v26, %v2192_v24  ;;  %v2441_v26 = vld [vmem:[#allocation2 + $0xc] sm:$0xf] }
 0x6c1   : > { %2199 = vst [vmem:[#allocation3 + $0x40] sm:$0xf] %v2195_v27  ;;  %v2108_v29 = vpop.permute.xlu1 %2107  ;;  %v2443_v27 = vmul.f32 %v2441_v26, %v3079_v61 }
 0x6c2   : > { %v2113_v30 = vsel %vm543_vm4, %v2108_v29, %v2110_v49  ;;  %v2206_v43 = vld [vmem:[#allocation3 + $0x28] sm:$0xff]  ;;  %v433_v29 = vld [vmem:[%s3712_s6] sm:$0xff] }
 0x6c3   : > { %2117 = vst [vmem:[#allocation3 + $0x10] sm:$0xf0] %v2113_v30 }
 0x6c5   : > { %v2155_v31 = vpop.permute.xlu1 %2154 }
 0x6c6   : > { %v2158_v23 = vsel %vm500_vm3, %v2153_v62, %v2155_v31  ;;  %v2159_v57 = vsel %vm500_vm3, %v2155_v31, %v3546_v11  ;;  %v2204_v16 = vld [vmem:[#allocation3 + $0x18] sm:$0xff] }
 0x6c7   : > { %2162 = vst [vmem:[#allocation3 + $0x30] sm:$0xf] %v2158_v23  ;;  %2163 = vst [vmem:[#allocation3 + $0x38] sm:$0xf] %v2159_v57  ;;  %v2709_v32 = vpack.c.bf16 %v2204_v16, %v2202_v20 }
 0x6c9   : > { %2710 = vmatprep.subr.bf16.mxu1 %v2709_v32  ;;  %v2134_v33 = vpop.permute.xlu1 %2133 }
 0x6ca   : > { %v2139_v34 = vsel %vm527_vm1, %v2134_v33, %v2136_v18  ;;  %v2203_v13 = vld [vmem:[#allocation3 + $0x10] sm:$0xff] }
 0x6cb   : > { %2143 = vst [vmem:[#allocation3 + $0x20] sm:$0xf0] %v2139_v34  ;;  %v2711_v38 = vpack.c.bf16 %v2203_v13, %v2201_v35 }
 0x6cd   : > { %2712 = vmatpush1.bf16.msra.mxu1 %v2711_v38  ;;  %v2171_v39 = vpop.permute.xlu1 %2170 }
 0x6ce   : > { %v2176_v42 = vsel %vm619_vm7, %v2171_v39, %v3569_v55  ;;  %v2208_v11 = vld [vmem:[#allocation3 + $0x38] sm:$0xff]  ;;  %v2209_v55 = vld [vmem:[#allocation3 + $0x40] sm:$0xff] }
 0x6cf   : > { %2180 = vst [vmem:[#allocation3 + $0x30] sm:$0xf0] %v2176_v42  ;;  %v2713_v46 = vpack.c.bf16 %v2208_v11, %v2206_v43 }
 0x6d1   : > { %2714 = vmatprep.subr.bf16.mxu1 %v2713_v46  ;;  %v2194_v47 = vpop.permute.xlu1 %2193 }
 0x6d2   : > { %v2196_v49 = vsel %vm453_vm2, %v2192_v24, %v2194_v47  ;;  %v2205_v52 = vld [vmem:[#allocation3 + $0x20] sm:$0xff] }
 0x6d3   : > { %2200 = vst [vmem:[#allocation3 + $0x48] sm:$0xf] %v2196_v49 }
 0x6d6   : > { %v2207_v36 = vld [vmem:[#allocation3 + $0x30] sm:$0xff] }
 0x6d7   : > { %v2715_v54 = vpack.c.bf16 %v2207_v36, %v2205_v52 }
 0x6d9   : > { %2716 = vmatpush1.bf16.msra.mxu1 %v2715_v54 }
 0x6da   : > { %v2210_v58 = vld [vmem:[#allocation3 + $0x48] sm:$0xff] }
 0x6db   : > { %2229 = vmatprep.subr.mxu1 %v2210_v58 }
 0x6dd   : > { %2230 = vmatpush1.msra.mxu1 %v2209_v55 }
 0x6de   : > { %2651 = vmatmul.mubr.msk.f32.vlgmr.msra.gmra.mrb[6].mxu1 %vm667_vm9, %v2649_v60 }
 0x6e2   : > { %v2216_v25 = vpop.permute.xlu1 %2215 }
 0x7b1   : > { %v2287_v53 = vpop.f32.mrb[6].mxu1 }
 0x7b2   : > { %v2288_v3 = vadd.f32 %v2287_v53, %v2216_v25  ;;  %v2289_v4 = vpop.f32.mrb[7].mxu1 }
 0x7b3   : > { %v2290_v28 = vadd.f32 %v2289_v4, %v2216_v25 }
 0x7b4   : > { %v2292_v44 = vmax.f32 %v2288_v3, 0.0 }
 0x7b5   : > { %v2293_v5 = vmax.f32 %v2290_v28, 0.0 }
 0x7b7   : > { %v2298_v17 = vcombine.low %v2292_v44, %v2293_v5  ;;  %v2822_v6 = vcombine.low %v2293_v5, %v2293_v5 }
 0x7b9   : > { %2300 = vst [vmem:[#allocation2 + $0x4] sm:$0xff] %v2298_v17  ;;  %2381 = vst [vmem:[#allocation3 + $0x20] sm:$0xf] %v2298_v17  ;;  %v2442_v24 = vmul.f32 %v2298_v17, %v3091_v1  ;;  %v2823_v1 = vcombine.low %v2292_v44, %v2292_v44 }
 0x7ba   : > { %2382 = vst [vmem:[#allocation3 + $0x28] sm:$0xf] %v2822_v6 }
 0x7bb   : > { %v2446_v19 = vcombine.high %v2442_v24, %v2442_v24 }
 0x7c0   : > { %v2320_v7 = vld [vmem:[#allocation2] sm:$0xff]  ;;  %v2302_v9 = vld [vmem:[#allocation2 + $0x8] sm:$0xf] }
 0x7c1   : > { %2328 = vrot.lane.b32.xlu0 %v2320_v7, %s2897_s24  ;;  %v2304_v51 = vmul.f32 %v2302_v9, %v3042_v40  ;;  %v2807_v10 = vld [vmem:[#allocation2 + $0x8] ss:$0 sps:$4 sm:$0xff]   ;;  %v2359_v37 = vmul.f32 %v2320_v7, %v3051_v45  ;;  %v2303_v21 = vmul.f32 %v2320_v7, %v3060_v50  ;;  %v2324_v40 = vcombine.low %v2320_v7, %v2320_v7 }
 0x7c2   : > { %v2339_v12 = vld [vmem:[#allocation2 + $0x8] sm:$0xf]  ;;  %v2340_v18 = vmul.f32 %v2320_v7, %v3070_v56 }
 0x7c3   : > { %2312 = vrot.lane.b32.xlu1 %v2304_v51, %s2895_s22  ;;  %v2341_v14 = vmul.f32 %v2339_v12, %v3054_v48  ;;  %v2358_v15 = vld [vmem:[#allocation2 + $0x8] sm:$0xf]  ;;  %v2385_v48 = vmul.f32 %v2298_v17, %v3076_v59  ;;  %v2363_v22 = vcombine.low %v2359_v37, %v2359_v37  ;;  %v2307_v50 = vcombine.high %v2303_v21, %v2303_v21  ;;  %v2647_v59 = vld [vmem:[%s3711_s5 + $0x10] sm:$0xff] }
 0x7c4   : > { %v2360_v62 = vmul.f32 %v2358_v15, %v3044_v41  ;;  %v2405_v41 = vmul.f32 %v2298_v17, %v3087_v0  ;;  %v2344_v56 = vcombine.high %v2340_v18, %v2340_v18  ;;  %2648 = vmatmul.mubr.msk.f32.vlgmr.msra.gmra.mrb[4].mxu0 %vm667_vm9, %v2647_v59 }
 0x7c5   : > { %2430 = vrot.lane.b32.xlu0 %v2298_v17, %s2896_s23  ;;  %2536 = vmatprep.mubr.f32.mxu0 %v2888_v2  ;;  %v2389_v0 = vcombine.low %v2385_v48, %v2385_v48  ;;  %v2396_v2 = vpop.permute.xlu1 %2395 }
 0x7c6   : > { %v2364_v45 = vcombine.low %v2360_v62, %v2360_v62  ;;  %v2409_v8 = vcombine.high %v2405_v41, %v2405_v41 }
 0x7c7   : > { %2330 = vrot.lane.b32.xlu1 %v2807_v10, %s2897_s24 }
 0x7c9   : > { %2367 = vrot.lane.b32.xlu0 %v2359_v37, %s2894_s21  ;;  %v2415_v30 = vpop.permute.xlu1 %2414 }
 0x7cb   : > { %2349 = vrot.lane.b32.xlu1 %v2341_v14, %s2893_s20 }
 0x7cd   : > { %2308 = vrot.lane.b32.xlu0 %v2303_v21, %s2895_s22  ;;  %v2433_v31 = vpop.permute.xlu1 %2432 }
 0x7cf   : > { %2326 = vrot.lane.b32.xlu1 %v2324_v40, %s2897_s24 }
 0x7d1   : > { %2345 = vrot.lane.b32.xlu0 %v2340_v18, %s2893_s20 }
 0x7d3   : > { %2369 = vrot.lane.b32.xlu1 %v2364_v45, %s2894_s21 }
 0x7d5   : > { %2393 = vrot.lane.b32.xlu0 %v2385_v48, %s2892_s19 }
 0x7d7   : > { %2365 = vrot.lane.b32.xlu1 %v2363_v22, %s2894_s21 }
 0x7d9   : > { %2310 = vrot.lane.b32.xlu0 %v2307_v50, %s2895_s22 }
 0x7db   : > { %2410 = vrot.lane.b32.xlu1 %v2405_v41, %s2890_s17  ;;  %v2652_v41 = vld [vmem:[%s3711_s5 + $0x18] sm:$0xff] }
 0x7dd   : > { %2347 = vrot.lane.b32.xlu0 %v2344_v56, %s2893_s20 }
 0x7df   : > { %2449 = vrot.lane.b32.xlu1 %v2446_v19, %s2891_s18 }
 0x7e1   : > { %2412 = vrot.lane.b32.xlu0 %v2409_v8, %s2890_s17 }
 0x7e3   : > { %2447 = vrot.lane.b32.xlu1 %v2442_v24, %s2891_s18 }
 0x7e5   : > { %2391 = vrot.lane.b32.xlu0 %v2389_v0, %s2892_s19  ;;  %s296_s19 = sand.u32 1, %s2878_s28   ;;  %v2547_v0 = vld [vmem:[%s3012_s10] sm:$0xff] }
 0x7e6   : > { %s2631_s22 = sshll.u32 %s296_s19, 4  ;;  %s2554_s20 = scalar_lea.sflag [#allocation6], %s296_s19 }
 0x7e7   : > { %s298_s26 = scalar_lea.vmem [#allocation5], %s2631_s22 }
 0x7e8   : > { %s2568_s12 = sshll.u32 %s298_s26, 4  ;;  %s3666_s12 = int_to_ptr.vmem [resolvable:$true] %s2568_s12 }
 0x7e9   : > { %2428 = vrot.lane.b32.xlu0 %v2823_v1, %s2896_s23  ;;  %s2660_s23 = sshll.u32 %s2965_s9, 8  ;;  %s2898_s9 = smov [#allocation5]  }
 0x7ea   : > { %s3664_s25 = scalar_lea.hbm %s3714_s8, %s2660_s23  ;;  %s2828_s21 = sshll.u32 %s2898_s9, 4  ;;  %s2829_s21 = int_to_ptr.vmem [resolvable:$false] %s2828_s21 }
 0x7eb   : > { %s2830_s17 = scalar_lea.vmem %s2829_s21, 512  ;;  %p2831_p0 = scmp.lt.s32.totalorder %s3666_s12, %s2829_s21 }
 0x7ed   : > { %2451 = vrot.lane.b32.xlu0 %v2443_v27, %s2891_s18  ;;  %v2548_v27 = vld [vmem:[%s3012_s10 + $0x8] sm:$0xff]  ;;  %s2824_s10 = scalar_lea.vmem %s3666_s12, 256 }
 0x7ee   : > { %p2825_p11 = scmp.ne.s32.totalorder %s3666_s12, %s2824_s10  ;;  %p2832_p1 = scmp.lt.s32.totalorder %s2830_s17, %s2824_s10 }
 0x7f0   : > { %p2826_p12 = pnand %p2825_p11, %p2982_p5  ;;  %p2833_p2 = por %p2832_p1, %p2831_p0 }
 0x7f1   : > { %436 = vperm.xlu0 %2782, %v433_v29  }
 0x7f2   : > { %p2827_p13 = pneg %p2826_p12 }
 0x7f4   : > { %p2834_p3 = pnand %p2833_p2, %p2827_p13 }
 0x833   : > { %v2329_v23 = vpop.permute.xlu0 %2328 }
 0x835   : > { %v2313_v57 = vpop.permute.xlu1 %2312 }
 0x837   : > { %v2431_v20 = vpop.permute.xlu0 %2430 }
 0x838   : > { %v2435_v16 = vsel %vm619_vm7, %v2431_v20, %v2433_v31 }
 0x839   : > { %2439 = vst [vmem:[#allocation3 + $0x38] sm:$0xf0] %v2435_v16  ;;  %v2331_v32 = vpop.permute.xlu1 %2330 }
 0x83a   : > { %v2333_v33 = vsel %vm487_vm8, %v2329_v23, %v2331_v32 }
 0x83b   : > { %2337 = vst [vmem:[#allocation3 + $0x8] sm:$0xf0] %v2333_v33  ;;  %v2368_v61 = vpop.permute.xlu0 %2367 }
 0x83d   : > { %v2350_v34 = vpop.permute.xlu1 %2349 }
 0x83f   : > { %v2309_v35 = vpop.permute.xlu0 %2308 }
 0x841   : > { %v2327_v13 = vpop.permute.xlu1 %2326 }
 0x842   : > { %v2332_v38 = vsel %vm487_vm8, %v2327_v13, %v2329_v23 }
 0x843   : > { %2336 = vst [vmem:[#allocation3] sm:$0xf0] %v2332_v38  ;;  %v2346_v39 = vpop.permute.xlu0 %2345 }
 0x845   : > { %v2370_v42 = vpop.permute.xlu1 %2369 }
 0x846   : > { %v2372_v43 = vsel %vm543_vm4, %v2368_v61, %v2370_v42 }
 0x847   : > { %2376 = vst [vmem:[#allocation3 + $0x18] sm:$0xf0] %v2372_v43  ;;  %v2394_v11 = vpop.permute.xlu0 %2393 }
 0x848   : > { %v2398_v46 = vsel %vm527_vm1, %v2394_v11, %v2396_v2 }
 0x849   : > { %2402 = vst [vmem:[#allocation3 + $0x28] sm:$0xf0] %v2398_v46  ;;  %v2366_v47 = vpop.permute.xlu1 %2365 }
 0x84a   : > { %v2371_v49 = vsel %vm543_vm4, %v2366_v47, %v2368_v61 }
 0x84b   : > { %2375 = vst [vmem:[#allocation3 + $0x10] sm:$0xf0] %v2371_v49  ;;  %v2311_v52 = vpop.permute.xlu0 %2310 }
 0x84c   : > { %v2314_v36 = vsel %vm468_vm6, %v2309_v35, %v2311_v52  ;;  %v2315_v54 = vsel %vm468_vm6, %v2311_v52, %v2313_v57 }
 0x84d   : > { %2318 = vst [vmem:[#allocation3] sm:$0xf] %v2314_v36  ;;  %2319 = vst [vmem:[#allocation3 + $0x8] sm:$0xf] %v2315_v54  ;;  %v2411_v58 = vpop.permute.xlu1 %2410 }
 0x84f   : > { %v2348_v60 = vpop.permute.xlu0 %2347 }
 0x850   : > { %v2351_v55 = vsel %vm515_vm5, %v2346_v39, %v2348_v60  ;;  %v2352_v63 = vsel %vm515_vm5, %v2348_v60, %v2350_v34  ;;  %v2464_v15 = vld [vmem:[#allocation3 + $0x28] sm:$0xff] }
 0x851   : > { %2355 = vst [vmem:[#allocation3 + $0x10] sm:$0xf] %v2351_v55  ;;  %2356 = vst [vmem:[#allocation3 + $0x18] sm:$0xf] %v2352_v63  ;;  %v2450_v25 = vpop.permute.xlu1 %2449 }
 0x853   : > { %v2413_v53 = vpop.permute.xlu0 %2412 }
 0x854   : > { %v2416_v3 = vsel %vm500_vm3, %v2411_v58, %v2413_v53  ;;  %v2417_v4 = vsel %vm500_vm3, %v2413_v53, %v2415_v30  ;;  %v2460_v17 = vld [vmem:[#allocation3 + $0x8] sm:$0xff]  ;;  %v2459_v9 = vld [vmem:[#allocation3] sm:$0xff] }
 0x855   : > { %2420 = vst [vmem:[#allocation3 + $0x30] sm:$0xf] %v2416_v3  ;;  %2421 = vst [vmem:[#allocation3 + $0x38] sm:$0xf] %v2417_v4  ;;  %v2448_v28 = vpop.permute.xlu1 %2447 }
 0x856   : > { %v2453_v44 = vsel %vm453_vm2, %v2448_v28, %v2450_v25 }
 0x857   : > { %2457 = vst [vmem:[#allocation3 + $0x40] sm:$0xf] %v2453_v44  ;;  %v2392_v5 = vpop.permute.xlu0 %2391 }
 0x858   : > { %v2397_v6 = vsel %vm527_vm1, %v2392_v5, %v2394_v11  ;;  %v2462_v7 = vld [vmem:[#allocation3 + $0x18] sm:$0xff]  ;;  %v2461_v51 = vld [vmem:[#allocation3 + $0x10] sm:$0xff] }
 0x859   : > { %2401 = vst [vmem:[#allocation3 + $0x20] sm:$0xf0] %v2397_v6  ;;  %v2717_v10 = vpack.c.bf16 %v2462_v7, %v2460_v17  ;;  %v2719_v12 = vpack.c.bf16 %v2461_v51, %v2459_v9 }
 0x85b   : > { %v2429_v37 = vpop.permute.xlu0 %2428  ;;  %2718 = vmatprep.subr.bf16.mxu0 %v2717_v10 }
 0x85c   : > { %v2434_v14 = vsel %vm619_vm7, %v2429_v37, %v2431_v20  ;;  %2720 = vmatpush1.bf16.msra.mxu0 %v2719_v12  ;;  %v2466_v21 = vld [vmem:[#allocation3 + $0x38] sm:$0xff] }
 0x85d   : > { %2438 = vst [vmem:[#allocation3 + $0x30] sm:$0xf0] %v2434_v14  ;;  %v2721_v40 = vpack.c.bf16 %v2466_v21, %v2464_v15 }
 0x85e   : > { %v2467_v24 = vld [vmem:[#allocation3 + $0x40] sm:$0xff] }
 0x85f   : > { %v2452_v62 = vpop.permute.xlu0 %2451  ;;  %2722 = vmatprep.subr.bf16.mxu0 %v2721_v40 }
 0x860   : > { %v2454_v18 = vsel %vm453_vm2, %v2450_v25, %v2452_v62  ;;  %v2463_v45 = vld [vmem:[#allocation3 + $0x20] sm:$0xff] }
 0x861   : > { %2458 = vst [vmem:[#allocation3 + $0x48] sm:$0xf] %v2454_v18 }
 0x864   : > { %v2465_v48 = vld [vmem:[#allocation3 + $0x30] sm:$0xff] }
 0x865   : > { %v2723_v22 = vpack.c.bf16 %v2465_v48, %v2463_v45 }
 0x867   : > { %2724 = vmatpush1.bf16.msra.mxu0 %v2723_v22 }
 0x868   : > { %v2468_v50 = vld [vmem:[#allocation3 + $0x48] sm:$0xff] }
 0x869   : > { %2480 = vmatprep.subr.mxu0 %v2468_v50 }
 0x86b   : > { %2481 = vmatpush1.msra.mxu0 %v2467_v24 }
 0x86c   : > { %2653 = vmatmul.mubr.msk.f32.vlgmr.msra.gmra.mrb[4].mxu0 %vm667_vm9, %v2652_v41 }
 0x870   : > { %v437_v56 = vpop.permute.xlu0 %436 }
 0x93f   : > { %v2538_v19 = vpop.f32.mrb[4].mxu0 }
 0x940   : > { %v2725_v59 = vadd.f32 %v2538_v19, %v437_v56  ;;  %v2540_v8 = vpop.f32.mrb[5].mxu0 }
 0x941   : > { %v2726_v1 = vadd.f32 %v2540_v8, %v437_v56 }
 0x942   : > { %v2545_v26 = vmul.f32 0.1, %v2725_v59 }
 0x943   : > { %v2546_v29 = vmul.f32 0.1, %v2726_v1 }
 0x944   : > { %v2549_v2 = vadd.f32 %v2547_v0, %v2545_v26 }
 0x945   : > { %v2550_v30 = vadd.f32 %v2548_v27, %v2546_v29 }
 0x946   : > { %2551 = vst [vmem:[%s298_s26] sm:$0xff] %v2549_v2 }
 0x947   : > { %2552 = vst [vmem:[%s298_s26 + $0x8] sm:$0xff] %v2550_v30 }
 0x948   : > { %2837 = shalt.err (!%p2834_p3)
}
 0x949   : > { %s2838_s18 = scalar_lea.hbm %s3664_s25, 256  ;;  %s2842_s23 = scalar_lea.hbm %s3714_s8, 512 }
 0x94a   : > { %p2839_p4 = scmp.ne.s32.totalorder %s3664_s25, %s2838_s18  ;;  %p2843_p9 = scmp.lt.u32.totalorder %s3664_s25, %s3714_s8 }
 0x94b   : > { %p2844_p10 = scmp.lt.u32.totalorder %s2842_s23, %s2838_s18  ;;  %p2846_p12 = scmp.lt.u32.totalorder %s2838_s18, %s3664_s25 }
 0x94c   : > { %p2840_p7 = pnand %p2839_p4, %p2982_p5 }
 0x94d   : > { %p2845_p11 = por %p2844_p10, %p2843_p9 }
 0x94e   : > { %p2841_p8 = pneg %p2840_p7 }
 0x94f   : > { %p2847_p13 = por %p2846_p12, %p2845_p11 }
 0x951   : > { %p2848_p0 = pnand %p2847_p13, %p2841_p8 }
 0x953   : > { %2851 = shalt.err (!%p2848_p0)
}
 0x954   : > { %2733 = dma.vmem_to_hbm [thread:$0]  (%p2982_p5), %s3666_s12, 256, %s3664_s25, %s2554_s20  }
 0x955 PF: > { %p2739_p1 = scmp.ge.s32.totalorder %s2886_s30, 2  ;;  %s2580_s24 = sand.u32 1, %s2874_s27  }
 0x956   : > { %s2581_s10 = scalar_lea.sflag [#allocation6], %s2580_s24 }
 0x957   : > { %p2736_p2 = pnand %p2739_p1, %p2986_p6 }
 0x959   : > { %2869 = dma.done.wait (!%p2736_p2), %s2581_s10, 256  }
 0x95a   : > { %2871 = vsyncadd (!%p2736_p2), %s2581_s10, 4294967040  ;;  %p18_p3 = scmp.ge.s32.totalorder %s2969_s11, 4   ;;  %s3717_s27 = smov %s2878_s28 }
 0x95b   : > { %s3718_s28 = smov %s2882_s29  ;;  %s3719_s29 = smov %s2980_s14 }
 0x95c   : > { %s3720_s30 = smov %s2969_s11  ;;  %20 = sbr.rel (!%p18_p3) target bundleno = 3 (0x3), region = 97 }
 0x963   :  { %2586 = vsyncpa [#allocation6], 1 }
 0x964   :  { %2588 = vsyncpa [#allocation6 + $0x1], 1 }

</bundles_post_ra>
